<compile_context>
chip_gen: v7x
topology: tpu7x:2x2x1
jax: 0.10.0
libtpu: 0.0.40
codegen_flags: <defaults>
</compile_context>

<pallas_src>
import jax
import jax.numpy as jnp
from jax import lax
from jax.experimental import pallas as pl
from jax.experimental.pallas import tpu as pltpu

MAX_LOG2NUM = 16
NEG_SLOPE = 0.05      # matches nn.LeakyReLU(negative_slope=0.05)
BN_EPS = 1e-5
NOUT = 4
NEG_BIG = -1e30


def _leaky_relu(x):
    return jnp.where(x > 0, x, NEG_SLOPE * x)


def _bn_scale_bias(col_sum, col_sumsq, n, gamma, beta):
    """Training-mode BatchNorm folded to one per-channel scale & bias (one pass)."""
    inv_n = 1.0 / n
    mean = col_sum * inv_n
    var = jnp.maximum(col_sumsq * inv_n - mean * mean, 0.0)   # biased batch variance
    scale = gamma * lax.rsqrt(var + BN_EPS)
    bias = beta - mean * scale
    return scale, bias


def policy_cnn_kernel(x_ref, w1_ref, w2_ref, w4_ref, w5_ref, pk_ref, out_ref):
    B = x_ref.shape[0]
    idx = x_ref[...]                                   # [B, 16] int32, column = r*4 + c

    # Packed per-channel vectors: one [10, 128] f32 block, row-sliced here.
    pk = pk_ref[...]
    b1, g1, be1 = pk[0:1, :], pk[1:2, :], pk[2:3, :]
    b2, g2, be2 = pk[3:4, :], pk[4:5, :], pk[5:6, :]
    b4, g4, be4 = pk[6:7, :], pk[7:8, :], pk[8:9, :]   # 64-wide, zero-padded to 128
    b5 = pk[9:10, :]                                   # 4-wide, zero-padded to 128

    # ---- Conv1: 16 -> 128, 2x2 valid, fused-tap im2col, ONE merged dot ----------
    # Tap t occupies im2col columns [16t, 16t+16); one-hot built with a shifted
    # iota-compare (exact in bf16).  The 9 output positions are stacked along M.
    iota64 = lax.broadcasted_iota(jnp.int32, (B, 4 * MAX_LOG2NUM), 1)

    def conv1_im2col(i, j):
        acc = None
        for t, (kh, kw) in enumerate(((0, 0), (0, 1), (1, 0), (1, 1))):
            p = (i + kh) * 4 + (j + kw)
            hit = (idx[:, p:p + 1] + t * MAX_LOG2NUM) == iota64
            acc = hit if acc is None else jnp.logical_or(acc, hit)
        return acc.astype(jnp.bfloat16)                # [B, 64]

    im1 = jnp.concatenate(
        [conv1_im2col(i, j) for i in range(3) for j in range(3)], axis=0)   # [9B, 64]

    z1 = jnp.dot(im1, w1_ref[...], preferred_element_type=jnp.float32) + b1
    z1 = _leaky_relu(z1)                               # [9B, 128] f32
    s1 = jnp.sum(z1, axis=0, keepdims=True)
    q1 = jnp.sum(z1 * z1, axis=0, keepdims=True)
    # BN1: BatchNorm2d(128), stats over N*H*W = 9B values per channel; one FMA apply.
    sc1, bi1 = _bn_scale_bias(s1, q1, float(9 * B), g1, be1)
    h1 = (z1 * sc1 + bi1).astype(jnp.bfloat16)         # [9B, 128] bf16

    # ---- Conv2: 128 -> 128, 2x2 valid, fused-tap im2col, ONE merged dot ---------
    def h1_blk(i, j):                                  # sublane-aligned static slice
        p = i * 3 + j
        return h1[p * B:(p + 1) * B]

    xs = jnp.concatenate(
        [jnp.concatenate([h1_blk(oh + kh, ow + kw)
                          for kh in range(2) for kw in range(2)], axis=1)
         for oh in range(2) for ow in range(2)], axis=0)          # [4B, 512] bf16

    z2 = jnp.dot(xs, w2_ref[...], preferred_element_type=jnp.float32) + b2
    z2 = _leaky_relu(z2)                               # [4B, 128] f32
    s2 = jnp.sum(z2, axis=0, keepdims=True)
    q2 = jnp.sum(z2 * z2, axis=0, keepdims=True)
    # BN2: BatchNorm2d(128), stats over N*H*W = 4B values per channel; one FMA apply.
    sc2, bi2 = _bn_scale_bias(s2, q2, float(4 * B), g2, be2)
    h2 = (z2 * sc2 + bi2).astype(jnp.bfloat16)         # [4B, 128] bf16

    # ---- Lin4 (512 -> 64, lane-padded to 128) + LeakyReLU + BN4 -----------------
    # "Flatten": column = (oh*2+ow)*128 + c; PyTorch's NCHW flatten order is
    # absorbed into the pre-permuted w4 rows, so this is a pure lane concat.
    h2f = jnp.concatenate([h2[p * B:(p + 1) * B] for p in range(4)], axis=1)  # [B,512]
    h4 = jnp.dot(h2f, w4_ref[...], preferred_element_type=jnp.float32) + b4   # [B,128]
    h4 = _leaky_relu(h4)
    s4 = jnp.sum(h4, axis=0, keepdims=True)
    q4 = jnp.sum(h4 * h4, axis=0, keepdims=True)
    sc4, bi4 = _bn_scale_bias(s4, q4, float(B), g4, be4)   # padded lanes stay exactly 0
    h4 = h4 * sc4 + bi4

    # ---- Lin5 (64 -> 4, lane-padded to 128) + LogSoftmax over dim=1 -------------
    logits = jnp.dot(h4, w5_ref[...], preferred_element_type=jnp.float32) + b5  # [B,128]
    lane = lax.broadcasted_iota(jnp.int32, logits.shape, 1)
    logits = jnp.where(lane < NOUT, logits, NEG_BIG)    # mask padded lanes
    m = jnp.max(logits, axis=-1, keepdims=True)
    zc = logits - m
    lse = jnp.log(jnp.sum(jnp.exp(zc), axis=-1, keepdims=True))
    out_ref[...] = zc - lse                             # lane-dense [B, 128] store


def init_params(key):
    """Deterministic parameters in PyTorch-native shapes."""
    ks = jax.random.split(key, 14)

    def u(k, shape, fan_in):
        bound = 1.0 / jnp.sqrt(jnp.float32(fan_in))
        return jax.random.uniform(k, shape, jnp.float32, -bound, bound)

    W1 = u(ks[0], (128, MAX_LOG2NUM, 2, 2), MAX_LOG2NUM * 4)   # Conv1 weight (O,I,kh,kw)
    b1 = u(ks[1], (128,), MAX_LOG2NUM * 4)
    g1 = 1.0 + 0.1 * jax.random.normal(ks[2], (128,), jnp.float32)
    be1 = 0.1 * jax.random.normal(ks[3], (128,), jnp.float32)
    W2 = u(ks[4], (128, 128, 2, 2), 128 * 4)                   # Conv2 weight
    b2 = u(ks[5], (128,), 128 * 4)
    g2 = 1.0 + 0.1 * jax.random.normal(ks[6], (128,), jnp.float32)
    be2 = 0.1 * jax.random.normal(ks[7], (128,), jnp.float32)
    W4 = u(ks[8], (64, 512), 512)                              # Lin4 weight (out,in)
    b4 = u(ks[9], (64,), 512)
    g4 = 1.0 + 0.1 * jax.random.normal(ks[10], (64,), jnp.float32)
    be4 = 0.1 * jax.random.normal(ks[11], (64,), jnp.float32)
    W5 = u(ks[12], (4, 64), 64)                                # Lin5 weight (out,in)
    b5 = u(ks[13], (4,), 64)
    return (W1, b1, g1, be1, W2, b2, g2, be2, W4, b4, g4, be4, W5, b5)


def pack_kernel_params(params):
    """Flatten PyTorch-shaped params into the kernel's matmul layouts (glue)."""
    (W1, b1, g1, be1, W2, b2, g2, be2, W4, b4, g4, be4, W5, b5) = params
    # Conv weights -> [(kh, kw, cin), cout] rows = tap-major / channel-minor,
    # matching the fused-tap im2col column order.  bf16 for the MXU.
    w1f = jnp.transpose(W1, (2, 3, 1, 0)).reshape(4 * MAX_LOG2NUM, 128).astype(jnp.bfloat16)
    w2f = jnp.transpose(W2, (2, 3, 1, 0)).reshape(4 * 128, 128).astype(jnp.bfloat16)
    # Lin4: PyTorch NCHW flatten index is c*4 + (oh*2+ow); kernel columns are
    # (oh*2+ow)*128 + c -> permute rows; pad outputs 64 -> 128 lanes with zeros.
    w4f = jnp.transpose(W4.reshape(64, 128, 2, 2), (2, 3, 1, 0)).reshape(512, 64)
    w4f = jnp.pad(w4f, ((0, 0), (0, 64))).astype(jnp.bfloat16)          # [512, 128]
    # Lin5: [64,4] -> pad to [128,128] (zero rows for padded h4 lanes, zero cols
    # for padded logit lanes, which get masked before log-softmax).  f32 tail.
    w5f = jnp.pad(W5.T, ((0, 64), (0, 128 - NOUT))).astype(jnp.float32)  # [128, 128]

    def pad128(v):
        v = v.astype(jnp.float32)
        return jnp.pad(v, (0, 128 - v.shape[0]))

    # Single packed block of all tiny per-channel vectors: 1 DMA instead of 10.
    pk = jnp.stack([pad128(b1), pad128(g1), pad128(be1),
                    pad128(b2), pad128(g2), pad128(be2),
                    pad128(b4), pad128(g4), pad128(be4),
                    pad128(b5)], axis=0)                                 # [10, 128]
    return (w1f, w2f, w4f, w5f, pk)


@jax.jit
def policy_cnn_forward(stateseq, kparams):
    B = stateseq.shape[0]
    # preprocess(): class index floor(log2(1 + x)); the one-hot itself is built
    # in-kernel, so only B*16 int32 cross HBM.
    logstate = jnp.floor(jnp.log2(1.0 + stateseq.astype(jnp.float32))).astype(jnp.int32)
    idx = logstate.reshape(B, 16)
    flat_in = (idx,) + tuple(kparams)
    out128 = pl.pallas_call(
        policy_cnn_kernel,
        out_shape=jax.ShapeDtypeStruct((B, 128), jnp.float32),   # lane-dense output
        in_specs=[pl.BlockSpec(memory_space=pltpu.MemorySpace.VMEM)] * len(flat_in),
        out_specs=pl.BlockSpec(memory_space=pltpu.MemorySpace.VMEM),
        compiler_params=pltpu.CompilerParams(vmem_limit_bytes=32 * 1024 * 1024),
    )(*flat_in)
    return out128[:, :NOUT]


if __name__ == "__main__":
    key = jax.random.PRNGKey(0)
    kp, kx = jax.random.split(key)

    params = init_params(kp)
    kparams = pack_kernel_params(params)

    # Training-mode BatchNorm needs a real batch; B a multiple of 8 keeps the
    # merged-block sublane slices aligned.
    B = 32
    stateseq = jax.random.randint(kx, (B, 4, 4), 0, 2048, dtype=jnp.int32)

    out = jax.block_until_ready(policy_cnn_forward(stateseq, kparams))

    assert out.shape == (B, NOUT), out.shape
    assert bool(jnp.all(jnp.isfinite(out))), "non-finite log-probs"
    # log-softmax rows must exponentiate to a probability distribution
    row_sums = jnp.sum(jnp.exp(out), axis=-1)
    assert jnp.allclose(row_sums, 1.0, atol=1e-3), row_sums
    print("KERNEL_OK")
</pallas_src>

<mosaic_0001>
module attributes {stable_mosaic.version = 11 : i64} {
  func.func @policy_cnn_kernel(%arg0: memref<32x16xi32, #tpu.memory_space<vmem>>, %arg1: memref<64x128xbf16, #tpu.memory_space<vmem>>, %arg2: memref<512x128xbf16, #tpu.memory_space<vmem>>, %arg3: memref<512x128xbf16, #tpu.memory_space<vmem>>, %arg4: memref<128x128xf32, #tpu.memory_space<vmem>>, %arg5: memref<10x128xf32, #tpu.memory_space<vmem>>, %arg6: memref<32x128xf32, #tpu.memory_space<vmem>>) attributes {dimension_semantics = [], scalar_prefetch = 0 : i64, scratch_operands = 0 : i64, tpu.core_type = #tpu.core_type<tc>} {
    %c0 = arith.constant 0 : index
    %c0_0 = arith.constant 0 : index
    %0 = vector.load %arg0[%c0, %c0_0] : memref<32x16xi32, #tpu.memory_space<vmem>>, vector<32x16xi32>
    %c0_1 = arith.constant 0 : index
    %c0_2 = arith.constant 0 : index
    %1 = vector.load %arg5[%c0_1, %c0_2] : memref<10x128xf32, #tpu.memory_space<vmem>>, vector<10x128xf32>
    %2 = vector.extract_strided_slice %1 {offsets = [0, 0], sizes = [1, 128], strides = [1, 1]} : vector<10x128xf32> to vector<1x128xf32>
    %3 = vector.extract_strided_slice %1 {offsets = [1, 0], sizes = [1, 128], strides = [1, 1]} : vector<10x128xf32> to vector<1x128xf32>
    %4 = vector.extract_strided_slice %1 {offsets = [2, 0], sizes = [1, 128], strides = [1, 1]} : vector<10x128xf32> to vector<1x128xf32>
    %5 = vector.extract_strided_slice %1 {offsets = [3, 0], sizes = [1, 128], strides = [1, 1]} : vector<10x128xf32> to vector<1x128xf32>
    %6 = vector.extract_strided_slice %1 {offsets = [4, 0], sizes = [1, 128], strides = [1, 1]} : vector<10x128xf32> to vector<1x128xf32>
    %7 = vector.extract_strided_slice %1 {offsets = [5, 0], sizes = [1, 128], strides = [1, 1]} : vector<10x128xf32> to vector<1x128xf32>
    %8 = vector.extract_strided_slice %1 {offsets = [6, 0], sizes = [1, 128], strides = [1, 1]} : vector<10x128xf32> to vector<1x128xf32>
    %9 = vector.extract_strided_slice %1 {offsets = [7, 0], sizes = [1, 128], strides = [1, 1]} : vector<10x128xf32> to vector<1x128xf32>
    %10 = vector.extract_strided_slice %1 {offsets = [8, 0], sizes = [1, 128], strides = [1, 1]} : vector<10x128xf32> to vector<1x128xf32>
    %11 = vector.extract_strided_slice %1 {offsets = [9, 0], sizes = [1, 128], strides = [1, 1]} : vector<10x128xf32> to vector<1x128xf32>
    %12 = tpu.iota {dimensions = array<i32: 1>} : vector<32x64xi32>
    %13 = vector.extract_strided_slice %0 {offsets = [0, 0], sizes = [32, 1], strides = [1, 1]} : vector<32x16xi32> to vector<32x1xi32>
    %c0_i32 = arith.constant 0 : i32
    %14 = vector.broadcast %c0_i32 : i32 to vector<32x1xi32>
    %15 = arith.addi %13, %14 : vector<32x1xi32>
    %16 = vector.broadcast %15 : vector<32x1xi32> to vector<32x64xi32>
    %17 = arith.cmpi eq, %16, %12 : vector<32x64xi32>
    %18 = vector.extract_strided_slice %0 {offsets = [0, 1], sizes = [32, 1], strides = [1, 1]} : vector<32x16xi32> to vector<32x1xi32>
    %c16_i32 = arith.constant 16 : i32
    %19 = vector.broadcast %c16_i32 : i32 to vector<32x1xi32>
    %20 = arith.addi %18, %19 : vector<32x1xi32>
    %21 = vector.broadcast %20 : vector<32x1xi32> to vector<32x64xi32>
    %22 = arith.cmpi eq, %21, %12 : vector<32x64xi32>
    %23 = arith.ori %17, %22 : vector<32x64xi1>
    %24 = vector.extract_strided_slice %0 {offsets = [0, 4], sizes = [32, 1], strides = [1, 1]} : vector<32x16xi32> to vector<32x1xi32>
    %c32_i32 = arith.constant 32 : i32
    %25 = vector.broadcast %c32_i32 : i32 to vector<32x1xi32>
    %26 = arith.addi %24, %25 : vector<32x1xi32>
    %27 = vector.broadcast %26 : vector<32x1xi32> to vector<32x64xi32>
    %28 = arith.cmpi eq, %27, %12 : vector<32x64xi32>
    %29 = arith.ori %23, %28 : vector<32x64xi1>
    %30 = vector.extract_strided_slice %0 {offsets = [0, 5], sizes = [32, 1], strides = [1, 1]} : vector<32x16xi32> to vector<32x1xi32>
    %c48_i32 = arith.constant 48 : i32
    %31 = vector.broadcast %c48_i32 : i32 to vector<32x1xi32>
    %32 = arith.addi %30, %31 : vector<32x1xi32>
    %33 = vector.broadcast %32 : vector<32x1xi32> to vector<32x64xi32>
    %34 = arith.cmpi eq, %33, %12 : vector<32x64xi32>
    %35 = arith.ori %29, %34 : vector<32x64xi1>
    %36 = arith.extui %35 : vector<32x64xi1> to vector<32x64xi32>
    %37 = arith.sitofp %36 : vector<32x64xi32> to vector<32x64xf32>
    %38 = arith.truncf %37 : vector<32x64xf32> to vector<32x64xbf16>
    %39 = vector.extract_strided_slice %0 {offsets = [0, 1], sizes = [32, 1], strides = [1, 1]} : vector<32x16xi32> to vector<32x1xi32>
    %c0_i32_3 = arith.constant 0 : i32
    %40 = vector.broadcast %c0_i32_3 : i32 to vector<32x1xi32>
    %41 = arith.addi %39, %40 : vector<32x1xi32>
    %42 = vector.broadcast %41 : vector<32x1xi32> to vector<32x64xi32>
    %43 = arith.cmpi eq, %42, %12 : vector<32x64xi32>
    %44 = vector.extract_strided_slice %0 {offsets = [0, 2], sizes = [32, 1], strides = [1, 1]} : vector<32x16xi32> to vector<32x1xi32>
    %c16_i32_4 = arith.constant 16 : i32
    %45 = vector.broadcast %c16_i32_4 : i32 to vector<32x1xi32>
    %46 = arith.addi %44, %45 : vector<32x1xi32>
    %47 = vector.broadcast %46 : vector<32x1xi32> to vector<32x64xi32>
    %48 = arith.cmpi eq, %47, %12 : vector<32x64xi32>
    %49 = arith.ori %43, %48 : vector<32x64xi1>
    %50 = vector.extract_strided_slice %0 {offsets = [0, 5], sizes = [32, 1], strides = [1, 1]} : vector<32x16xi32> to vector<32x1xi32>
    %c32_i32_5 = arith.constant 32 : i32
    %51 = vector.broadcast %c32_i32_5 : i32 to vector<32x1xi32>
    %52 = arith.addi %50, %51 : vector<32x1xi32>
    %53 = vector.broadcast %52 : vector<32x1xi32> to vector<32x64xi32>
    %54 = arith.cmpi eq, %53, %12 : vector<32x64xi32>
    %55 = arith.ori %49, %54 : vector<32x64xi1>
    %56 = vector.extract_strided_slice %0 {offsets = [0, 6], sizes = [32, 1], strides = [1, 1]} : vector<32x16xi32> to vector<32x1xi32>
    %c48_i32_6 = arith.constant 48 : i32
    %57 = vector.broadcast %c48_i32_6 : i32 to vector<32x1xi32>
    %58 = arith.addi %56, %57 : vector<32x1xi32>
    %59 = vector.broadcast %58 : vector<32x1xi32> to vector<32x64xi32>
    %60 = arith.cmpi eq, %59, %12 : vector<32x64xi32>
    %61 = arith.ori %55, %60 : vector<32x64xi1>
    %62 = arith.extui %61 : vector<32x64xi1> to vector<32x64xi32>
    %63 = arith.sitofp %62 : vector<32x64xi32> to vector<32x64xf32>
    %64 = arith.truncf %63 : vector<32x64xf32> to vector<32x64xbf16>
    %65 = vector.extract_strided_slice %0 {offsets = [0, 2], sizes = [32, 1], strides = [1, 1]} : vector<32x16xi32> to vector<32x1xi32>
    %c0_i32_7 = arith.constant 0 : i32
    %66 = vector.broadcast %c0_i32_7 : i32 to vector<32x1xi32>
    %67 = arith.addi %65, %66 : vector<32x1xi32>
    %68 = vector.broadcast %67 : vector<32x1xi32> to vector<32x64xi32>
    %69 = arith.cmpi eq, %68, %12 : vector<32x64xi32>
    %70 = vector.extract_strided_slice %0 {offsets = [0, 3], sizes = [32, 1], strides = [1, 1]} : vector<32x16xi32> to vector<32x1xi32>
    %c16_i32_8 = arith.constant 16 : i32
    %71 = vector.broadcast %c16_i32_8 : i32 to vector<32x1xi32>
    %72 = arith.addi %70, %71 : vector<32x1xi32>
    %73 = vector.broadcast %72 : vector<32x1xi32> to vector<32x64xi32>
    %74 = arith.cmpi eq, %73, %12 : vector<32x64xi32>
    %75 = arith.ori %69, %74 : vector<32x64xi1>
    %76 = vector.extract_strided_slice %0 {offsets = [0, 6], sizes = [32, 1], strides = [1, 1]} : vector<32x16xi32> to vector<32x1xi32>
    %c32_i32_9 = arith.constant 32 : i32
    %77 = vector.broadcast %c32_i32_9 : i32 to vector<32x1xi32>
    %78 = arith.addi %76, %77 : vector<32x1xi32>
    %79 = vector.broadcast %78 : vector<32x1xi32> to vector<32x64xi32>
    %80 = arith.cmpi eq, %79, %12 : vector<32x64xi32>
    %81 = arith.ori %75, %80 : vector<32x64xi1>
    %82 = vector.extract_strided_slice %0 {offsets = [0, 7], sizes = [32, 1], strides = [1, 1]} : vector<32x16xi32> to vector<32x1xi32>
    %c48_i32_10 = arith.constant 48 : i32
    %83 = vector.broadcast %c48_i32_10 : i32 to vector<32x1xi32>
    %84 = arith.addi %82, %83 : vector<32x1xi32>
    %85 = vector.broadcast %84 : vector<32x1xi32> to vector<32x64xi32>
    %86 = arith.cmpi eq, %85, %12 : vector<32x64xi32>
    %87 = arith.ori %81, %86 : vector<32x64xi1>
    %88 = arith.extui %87 : vector<32x64xi1> to vector<32x64xi32>
    %89 = arith.sitofp %88 : vector<32x64xi32> to vector<32x64xf32>
    %90 = arith.truncf %89 : vector<32x64xf32> to vector<32x64xbf16>
    %91 = vector.extract_strided_slice %0 {offsets = [0, 4], sizes = [32, 1], strides = [1, 1]} : vector<32x16xi32> to vector<32x1xi32>
    %c0_i32_11 = arith.constant 0 : i32
    %92 = vector.broadcast %c0_i32_11 : i32 to vector<32x1xi32>
    %93 = arith.addi %91, %92 : vector<32x1xi32>
    %94 = vector.broadcast %93 : vector<32x1xi32> to vector<32x64xi32>
    %95 = arith.cmpi eq, %94, %12 : vector<32x64xi32>
    %96 = vector.extract_strided_slice %0 {offsets = [0, 5], sizes = [32, 1], strides = [1, 1]} : vector<32x16xi32> to vector<32x1xi32>
    %c16_i32_12 = arith.constant 16 : i32
    %97 = vector.broadcast %c16_i32_12 : i32 to vector<32x1xi32>
    %98 = arith.addi %96, %97 : vector<32x1xi32>
    %99 = vector.broadcast %98 : vector<32x1xi32> to vector<32x64xi32>
    %100 = arith.cmpi eq, %99, %12 : vector<32x64xi32>
    %101 = arith.ori %95, %100 : vector<32x64xi1>
    %102 = vector.extract_strided_slice %0 {offsets = [0, 8], sizes = [32, 1], strides = [1, 1]} : vector<32x16xi32> to vector<32x1xi32>
    %c32_i32_13 = arith.constant 32 : i32
    %103 = vector.broadcast %c32_i32_13 : i32 to vector<32x1xi32>
    %104 = arith.addi %102, %103 : vector<32x1xi32>
    %105 = vector.broadcast %104 : vector<32x1xi32> to vector<32x64xi32>
    %106 = arith.cmpi eq, %105, %12 : vector<32x64xi32>
    %107 = arith.ori %101, %106 : vector<32x64xi1>
    %108 = vector.extract_strided_slice %0 {offsets = [0, 9], sizes = [32, 1], strides = [1, 1]} : vector<32x16xi32> to vector<32x1xi32>
    %c48_i32_14 = arith.constant 48 : i32
    %109 = vector.broadcast %c48_i32_14 : i32 to vector<32x1xi32>
    %110 = arith.addi %108, %109 : vector<32x1xi32>
    %111 = vector.broadcast %110 : vector<32x1xi32> to vector<32x64xi32>
    %112 = arith.cmpi eq, %111, %12 : vector<32x64xi32>
    %113 = arith.ori %107, %112 : vector<32x64xi1>
    %114 = arith.extui %113 : vector<32x64xi1> to vector<32x64xi32>
    %115 = arith.sitofp %114 : vector<32x64xi32> to vector<32x64xf32>
    %116 = arith.truncf %115 : vector<32x64xf32> to vector<32x64xbf16>
    %117 = vector.extract_strided_slice %0 {offsets = [0, 5], sizes = [32, 1], strides = [1, 1]} : vector<32x16xi32> to vector<32x1xi32>
    %c0_i32_15 = arith.constant 0 : i32
    %118 = vector.broadcast %c0_i32_15 : i32 to vector<32x1xi32>
    %119 = arith.addi %117, %118 : vector<32x1xi32>
    %120 = vector.broadcast %119 : vector<32x1xi32> to vector<32x64xi32>
    %121 = arith.cmpi eq, %120, %12 : vector<32x64xi32>
    %122 = vector.extract_strided_slice %0 {offsets = [0, 6], sizes = [32, 1], strides = [1, 1]} : vector<32x16xi32> to vector<32x1xi32>
    %c16_i32_16 = arith.constant 16 : i32
    %123 = vector.broadcast %c16_i32_16 : i32 to vector<32x1xi32>
    %124 = arith.addi %122, %123 : vector<32x1xi32>
    %125 = vector.broadcast %124 : vector<32x1xi32> to vector<32x64xi32>
    %126 = arith.cmpi eq, %125, %12 : vector<32x64xi32>
    %127 = arith.ori %121, %126 : vector<32x64xi1>
    %128 = vector.extract_strided_slice %0 {offsets = [0, 9], sizes = [32, 1], strides = [1, 1]} : vector<32x16xi32> to vector<32x1xi32>
    %c32_i32_17 = arith.constant 32 : i32
    %129 = vector.broadcast %c32_i32_17 : i32 to vector<32x1xi32>
    %130 = arith.addi %128, %129 : vector<32x1xi32>
    %131 = vector.broadcast %130 : vector<32x1xi32> to vector<32x64xi32>
    %132 = arith.cmpi eq, %131, %12 : vector<32x64xi32>
    %133 = arith.ori %127, %132 : vector<32x64xi1>
    %134 = vector.extract_strided_slice %0 {offsets = [0, 10], sizes = [32, 1], strides = [1, 1]} : vector<32x16xi32> to vector<32x1xi32>
    %c48_i32_18 = arith.constant 48 : i32
    %135 = vector.broadcast %c48_i32_18 : i32 to vector<32x1xi32>
    %136 = arith.addi %134, %135 : vector<32x1xi32>
    %137 = vector.broadcast %136 : vector<32x1xi32> to vector<32x64xi32>
    %138 = arith.cmpi eq, %137, %12 : vector<32x64xi32>
    %139 = arith.ori %133, %138 : vector<32x64xi1>
    %140 = arith.extui %139 : vector<32x64xi1> to vector<32x64xi32>
    %141 = arith.sitofp %140 : vector<32x64xi32> to vector<32x64xf32>
    %142 = arith.truncf %141 : vector<32x64xf32> to vector<32x64xbf16>
    %143 = vector.extract_strided_slice %0 {offsets = [0, 6], sizes = [32, 1], strides = [1, 1]} : vector<32x16xi32> to vector<32x1xi32>
    %c0_i32_19 = arith.constant 0 : i32
    %144 = vector.broadcast %c0_i32_19 : i32 to vector<32x1xi32>
    %145 = arith.addi %143, %144 : vector<32x1xi32>
    %146 = vector.broadcast %145 : vector<32x1xi32> to vector<32x64xi32>
    %147 = arith.cmpi eq, %146, %12 : vector<32x64xi32>
    %148 = vector.extract_strided_slice %0 {offsets = [0, 7], sizes = [32, 1], strides = [1, 1]} : vector<32x16xi32> to vector<32x1xi32>
    %c16_i32_20 = arith.constant 16 : i32
    %149 = vector.broadcast %c16_i32_20 : i32 to vector<32x1xi32>
    %150 = arith.addi %148, %149 : vector<32x1xi32>
    %151 = vector.broadcast %150 : vector<32x1xi32> to vector<32x64xi32>
    %152 = arith.cmpi eq, %151, %12 : vector<32x64xi32>
    %153 = arith.ori %147, %152 : vector<32x64xi1>
    %154 = vector.extract_strided_slice %0 {offsets = [0, 10], sizes = [32, 1], strides = [1, 1]} : vector<32x16xi32> to vector<32x1xi32>
    %c32_i32_21 = arith.constant 32 : i32
    %155 = vector.broadcast %c32_i32_21 : i32 to vector<32x1xi32>
    %156 = arith.addi %154, %155 : vector<32x1xi32>
    %157 = vector.broadcast %156 : vector<32x1xi32> to vector<32x64xi32>
    %158 = arith.cmpi eq, %157, %12 : vector<32x64xi32>
    %159 = arith.ori %153, %158 : vector<32x64xi1>
    %160 = vector.extract_strided_slice %0 {offsets = [0, 11], sizes = [32, 1], strides = [1, 1]} : vector<32x16xi32> to vector<32x1xi32>
    %c48_i32_22 = arith.constant 48 : i32
    %161 = vector.broadcast %c48_i32_22 : i32 to vector<32x1xi32>
    %162 = arith.addi %160, %161 : vector<32x1xi32>
    %163 = vector.broadcast %162 : vector<32x1xi32> to vector<32x64xi32>
    %164 = arith.cmpi eq, %163, %12 : vector<32x64xi32>
    %165 = arith.ori %159, %164 : vector<32x64xi1>
    %166 = arith.extui %165 : vector<32x64xi1> to vector<32x64xi32>
    %167 = arith.sitofp %166 : vector<32x64xi32> to vector<32x64xf32>
    %168 = arith.truncf %167 : vector<32x64xf32> to vector<32x64xbf16>
    %169 = vector.extract_strided_slice %0 {offsets = [0, 8], sizes = [32, 1], strides = [1, 1]} : vector<32x16xi32> to vector<32x1xi32>
    %c0_i32_23 = arith.constant 0 : i32
    %170 = vector.broadcast %c0_i32_23 : i32 to vector<32x1xi32>
    %171 = arith.addi %169, %170 : vector<32x1xi32>
    %172 = vector.broadcast %171 : vector<32x1xi32> to vector<32x64xi32>
    %173 = arith.cmpi eq, %172, %12 : vector<32x64xi32>
    %174 = vector.extract_strided_slice %0 {offsets = [0, 9], sizes = [32, 1], strides = [1, 1]} : vector<32x16xi32> to vector<32x1xi32>
    %c16_i32_24 = arith.constant 16 : i32
    %175 = vector.broadcast %c16_i32_24 : i32 to vector<32x1xi32>
    %176 = arith.addi %174, %175 : vector<32x1xi32>
    %177 = vector.broadcast %176 : vector<32x1xi32> to vector<32x64xi32>
    %178 = arith.cmpi eq, %177, %12 : vector<32x64xi32>
    %179 = arith.ori %173, %178 : vector<32x64xi1>
    %180 = vector.extract_strided_slice %0 {offsets = [0, 12], sizes = [32, 1], strides = [1, 1]} : vector<32x16xi32> to vector<32x1xi32>
    %c32_i32_25 = arith.constant 32 : i32
    %181 = vector.broadcast %c32_i32_25 : i32 to vector<32x1xi32>
    %182 = arith.addi %180, %181 : vector<32x1xi32>
    %183 = vector.broadcast %182 : vector<32x1xi32> to vector<32x64xi32>
    %184 = arith.cmpi eq, %183, %12 : vector<32x64xi32>
    %185 = arith.ori %179, %184 : vector<32x64xi1>
    %186 = vector.extract_strided_slice %0 {offsets = [0, 13], sizes = [32, 1], strides = [1, 1]} : vector<32x16xi32> to vector<32x1xi32>
    %c48_i32_26 = arith.constant 48 : i32
    %187 = vector.broadcast %c48_i32_26 : i32 to vector<32x1xi32>
    %188 = arith.addi %186, %187 : vector<32x1xi32>
    %189 = vector.broadcast %188 : vector<32x1xi32> to vector<32x64xi32>
    %190 = arith.cmpi eq, %189, %12 : vector<32x64xi32>
    %191 = arith.ori %185, %190 : vector<32x64xi1>
    %192 = arith.extui %191 : vector<32x64xi1> to vector<32x64xi32>
    %193 = arith.sitofp %192 : vector<32x64xi32> to vector<32x64xf32>
    %194 = arith.truncf %193 : vector<32x64xf32> to vector<32x64xbf16>
    %195 = vector.extract_strided_slice %0 {offsets = [0, 9], sizes = [32, 1], strides = [1, 1]} : vector<32x16xi32> to vector<32x1xi32>
    %c0_i32_27 = arith.constant 0 : i32
    %196 = vector.broadcast %c0_i32_27 : i32 to vector<32x1xi32>
    %197 = arith.addi %195, %196 : vector<32x1xi32>
    %198 = vector.broadcast %197 : vector<32x1xi32> to vector<32x64xi32>
    %199 = arith.cmpi eq, %198, %12 : vector<32x64xi32>
    %200 = vector.extract_strided_slice %0 {offsets = [0, 10], sizes = [32, 1], strides = [1, 1]} : vector<32x16xi32> to vector<32x1xi32>
    %c16_i32_28 = arith.constant 16 : i32
    %201 = vector.broadcast %c16_i32_28 : i32 to vector<32x1xi32>
    %202 = arith.addi %200, %201 : vector<32x1xi32>
    %203 = vector.broadcast %202 : vector<32x1xi32> to vector<32x64xi32>
    %204 = arith.cmpi eq, %203, %12 : vector<32x64xi32>
    %205 = arith.ori %199, %204 : vector<32x64xi1>
    %206 = vector.extract_strided_slice %0 {offsets = [0, 13], sizes = [32, 1], strides = [1, 1]} : vector<32x16xi32> to vector<32x1xi32>
    %c32_i32_29 = arith.constant 32 : i32
    %207 = vector.broadcast %c32_i32_29 : i32 to vector<32x1xi32>
    %208 = arith.addi %206, %207 : vector<32x1xi32>
    %209 = vector.broadcast %208 : vector<32x1xi32> to vector<32x64xi32>
    %210 = arith.cmpi eq, %209, %12 : vector<32x64xi32>
    %211 = arith.ori %205, %210 : vector<32x64xi1>
    %212 = vector.extract_strided_slice %0 {offsets = [0, 14], sizes = [32, 1], strides = [1, 1]} : vector<32x16xi32> to vector<32x1xi32>
    %c48_i32_30 = arith.constant 48 : i32
    %213 = vector.broadcast %c48_i32_30 : i32 to vector<32x1xi32>
    %214 = arith.addi %212, %213 : vector<32x1xi32>
    %215 = vector.broadcast %214 : vector<32x1xi32> to vector<32x64xi32>
    %216 = arith.cmpi eq, %215, %12 : vector<32x64xi32>
    %217 = arith.ori %211, %216 : vector<32x64xi1>
    %218 = arith.extui %217 : vector<32x64xi1> to vector<32x64xi32>
    %219 = arith.sitofp %218 : vector<32x64xi32> to vector<32x64xf32>
    %220 = arith.truncf %219 : vector<32x64xf32> to vector<32x64xbf16>
    %221 = vector.extract_strided_slice %0 {offsets = [0, 10], sizes = [32, 1], strides = [1, 1]} : vector<32x16xi32> to vector<32x1xi32>
    %c0_i32_31 = arith.constant 0 : i32
    %222 = vector.broadcast %c0_i32_31 : i32 to vector<32x1xi32>
    %223 = arith.addi %221, %222 : vector<32x1xi32>
    %224 = vector.broadcast %223 : vector<32x1xi32> to vector<32x64xi32>
    %225 = arith.cmpi eq, %224, %12 : vector<32x64xi32>
    %226 = vector.extract_strided_slice %0 {offsets = [0, 11], sizes = [32, 1], strides = [1, 1]} : vector<32x16xi32> to vector<32x1xi32>
    %c16_i32_32 = arith.constant 16 : i32
    %227 = vector.broadcast %c16_i32_32 : i32 to vector<32x1xi32>
    %228 = arith.addi %226, %227 : vector<32x1xi32>
    %229 = vector.broadcast %228 : vector<32x1xi32> to vector<32x64xi32>
    %230 = arith.cmpi eq, %229, %12 : vector<32x64xi32>
    %231 = arith.ori %225, %230 : vector<32x64xi1>
    %232 = vector.extract_strided_slice %0 {offsets = [0, 14], sizes = [32, 1], strides = [1, 1]} : vector<32x16xi32> to vector<32x1xi32>
    %c32_i32_33 = arith.constant 32 : i32
    %233 = vector.broadcast %c32_i32_33 : i32 to vector<32x1xi32>
    %234 = arith.addi %232, %233 : vector<32x1xi32>
    %235 = vector.broadcast %234 : vector<32x1xi32> to vector<32x64xi32>
    %236 = arith.cmpi eq, %235, %12 : vector<32x64xi32>
    %237 = arith.ori %231, %236 : vector<32x64xi1>
    %238 = vector.extract_strided_slice %0 {offsets = [0, 15], sizes = [32, 1], strides = [1, 1]} : vector<32x16xi32> to vector<32x1xi32>
    %c48_i32_34 = arith.constant 48 : i32
    %239 = vector.broadcast %c48_i32_34 : i32 to vector<32x1xi32>
    %240 = arith.addi %238, %239 : vector<32x1xi32>
    %241 = vector.broadcast %240 : vector<32x1xi32> to vector<32x64xi32>
    %242 = arith.cmpi eq, %241, %12 : vector<32x64xi32>
    %243 = arith.ori %237, %242 : vector<32x64xi1>
    %244 = arith.extui %243 : vector<32x64xi1> to vector<32x64xi32>
    %245 = arith.sitofp %244 : vector<32x64xi32> to vector<32x64xf32>
    %246 = arith.truncf %245 : vector<32x64xf32> to vector<32x64xbf16>
    %247 = tpu.concatenate %38, %64, %90, %116, %142, %168, %194, %220, %246 in 0 : vector<32x64xbf16>, vector<32x64xbf16>, vector<32x64xbf16>, vector<32x64xbf16>, vector<32x64xbf16>, vector<32x64xbf16>, vector<32x64xbf16>, vector<32x64xbf16>, vector<32x64xbf16> -> vector<288x64xbf16>
    %c0_35 = arith.constant 0 : index
    %c0_36 = arith.constant 0 : index
    %248 = vector.load %arg1[%c0_35, %c0_36] : memref<64x128xbf16, #tpu.memory_space<vmem>>, vector<64x128xbf16>
    %cst = arith.constant dense<0.000000e+00> : vector<288x128xf32>
    %249 = tpu.matmul %247, %248, %cst {dimension_numbers = #tpu.dot_dimension_numbers<[1], [0], [0], [1], [0, 0, 1, 1], [], []>} : vector<288x64xbf16>, vector<64x128xbf16>, vector<288x128xf32> -> vector<288x128xf32>
    %250 = vector.broadcast %2 : vector<1x128xf32> to vector<288x128xf32>
    %251 = arith.addf %249, %250 : vector<288x128xf32>
    %cst_37 = arith.constant 0.000000e+00 : f32
    %252 = vector.broadcast %cst_37 : f32 to vector<288x128xf32>
    %253 = arith.cmpf ogt, %251, %252 : vector<288x128xf32>
    %cst_38 = arith.constant 5.000000e-02 : f32
    %254 = vector.broadcast %cst_38 : f32 to vector<288x128xf32>
    %255 = arith.mulf %254, %251 : vector<288x128xf32>
    %256 = arith.select %253, %251, %255 : vector<288x128xi1>, vector<288x128xf32>
    %cst_39 = arith.constant dense<0.000000e+00> : vector<128xf32>
    %257 = vector.multi_reduction <add>, %256, %cst_39 [0] : vector<288x128xf32> to vector<128xf32>
    %258 = vector.shape_cast %257 : vector<128xf32> to vector<1x128xf32>
    %259 = arith.mulf %256, %256 : vector<288x128xf32>
    %cst_40 = arith.constant dense<0.000000e+00> : vector<128xf32>
    %260 = vector.multi_reduction <add>, %259, %cst_40 [0] : vector<288x128xf32> to vector<128xf32>
    %261 = vector.shape_cast %260 : vector<128xf32> to vector<1x128xf32>
    %cst_41 = arith.constant 0.00347222225 : f32
    %262 = vector.broadcast %cst_41 : f32 to vector<1x128xf32>
    %263 = arith.mulf %258, %262 : vector<1x128xf32>
    %cst_42 = arith.constant 0.00347222225 : f32
    %264 = vector.broadcast %cst_42 : f32 to vector<1x128xf32>
    %265 = arith.mulf %261, %264 : vector<1x128xf32>
    %266 = arith.mulf %263, %263 : vector<1x128xf32>
    %267 = arith.subf %265, %266 : vector<1x128xf32>
    %cst_43 = arith.constant 0.000000e+00 : f32
    %268 = vector.broadcast %cst_43 : f32 to vector<1x128xf32>
    %269 = arith.maximumf %267, %268 : vector<1x128xf32>
    %cst_44 = arith.constant 9.99999974E-6 : f32
    %270 = vector.broadcast %cst_44 : f32 to vector<1x128xf32>
    %271 = arith.addf %269, %270 : vector<1x128xf32>
    %272 = math.rsqrt %271 : vector<1x128xf32>
    %273 = arith.mulf %3, %272 : vector<1x128xf32>
    %274 = arith.mulf %263, %273 : vector<1x128xf32>
    %275 = arith.subf %4, %274 : vector<1x128xf32>
    %276 = vector.broadcast %273 : vector<1x128xf32> to vector<288x128xf32>
    %277 = arith.mulf %256, %276 : vector<288x128xf32>
    %278 = vector.broadcast %275 : vector<1x128xf32> to vector<288x128xf32>
    %279 = arith.addf %277, %278 : vector<288x128xf32>
    %280 = arith.truncf %279 : vector<288x128xf32> to vector<288x128xbf16>
    %281 = vector.extract_strided_slice %280 {offsets = [0, 0], sizes = [32, 128], strides = [1, 1]} : vector<288x128xbf16> to vector<32x128xbf16>
    %282 = vector.extract_strided_slice %280 {offsets = [32, 0], sizes = [32, 128], strides = [1, 1]} : vector<288x128xbf16> to vector<32x128xbf16>
    %283 = vector.extract_strided_slice %280 {offsets = [96, 0], sizes = [32, 128], strides = [1, 1]} : vector<288x128xbf16> to vector<32x128xbf16>
    %284 = vector.extract_strided_slice %280 {offsets = [128, 0], sizes = [32, 128], strides = [1, 1]} : vector<288x128xbf16> to vector<32x128xbf16>
    %285 = tpu.concatenate %281, %282, %283, %284 in 1 : vector<32x128xbf16>, vector<32x128xbf16>, vector<32x128xbf16>, vector<32x128xbf16> -> vector<32x512xbf16>
    %286 = vector.extract_strided_slice %280 {offsets = [32, 0], sizes = [32, 128], strides = [1, 1]} : vector<288x128xbf16> to vector<32x128xbf16>
    %287 = vector.extract_strided_slice %280 {offsets = [64, 0], sizes = [32, 128], strides = [1, 1]} : vector<288x128xbf16> to vector<32x128xbf16>
    %288 = vector.extract_strided_slice %280 {offsets = [128, 0], sizes = [32, 128], strides = [1, 1]} : vector<288x128xbf16> to vector<32x128xbf16>
    %289 = vector.extract_strided_slice %280 {offsets = [160, 0], sizes = [32, 128], strides = [1, 1]} : vector<288x128xbf16> to vector<32x128xbf16>
    %290 = tpu.concatenate %286, %287, %288, %289 in 1 : vector<32x128xbf16>, vector<32x128xbf16>, vector<32x128xbf16>, vector<32x128xbf16> -> vector<32x512xbf16>
    %291 = vector.extract_strided_slice %280 {offsets = [96, 0], sizes = [32, 128], strides = [1, 1]} : vector<288x128xbf16> to vector<32x128xbf16>
    %292 = vector.extract_strided_slice %280 {offsets = [128, 0], sizes = [32, 128], strides = [1, 1]} : vector<288x128xbf16> to vector<32x128xbf16>
    %293 = vector.extract_strided_slice %280 {offsets = [192, 0], sizes = [32, 128], strides = [1, 1]} : vector<288x128xbf16> to vector<32x128xbf16>
    %294 = vector.extract_strided_slice %280 {offsets = [224, 0], sizes = [32, 128], strides = [1, 1]} : vector<288x128xbf16> to vector<32x128xbf16>
    %295 = tpu.concatenate %291, %292, %293, %294 in 1 : vector<32x128xbf16>, vector<32x128xbf16>, vector<32x128xbf16>, vector<32x128xbf16> -> vector<32x512xbf16>
    %296 = vector.extract_strided_slice %280 {offsets = [128, 0], sizes = [32, 128], strides = [1, 1]} : vector<288x128xbf16> to vector<32x128xbf16>
    %297 = vector.extract_strided_slice %280 {offsets = [160, 0], sizes = [32, 128], strides = [1, 1]} : vector<288x128xbf16> to vector<32x128xbf16>
    %298 = vector.extract_strided_slice %280 {offsets = [224, 0], sizes = [32, 128], strides = [1, 1]} : vector<288x128xbf16> to vector<32x128xbf16>
    %299 = vector.extract_strided_slice %280 {offsets = [256, 0], sizes = [32, 128], strides = [1, 1]} : vector<288x128xbf16> to vector<32x128xbf16>
    %300 = tpu.concatenate %296, %297, %298, %299 in 1 : vector<32x128xbf16>, vector<32x128xbf16>, vector<32x128xbf16>, vector<32x128xbf16> -> vector<32x512xbf16>
    %301 = tpu.concatenate %285, %290, %295, %300 in 0 : vector<32x512xbf16>, vector<32x512xbf16>, vector<32x512xbf16>, vector<32x512xbf16> -> vector<128x512xbf16>
    %c0_45 = arith.constant 0 : index
    %c0_46 = arith.constant 0 : index
    %302 = vector.load %arg2[%c0_45, %c0_46] : memref<512x128xbf16, #tpu.memory_space<vmem>>, vector<512x128xbf16>
    %cst_47 = arith.constant dense<0.000000e+00> : vector<128x128xf32>
    %303 = tpu.matmul %301, %302, %cst_47 {dimension_numbers = #tpu.dot_dimension_numbers<[1], [0], [0], [1], [0, 0, 1, 1], [], []>} : vector<128x512xbf16>, vector<512x128xbf16>, vector<128x128xf32> -> vector<128x128xf32>
    %304 = vector.broadcast %5 : vector<1x128xf32> to vector<128x128xf32>
    %305 = arith.addf %303, %304 : vector<128x128xf32>
    %cst_48 = arith.constant 0.000000e+00 : f32
    %306 = vector.broadcast %cst_48 : f32 to vector<128x128xf32>
    %307 = arith.cmpf ogt, %305, %306 : vector<128x128xf32>
    %cst_49 = arith.constant 5.000000e-02 : f32
    %308 = vector.broadcast %cst_49 : f32 to vector<128x128xf32>
    %309 = arith.mulf %308, %305 : vector<128x128xf32>
    %310 = arith.select %307, %305, %309 : vector<128x128xi1>, vector<128x128xf32>
    %cst_50 = arith.constant dense<0.000000e+00> : vector<128xf32>
    %311 = vector.multi_reduction <add>, %310, %cst_50 [0] : vector<128x128xf32> to vector<128xf32>
    %312 = vector.shape_cast %311 : vector<128xf32> to vector<1x128xf32>
    %313 = arith.mulf %310, %310 : vector<128x128xf32>
    %cst_51 = arith.constant dense<0.000000e+00> : vector<128xf32>
    %314 = vector.multi_reduction <add>, %313, %cst_51 [0] : vector<128x128xf32> to vector<128xf32>
    %315 = vector.shape_cast %314 : vector<128xf32> to vector<1x128xf32>
    %cst_52 = arith.constant 7.812500e-03 : f32
    %316 = vector.broadcast %cst_52 : f32 to vector<1x128xf32>
    %317 = arith.mulf %312, %316 : vector<1x128xf32>
    %cst_53 = arith.constant 7.812500e-03 : f32
    %318 = vector.broadcast %cst_53 : f32 to vector<1x128xf32>
    %319 = arith.mulf %315, %318 : vector<1x128xf32>
    %320 = arith.mulf %317, %317 : vector<1x128xf32>
    %321 = arith.subf %319, %320 : vector<1x128xf32>
    %cst_54 = arith.constant 0.000000e+00 : f32
    %322 = vector.broadcast %cst_54 : f32 to vector<1x128xf32>
    %323 = arith.maximumf %321, %322 : vector<1x128xf32>
    %cst_55 = arith.constant 9.99999974E-6 : f32
    %324 = vector.broadcast %cst_55 : f32 to vector<1x128xf32>
    %325 = arith.addf %323, %324 : vector<1x128xf32>
    %326 = math.rsqrt %325 : vector<1x128xf32>
    %327 = arith.mulf %6, %326 : vector<1x128xf32>
    %328 = arith.mulf %317, %327 : vector<1x128xf32>
    %329 = arith.subf %7, %328 : vector<1x128xf32>
    %330 = vector.broadcast %327 : vector<1x128xf32> to vector<128x128xf32>
    %331 = arith.mulf %310, %330 : vector<128x128xf32>
    %332 = vector.broadcast %329 : vector<1x128xf32> to vector<128x128xf32>
    %333 = arith.addf %331, %332 : vector<128x128xf32>
    %334 = arith.truncf %333 : vector<128x128xf32> to vector<128x128xbf16>
    %335 = vector.extract_strided_slice %334 {offsets = [0, 0], sizes = [32, 128], strides = [1, 1]} : vector<128x128xbf16> to vector<32x128xbf16>
    %336 = vector.extract_strided_slice %334 {offsets = [32, 0], sizes = [32, 128], strides = [1, 1]} : vector<128x128xbf16> to vector<32x128xbf16>
    %337 = vector.extract_strided_slice %334 {offsets = [64, 0], sizes = [32, 128], strides = [1, 1]} : vector<128x128xbf16> to vector<32x128xbf16>
    %338 = vector.extract_strided_slice %334 {offsets = [96, 0], sizes = [32, 128], strides = [1, 1]} : vector<128x128xbf16> to vector<32x128xbf16>
    %339 = tpu.concatenate %335, %336, %337, %338 in 1 : vector<32x128xbf16>, vector<32x128xbf16>, vector<32x128xbf16>, vector<32x128xbf16> -> vector<32x512xbf16>
    %c0_56 = arith.constant 0 : index
    %c0_57 = arith.constant 0 : index
    %340 = vector.load %arg3[%c0_56, %c0_57] : memref<512x128xbf16, #tpu.memory_space<vmem>>, vector<512x128xbf16>
    %cst_58 = arith.constant dense<0.000000e+00> : vector<32x128xf32>
    %341 = tpu.matmul %339, %340, %cst_58 {dimension_numbers = #tpu.dot_dimension_numbers<[1], [0], [0], [1], [0, 0, 1, 1], [], []>} : vector<32x512xbf16>, vector<512x128xbf16>, vector<32x128xf32> -> vector<32x128xf32>
    %342 = vector.broadcast %8 : vector<1x128xf32> to vector<32x128xf32>
    %343 = arith.addf %341, %342 : vector<32x128xf32>
    %cst_59 = arith.constant 0.000000e+00 : f32
    %344 = vector.broadcast %cst_59 : f32 to vector<32x128xf32>
    %345 = arith.cmpf ogt, %343, %344 : vector<32x128xf32>
    %cst_60 = arith.constant 5.000000e-02 : f32
    %346 = vector.broadcast %cst_60 : f32 to vector<32x128xf32>
    %347 = arith.mulf %346, %343 : vector<32x128xf32>
    %348 = arith.select %345, %343, %347 : vector<32x128xi1>, vector<32x128xf32>
    %cst_61 = arith.constant dense<0.000000e+00> : vector<128xf32>
    %349 = vector.multi_reduction <add>, %348, %cst_61 [0] : vector<32x128xf32> to vector<128xf32>
    %350 = vector.shape_cast %349 : vector<128xf32> to vector<1x128xf32>
    %351 = arith.mulf %348, %348 : vector<32x128xf32>
    %cst_62 = arith.constant dense<0.000000e+00> : vector<128xf32>
    %352 = vector.multi_reduction <add>, %351, %cst_62 [0] : vector<32x128xf32> to vector<128xf32>
    %353 = vector.shape_cast %352 : vector<128xf32> to vector<1x128xf32>
    %cst_63 = arith.constant 3.125000e-02 : f32
    %354 = vector.broadcast %cst_63 : f32 to vector<1x128xf32>
    %355 = arith.mulf %350, %354 : vector<1x128xf32>
    %cst_64 = arith.constant 3.125000e-02 : f32
    %356 = vector.broadcast %cst_64 : f32 to vector<1x128xf32>
    %357 = arith.mulf %353, %356 : vector<1x128xf32>
    %358 = arith.mulf %355, %355 : vector<1x128xf32>
    %359 = arith.subf %357, %358 : vector<1x128xf32>
    %cst_65 = arith.constant 0.000000e+00 : f32
    %360 = vector.broadcast %cst_65 : f32 to vector<1x128xf32>
    %361 = arith.maximumf %359, %360 : vector<1x128xf32>
    %cst_66 = arith.constant 9.99999974E-6 : f32
    %362 = vector.broadcast %cst_66 : f32 to vector<1x128xf32>
    %363 = arith.addf %361, %362 : vector<1x128xf32>
    %364 = math.rsqrt %363 : vector<1x128xf32>
    %365 = arith.mulf %9, %364 : vector<1x128xf32>
    %366 = arith.mulf %355, %365 : vector<1x128xf32>
    %367 = arith.subf %10, %366 : vector<1x128xf32>
    %368 = vector.broadcast %365 : vector<1x128xf32> to vector<32x128xf32>
    %369 = arith.mulf %348, %368 : vector<32x128xf32>
    %370 = vector.broadcast %367 : vector<1x128xf32> to vector<32x128xf32>
    %371 = arith.addf %369, %370 : vector<32x128xf32>
    %c0_67 = arith.constant 0 : index
    %c0_68 = arith.constant 0 : index
    %372 = vector.load %arg4[%c0_67, %c0_68] : memref<128x128xf32, #tpu.memory_space<vmem>>, vector<128x128xf32>
    %cst_69 = arith.constant dense<0.000000e+00> : vector<32x128xf32>
    %373 = tpu.matmul %371, %372, %cst_69 {dimension_numbers = #tpu.dot_dimension_numbers<[1], [0], [0], [1], [0, 0, 1, 1], [], []>} : vector<32x128xf32>, vector<128x128xf32>, vector<32x128xf32> -> vector<32x128xf32>
    %374 = vector.broadcast %11 : vector<1x128xf32> to vector<32x128xf32>
    %375 = arith.addf %373, %374 : vector<32x128xf32>
    %376 = tpu.iota {dimensions = array<i32: 1>} : vector<32x128xi32>
    %c4_i32 = arith.constant 4 : i32
    %377 = vector.broadcast %c4_i32 : i32 to vector<32x128xi32>
    %378 = arith.cmpi slt, %376, %377 : vector<32x128xi32>
    %cst_70 = arith.constant -1.000000e+30 : f32
    %379 = vector.broadcast %cst_70 : f32 to vector<32x128xf32>
    %380 = arith.select %378, %375, %379 : vector<32x128xi1>, vector<32x128xf32>
    %cst_71 = arith.constant dense<0xFF800000> : vector<32xf32>
    %381 = vector.multi_reduction <maximumf>, %380, %cst_71 [1] : vector<32x128xf32> to vector<32xf32>
    %382 = vector.shape_cast %381 : vector<32xf32> to vector<32x1xf32>
    %383 = vector.broadcast %382 : vector<32x1xf32> to vector<32x128xf32>
    %384 = arith.subf %380, %383 : vector<32x128xf32>
    %385 = math.exp %384 : vector<32x128xf32>
    %cst_72 = arith.constant dense<0.000000e+00> : vector<32xf32>
    %386 = vector.multi_reduction <add>, %385, %cst_72 [1] : vector<32x128xf32> to vector<32xf32>
    %387 = vector.shape_cast %386 : vector<32xf32> to vector<32x1xf32>
    %388 = math.log %387 : vector<32x1xf32>
    %389 = vector.broadcast %388 : vector<32x1xf32> to vector<32x128xf32>
    %390 = arith.subf %384, %389 : vector<32x128xf32>
    %c0_73 = arith.constant 0 : index
    %c0_74 = arith.constant 0 : index
    %391 = vector.load %arg6[%c0_73, %c0_74] : memref<32x128xf32, #tpu.memory_space<vmem>>, vector<32x128xf32>
    tpu.vector_store %arg6[%c0_73, %c0_74], %390 {strides = array<i32>} : memref<32x128xf32, #tpu.memory_space<vmem>>, vector<32x128xf32>,
    return
  }
}

</mosaic_0001>

<bundles_post_ra>
// kernel: policy_cnn_forward.1
= control target key start
LH: loop header
LB: loop body
LE: loop exit
PB: predicated region body
PF: predicated region fallthrough
CT: control target
= control target key end

     0   :  { %11 = vsyncpa [#allocation3], 0  ;;  %s4685_s0 = inlined_call_operand.vmem [shape: s32[32,16], index: 0, kind: input, shape index: {}]   ;;  %s4686_s1 = inlined_call_operand.vmem [shape: bf16[64,128], index: 1, kind: input, shape index: {}]   ;;  %s4687_s2 = inlined_call_operand.hbm [shape: bf16[512,128], index: 2, kind: input, shape index: {}]   ;;  %s4688_s3 = inlined_call_operand.hbm [shape: bf16[512,128], index: 3, kind: input, shape index: {}]   ;;  %s4689_s4 = inlined_call_operand.hbm [shape: f32[128,128], index: 4, kind: input, shape index: {}]   ;;  %s4690_s5 = inlined_call_operand.vmem [shape: f32[10,128], index: 5, kind: input, shape index: {}]   ;;  %s4691_s6 = inlined_call_operand.vmem [shape: f32[32,128], index: 6, kind: output, shape index: {}]  }
   0x1   :  { %12 = vsyncpa [#allocation5], 0  ;;  %s3383_s21 = smov [#allocation4]   ;;  %s3384_s23 = smov [#allocation2]  }
   0x2   :  { %s34_s22 = sshll.u32 %s3383_s21, 4  ;;  %s22_s24 = sshll.u32 %s3384_s23, 4  ;;  %s35_s22 = int_to_ptr.vmem [resolvable:$true] %s34_s22  ;;  %s3442_s24 = int_to_ptr.vmem [resolvable:$true] %s22_s24 }
   0x3   :  { %s3313_s27 = scalar_lea.hbm %s4688_s3, 4096 }
   0x4   :  { %p3314_p0 = scmp.ne.s32.totalorder %s4688_s3, %s3313_s27  ;;  %p3317_p1 = scmp.lt.u32.totalorder %s3313_s27, %s4688_s3 }
   0x6   :  { %p3319_p2 = pnand %p3317_p1, %p3314_p0 }
   0x8   :  { %3322 = shalt.err (!%p3319_p2)
}
   0x9   :  { %s3323_s8 = scalar_lea.vmem %s35_s22, 4096  ;;  %p3328_p4 = scmp.lt.s32.totalorder %s35_s22, %s35_s22 }
   0xa   :  { %p3324_p3 = scmp.ne.s32.totalorder %s35_s22, %s3323_s8  ;;  %p3329_p5 = scmp.lt.s32.totalorder %s3323_s8, %s3323_s8 }
   0xc   :  { %p3330_p6 = por %p3329_p5, %p3328_p4 }
   0xe   :  { %p3331_p7 = pnand %p3330_p6, %p3324_p3 }
  0x10   :  { %3334 = shalt.err (!%p3331_p7)
}
  0x11   :  { %s3385_s9 = smov 64   ;;  %s3386_s10 = smov 4  }
  0x12   :  { %40 = dma.hbm_to_vmem [thread:$0]  %s4688_s3, 4096, %s35_s22, [#allocation5], %s3385_s9, %s3385_s9, %s3386_s10  }
  0x13   :  { %s3335_s15 = scalar_lea.hbm %s4687_s2, 4096 }
  0x14   :  { %p3336_p8 = scmp.ne.s32.totalorder %s4687_s2, %s3335_s15  ;;  %p3339_p9 = scmp.lt.u32.totalorder %s3335_s15, %s4687_s2 }
  0x16   :  { %p3341_p10 = pnand %p3339_p9, %p3336_p8 }
  0x18   :  { %3344 = shalt.err (!%p3341_p10)
}
  0x19   :  { %s3345_s20 = scalar_lea.vmem %s3442_s24, 4096  ;;  %p3350_p12 = scmp.lt.s32.totalorder %s3442_s24, %s3442_s24 }
  0x1a   :  { %p3346_p11 = scmp.ne.s32.totalorder %s3442_s24, %s3345_s20  ;;  %p3351_p13 = scmp.lt.s32.totalorder %s3345_s20, %s3345_s20 }
  0x1c   :  { %p3352_p0 = por %p3351_p13, %p3350_p12 }
  0x1e   :  { %p3353_p1 = pnand %p3352_p0, %p3346_p11 }
  0x20   :  { %3356 = shalt.err (!%p3353_p1)
}
  0x21   :  { %28 = dma.hbm_to_vmem [thread:$0]  %s4687_s2, 4096, %s3442_s24, [#allocation3], %s3385_s9, %s3385_s9, %s3386_s10  }
  0x22   :  { %s3387_s22 = smov [#allocation6]   ;;  %s3357_s27 = scalar_lea.hbm %s4689_s4, 2048 }
  0x23   :  { %s46_s23 = sshll.u32 %s3387_s22, 4  ;;  %p3358_p2 = scmp.ne.s32.totalorder %s4689_s4, %s3357_s27  ;;  %s47_s23 = int_to_ptr.vmem [resolvable:$true] %s46_s23 }
  0x24   :  { %p3361_p3 = scmp.lt.u32.totalorder %s3357_s27, %s4689_s4 }
  0x26   :  { %p3363_p4 = pnand %p3361_p3, %p3358_p2 }
  0x28   :  { %3366 = shalt.err (!%p3363_p4)
}
  0x29   :  { %s3367_s8 = scalar_lea.vmem %s47_s23, 2048  ;;  %p3372_p6 = scmp.lt.s32.totalorder %s47_s23, %s47_s23 }
  0x2a   :  { %p3368_p5 = scmp.ne.s32.totalorder %s47_s23, %s3367_s8  ;;  %p3373_p7 = scmp.lt.s32.totalorder %s3367_s8, %s3367_s8 }
  0x2c   :  { %p3374_p8 = por %p3373_p7, %p3372_p6 }
  0x2e   :  { %p3375_p9 = pnand %p3374_p8, %p3368_p5 }
  0x30   :  { %3378 = shalt.err (!%p3375_p9)
}
  0x31   :  { %s3388_s2 = smov 128   ;;  %s3389_s24 = smov 8  }
  0x32   :  { %52 = dma.hbm_to_vmem [thread:$0]  %s4689_s4, 2048, %s47_s23, [#allocation5], %s3388_s2, %s3388_s2, %s3389_s24  }
  0x33   :  { %3379 = dma.done.wait [#allocation3], 4096  }
  0x34   :  { %3380 = vsyncadd [#allocation3], 4294963200 }
  0x35   :  { %3381 = dma.done.wait [#allocation5], 6144  }
  0x36   :  { %3382 = vsyncadd [#allocation5], 4294961152  ;;  %v3390_v0 = vmov 0   ;;  %v3488_v1 = vld [vmem:[%s4685_s0 + $0x18] sm:$0xff]  ;;  %v3493_v2 = vld [vmem:[%s4685_s0] sm:$0xff]  ;;  %v3391_v9 = vmov 1   ;;  %v71_v52 = vlaneseq }
  0x37   :  { %3153 = vset.pattern.permute.xlu1 %v3390_v0  ;;  %3152 = vset.pattern.permute.xlu0 %v3390_v0  ;;  %v3500_v3 = vld [vmem:[%s4685_s0 + $0x8] sm:$0xff]  ;;  %v3503_v4 = vadd.s32 16, %v3493_v2  ;;  %v3509_v6 = vadd.s32 16, %v3488_v1  ;;  %v3512_v7 = vadd.s32 32, %v3493_v2  ;;  %v3517_v8 = vld [vmem:[%s4685_s0 + $0x10] sm:$0xff]  ;;  %v3392_v12 = vmov 4  }
  0x38   :  { %83 = vperm.xlu1 %3153, %v3488_v1   ;;  %74 = vperm.xlu0 %3152, %v3493_v2   ;;  %v3506_v5 = vadd.s32 16, %v3500_v3  ;;  %v3524_v10 = vadd.s32 16, %v3517_v8  ;;  %v3527_v11 = vadd.s32 32, %v3517_v8  ;;  %v3537_v13 = vadd.s32 32, %v3488_v1  ;;  %v3220_v20 = vld [vmem:[%s4686_s1] sm:$0xff]   ;;  %v3221_v22 = vld [vmem:[%s4686_s1 + $0x8] sm:$0xff]  }
  0x39   :  { %v3393_v14 = vmov 2   ;;  %v3543_v15 = vadd.s32 48, %v3500_v3  ;;  %v3546_v16 = vadd.s32 48, %v3517_v8  ;;  %v3394_v17 = vmov 5   ;;  %3014 = vmatprep.subr.bf16.mxu0 %v3220_v20  ;;  %v3222_v24 = vld [vmem:[%s4686_s1 + $0x10] sm:$0xff]   ;;  %v3223_v25 = vld [vmem:[%s4686_s1 + $0x18] sm:$0xff]  }
  0x3a   :  { %v3552_v18 = vadd.s32 32, %v3500_v3  ;;  %v3395_v19 = vmov 3   ;;  %3015 = vmatpush3.bf16.msra.mxu0 %v3220_v20  ;;  %v3569_v21 = vadd.s32 48, %v3493_v2  ;;  %v3578_v23 = vadd.s32 48, %v3488_v1 }
  0x3b   :  { %3016 = vmatprep.subr.bf16.mxu0 %v3221_v22  ;;  %v3396_v26 = vmov 6   ;;  %v3397_v27 = vmov 7   ;;  %v3398_v28 = vmov 8   ;;  %v3399_v33 = vmov 12  }
  0x3c   :  { %3154 = vset.pattern.permute.xlu1 %v3391_v9  ;;  %77 = vperm.xlu0 %3152, %v3500_v3   ;;  %v3400_v36 = vmov 9   ;;  %v3401_v49 = vmov 13   ;;  %v3693_v55 = vand.u32 127, %v71_v52  ;;  %v3402_v57 = vmov 10  }
  0x3d   :  { %94 = vperm.xlu1 %3154, %v3503_v4  }
  0x3e   :  { %3017 = vmatpush3.bf16.msra.mxu0 %v3221_v22 }
  0x3f   :  { %3018 = vmatprep.subr.bf16.mxu0 %v3222_v24 }
  0x40   :  { %80 = vperm.xlu0 %3152, %v3517_v8  }
  0x41   :  { %97 = vperm.xlu1 %3154, %v3506_v5  }
  0x42   :  { %3019 = vmatpush3.bf16.msra.mxu0 %v3222_v24 }
  0x43   :  { %3020 = vmatprep.subr.bf16.mxu0 %v3223_v25 }
  0x44   :  { %3155 = vset.pattern.permute.xlu0 %v3391_v9 }
  0x45   :  { %100 = vperm.xlu0 %3155, %v3524_v10   ;;  %103 = vperm.xlu1 %3154, %v3509_v6  }
  0x46   :  { %3021 = vmatpush3.bf16.msra.mxu0 %v3223_v25 }
  0x49   :  { %175 = vperm.xlu0 %3155, %v3500_v3   ;;  %3156 = vset.pattern.permute.xlu1 %v3392_v12 }
  0x4a   :  { %118 = vperm.xlu1 %3156, %v3512_v7  }
  0x4d   :  { %178 = vperm.xlu0 %3155, %v3517_v8  }
  0x4e   :  { %124 = vperm.xlu1 %3156, %v3527_v11  }
  0x51   :  { %3161 = vset.pattern.permute.xlu0 %v3393_v14 }
  0x52   :  { %194 = vperm.xlu0 %3161, %v3524_v10   ;;  %127 = vperm.xlu1 %3156, %v3537_v13  }
  0x56   :  { %261 = vperm.xlu0 %3161, %v3500_v3   ;;  %3157 = vset.pattern.permute.xlu1 %v3394_v17 }
  0x57   :  { %145 = vperm.xlu1 %3157, %v3543_v15  }
  0x5a   :  { %264 = vperm.xlu0 %3161, %v3517_v8  }
  0x5b   :  { %148 = vperm.xlu1 %3157, %v3546_v16  }
  0x5e   :  { %3168 = vset.pattern.permute.xlu0 %v3395_v19 }
  0x5f   :  { %280 = vperm.xlu0 %3168, %v3524_v10   ;;  %3158 = vset.pattern.permute.xlu1 %v3391_v9 }
  0x60   :  { %172 = vperm.xlu1 %3158, %v3493_v2  }
  0x63   :  { %3169 = vset.pattern.permute.xlu0 %v3392_v12 }
  0x64   :  { %121 = vperm.xlu0 %3169, %v3552_v18   ;;  %3159 = vset.pattern.permute.xlu1 %v3393_v14 }
  0x65   :  { %188 = vperm.xlu1 %3159, %v3503_v4  }
  0x68   :  { %347 = vperm.xlu0 %3169, %v3500_v3  }
  0x69   :  { %191 = vperm.xlu1 %3159, %v3506_v5  }
  0x6c   :  { %350 = vperm.xlu0 %3169, %v3517_v8  }
  0x6d   :  { %3160 = vset.pattern.permute.xlu1 %v3391_v9  ;;  %v3403_v9 = vmov 0.0  }
  0x6e   :  { %181 = vperm.xlu1 %3160, %v3488_v1  }
  0x70   :  { %3175 = vset.pattern.permute.xlu0 %v3394_v17 }
  0x71   :  { %142 = vperm.xlu0 %3175, %v3569_v21  }
  0x72   :  { %3162 = vset.pattern.permute.xlu1 %v3393_v14 }
  0x73   :  { %197 = vperm.xlu1 %3162, %v3509_v6  }
  0x75   :  { %151 = vperm.xlu0 %3175, %v3578_v23  }
  0x77   :  { %3163 = vset.pattern.permute.xlu1 %v3394_v17 }
  0x78   :  { %208 = vperm.xlu1 %3163, %v3512_v7  }
  0x79   :  { %211 = vperm.xlu0 %3175, %v3552_v18  }
  0x7c   :  { %214 = vperm.xlu1 %3163, %v3527_v11  }
  0x7d   :  { %366 = vperm.xlu0 %3175, %v3524_v10  }
  0x80   :  { %217 = vperm.xlu1 %3163, %v3537_v13  }
  0x81   :  { %433 = vperm.xlu0 %3175, %v3500_v3  }
  0x84   :  { %3164 = vset.pattern.permute.xlu1 %v3396_v26 }
  0x85   :  { %436 = vperm.xlu0 %3175, %v3517_v8   ;;  %231 = vperm.xlu1 %3164, %v3543_v15  }
  0x89   :  { %3182 = vset.pattern.permute.xlu0 %v3396_v26  ;;  %234 = vperm.xlu1 %3164, %v3546_v16  }
  0x8a   :  { %228 = vperm.xlu0 %3182, %v3569_v21  }
  0x8d   :  { %3165 = vset.pattern.permute.xlu1 %v3393_v14 }
  0x8e   :  { %237 = vperm.xlu0 %3182, %v3578_v23   ;;  %258 = vperm.xlu1 %3165, %v3493_v2  }
  0x92   :  { %3166 = vset.pattern.permute.xlu1 %v3395_v19  ;;  %297 = vperm.xlu0 %3182, %v3552_v18  }
  0x93   :  { %274 = vperm.xlu1 %3166, %v3503_v4  }
  0x96   :  { %452 = vperm.xlu0 %3182, %v3524_v10  }
  0x97   :  { %277 = vperm.xlu1 %3166, %v3506_v5  }
  0x9a   :  { %519 = vperm.xlu0 %3182, %v3500_v3  }
  0x9b   :  { %3167 = vset.pattern.permute.xlu1 %v3393_v14 }
  0x9c   :  { %267 = vperm.xlu1 %3167, %v3488_v1  }
  0x9e   :  { %522 = vperm.xlu0 %3182, %v3517_v8  }
  0xa0   :  { %3170 = vset.pattern.permute.xlu1 %v3395_v19 }
  0xa1   :  { %283 = vperm.xlu1 %3170, %v3509_v6  }
  0xa2   :  { %3189 = vset.pattern.permute.xlu0 %v3397_v27 }
  0xa3   :  { %314 = vperm.xlu0 %3189, %v3569_v21  }
  0xa5   :  { %3171 = vset.pattern.permute.xlu1 %v3396_v26 }
  0xa6   :  { %294 = vperm.xlu1 %3171, %v3512_v7  }
  0xa7   :  { %323 = vperm.xlu0 %3189, %v3578_v23  }
  0xaa   :  { %300 = vperm.xlu1 %3171, %v3527_v11  }
  0xab   :  { %538 = vperm.xlu0 %3189, %v3524_v10  }
  0xae   :  { %303 = vperm.xlu1 %3171, %v3537_v13  }
  0xaf   :  { %3191 = vset.pattern.permute.xlu0 %v3398_v28 }
  0xb0   :  { %383 = vperm.xlu0 %3191, %v3552_v18  }
  0xb2   :  { %3172 = vset.pattern.permute.xlu1 %v3397_v27 }
  0xb3   :  { %317 = vperm.xlu1 %3172, %v3543_v15  }
  0xb4   :  { %605 = vperm.xlu0 %3191, %v3500_v3  }
  0xb7   :  { %v3627_v29 = vpop.permute.xlu1 %83  ;;  %320 = vperm.xlu1 %3172, %v3546_v16   ;;  %v3630_v30 = vpop.permute.xlu0 %74 }
  0xb8   :  { %608 = vperm.xlu0 %3191, %v3517_v8   ;;  %vm85_vm0 = vcmp.eq.s32.totalorder %v3630_v30, %v3693_v55  ;;  %vm88_vm10 = vcmp.eq.s32.totalorder %v3627_v29, %v3693_v55 }
  0xbb   :  { %3173 = vset.pattern.permute.xlu1 %v3392_v12  ;;  %v3634_v31 = vpop.permute.xlu0 %77 }
  0xbc   :  { %344 = vperm.xlu1 %3173, %v3493_v2   ;;  %v3637_v32 = vpop.permute.xlu1 %94  ;;  %3200 = vset.pattern.permute.xlu0 %v3399_v33  ;;  %vm86_vm2 = vcmp.eq.s32.totalorder %v3634_v31, %v3693_v55 }
  0xbd   :  { %641 = vperm.xlu0 %3200, %v3552_v18   ;;  %vm105_vm1 = vcmp.eq.s32.totalorder %v3637_v32, %v3693_v55 }
  0xbe   :  { %vm3711_vm5 = vmor %vm85_vm0, %vm105_vm1 }
  0xbf   :  { %v3641_v34 = vpop.permute.xlu0 %80 }
  0xc0   :  { %3174 = vset.pattern.permute.xlu1 %v3394_v17  ;;  %v98_v35 = vpop.permute.xlu1 %97  ;;  %vm87_vm7 = vcmp.eq.s32.totalorder %v3641_v34, %v3693_v55 }
  0xc1   :  { %360 = vperm.xlu1 %3174, %v3503_v4   ;;  %3201 = vset.pattern.permute.xlu0 %v3400_v36  ;;  %vm106_vm3 = vcmp.eq.s32.totalorder %v98_v35, %v3693_v55  ;;  %v3404_v35 = vmov 11  }
  0xc2   :  { %400 = vperm.xlu0 %3201, %v3569_v21   ;;  %vm110_vm9 = vmor %vm86_vm2, %vm106_vm3 }
  0xc4   :  { %v104_v37 = vpop.permute.xlu1 %103  ;;  %v3647_v38 = vpop.permute.xlu0 %100 }
  0xc5   :  { %363 = vperm.xlu1 %3174, %v3506_v5   ;;  %vm108_vm6 = vcmp.eq.s32.totalorder %v104_v37, %v3693_v55  ;;  %vm107_vm8 = vcmp.eq.s32.totalorder %v3647_v38, %v3693_v55 }
  0xc6   :  { %409 = vperm.xlu0 %3201, %v3578_v23   ;;  %vm3725_vm12 = vmor %vm88_vm10, %vm108_vm6 }
  0xc7   :  { %vm111_vm14 = vmor %vm87_vm7, %vm107_vm8 }
  0xc8   :  { %v3651_v39 = vpop.permute.xlu0 %175 }
  0xc9   :  { %3176 = vset.pattern.permute.xlu1 %v3392_v12  ;;  %v3654_v40 = vpop.permute.xlu1 %118 }
  0xca   :  { %353 = vperm.xlu1 %3176, %v3488_v1   ;;  %469 = vperm.xlu0 %3201, %v3552_v18   ;;  %vm129_vm13 = vcmp.eq.s32.totalorder %v3654_v40, %v3693_v55  ;;  %v3406_v40 = vmov 15  }
  0xcb   :  { %vm133_vm3 = vmor %vm3711_vm5, %vm129_vm13 }
  0xcc   :  { %v3658_v41 = vpop.permute.xlu0 %178 }
  0xcd   :  { %v3660_v42 = vpop.permute.xlu1 %124 }
  0xce   :  { %3177 = vset.pattern.permute.xlu1 %v3394_v17  ;;  %624 = vperm.xlu0 %3201, %v3524_v10   ;;  %vm131_vm0 = vcmp.eq.s32.totalorder %v3660_v42, %v3693_v55 }
  0xcf   :  { %369 = vperm.xlu1 %3177, %v3509_v6   ;;  %vm135_vm8 = vmor %vm111_vm14, %vm131_vm0  ;;  %vm185_vm0 = vcmp.eq.s32.totalorder %v3658_v41, %v3693_v55 }
  0xd1   :  { %v3665_v43 = vpop.permute.xlu1 %127  ;;  %v3667_v44 = vpop.permute.xlu0 %194 }
  0xd2   :  { %691 = vperm.xlu0 %3201, %v3500_v3   ;;  %vm132_vm6 = vcmp.eq.s32.totalorder %v3665_v43, %v3693_v55 }
  0xd3   :  { %3178 = vset.pattern.permute.xlu1 %v3398_v28  ;;  %vm136_vm5 = vmor %vm3725_vm12, %vm132_vm6 }
  0xd4   :  { %380 = vperm.xlu1 %3178, %v3512_v7  }
  0xd5   :  { %v3672_v45 = vpop.permute.xlu0 %261 }
  0xd6   :  { %v146_v46 = vpop.permute.xlu1 %145  ;;  %694 = vperm.xlu0 %3201, %v3517_v8  }
  0xd7   :  { %vm154_vm15 = vcmp.eq.s32.totalorder %v146_v46, %v3693_v55 }
  0xd8   :  { %386 = vperm.xlu1 %3178, %v3527_v11  }
  0xd9   :  { %v3676_v47 = vpop.permute.xlu0 %264 }
  0xda   :  { %v149_v48 = vpop.permute.xlu1 %148  ;;  %3205 = vset.pattern.permute.xlu0 %v3401_v49 }
  0xdb   :  { %658 = vperm.xlu0 %3205, %v3569_v21   ;;  %vm155_vm2 = vcmp.eq.s32.totalorder %v149_v48, %v3693_v55 }
  0xdc   :  { %389 = vperm.xlu1 %3178, %v3537_v13   ;;  %vm159_vm10 = vmor %vm135_vm8, %vm155_vm2 }
  0xdd   :  { %v2668_v22 = vsel %vm159_vm10, 1.0, %v3403_v9 }
  0xde   :  { %v3681_v50 = vpop.permute.xlu0 %280 }
  0xdf   :  { %v3683_v51 = vpop.permute.xlu1 %172  ;;  %667 = vperm.xlu0 %3205, %v3578_v23  }
  0xe0   :  { %3179 = vset.pattern.permute.xlu1 %v3400_v36 }
  0xe1   :  { %403 = vperm.xlu1 %3179, %v3543_v15  }
  0xe3   :  { %v122_v53 = vpop.permute.xlu0 %121  ;;  %727 = vperm.xlu0 %3205, %v3552_v18  }
  0xe4   :  { %v3689_v54 = vpop.permute.xlu1 %188  ;;  %vm130_vm4 = vcmp.eq.s32.totalorder %v122_v53, %v3693_v55 }
  0xe5   :  { %406 = vperm.xlu1 %3179, %v3546_v16   ;;  %vm134_vm11 = vmor %vm110_vm9, %vm130_vm4  ;;  %vm4692_vm9 = vcmask 523264   ;;  %vm199_vm2 = vcmp.eq.s32.totalorder %v3689_v54, %v3693_v55 }
  0xe6   :  { %vm158_vm1 = vmor %vm134_vm11, %vm154_vm15 }
  0xe7   :  { %v3695_v56 = vpop.permute.xlu0 %347  ;;  %3209 = vset.pattern.permute.xlu0 %v3402_v57  ;;  %v2667_v14 = vsel %vm158_vm1, 1.0, %v3403_v9  ;;  %vm201_vm1 = vcmp.eq.s32.totalorder %v3667_v44, %v3693_v55 }
  0xe8   :  { %v3702_v58 = vpop.permute.xlu1 %191  ;;  %486 = vperm.xlu0 %3209, %v3569_v21   ;;  %vm3782_vm6 = vmor %vm185_vm0, %vm201_vm1 }
  0xe9   :  { %3180 = vset.pattern.permute.xlu1 %v3394_v17 }
  0xea   :  { %430 = vperm.xlu1 %3180, %v3493_v2  }
  0xeb   :  { %v351_v60 = vpop.permute.xlu0 %350 }
  0xec   :  { %495 = vperm.xlu0 %3209, %v3578_v23   ;;  %vm357_vm12 = vcmp.eq.s32.totalorder %v351_v60, %v3693_v55 }
  0xed   :  { %v3723_v61 = vpop.permute.xlu1 %181 }
  0xee   :  { %3181 = vset.pattern.permute.xlu1 %v3396_v26 }
  0xef   :  { %446 = vperm.xlu1 %3181, %v3503_v4  }
  0xf0   :  { %v143_v63 = vpop.permute.xlu0 %142  ;;  %555 = vperm.xlu0 %3209, %v3552_v18  }
  0xf1   :  { %vm153_vm4 = vcmp.eq.s32.totalorder %v143_v63, %v3693_v55  ;;  %v4707_v63 = vmov 0 }
  0xf2   :  { %vm157_vm7 = vmor %vm133_vm3, %vm153_vm4  ;;  %v198_v0 = vpop.permute.xlu1 %197  ;;  %vm184_vm3 = vcmp.eq.s32.totalorder %v3651_v39, %v3693_v55  ;;  %vm200_vm4 = vcmp.eq.s32.totalorder %v3702_v58, %v3693_v55 }
  0xf3   :  { %449 = vperm.xlu1 %3181, %v3506_v5   ;;  %v2666_v12 = vsel %vm157_vm7, 1.0, %v3403_v9  ;;  %vm183_vm7 = vcmp.eq.s32.totalorder %v3683_v51, %v3693_v55  ;;  %vm202_vm8 = vcmp.eq.s32.totalorder %v198_v0, %v3693_v55  ;;  %v3405_v51 = vmov 14  }
  0xf4   :  { %v152_v19 = vpop.permute.xlu0 %151  ;;  %v169_v20 = vpack.c.bf16 %v2667_v14, %v2666_v12  ;;  %710 = vperm.xlu0 %3209, %v3524_v10   ;;  %vm3789_vm10 = vmor %vm183_vm7, %vm199_vm2 }
  0xf5   :  { %vm156_vm11 = vcmp.eq.s32.totalorder %v152_v19, %v3693_v55 }
  0xf6   :  { %vm160_vm13 = vmor %vm136_vm5, %vm156_vm11  ;;  %3022 = vmatprep.mubr.msk.bf16.mxu0 %vm4692_vm9, %v169_v20  ;;  %vm186_vm11 = vcmp.eq.s32.totalorder %v3723_v61, %v3693_v55 }
  0xf7   :  { %v2669_v24 = vsel %vm160_vm13, 1.0, %v3403_v9  ;;  %3183 = vset.pattern.permute.xlu1 %v3394_v17  ;;  %v209_v25 = vpop.permute.xlu1 %208  ;;  %v4697_v17 = vmov 0  ;;  %vm204_vm13 = vmor %vm184_vm3, %vm200_vm4 }
  0xf8   :  { %v170_v29 = vpack.c.bf16 %v2669_v24, %v2668_v22  ;;  %v212_v30 = vpop.permute.xlu0 %211  ;;  %439 = vperm.xlu1 %3183, %v3488_v1   ;;  %777 = vperm.xlu0 %3209, %v3500_v3   ;;  %vm219_vm0 = vcmp.eq.s32.totalorder %v209_v25, %v3693_v55 }
  0xf9   :  { %vm220_vm5 = vcmp.eq.s32.totalorder %v212_v30, %v3693_v55  ;;  %vm223_vm4 = vmor %vm3789_vm10, %vm219_vm0 }
  0xfa   :  { %3023 = vmatmul.mubr.msk.bf16.vlgmr.msra.gmra.mrb[0].mxu0 %vm4692_vm9, %v170_v29  ;;  %vm224_vm1 = vmor %vm204_vm13, %vm220_vm5 }
  0xfb   :  { %v215_v31 = vpop.permute.xlu1 %214 }
  0xfc   :  { %3184 = vset.pattern.permute.xlu1 %v3396_v26  ;;  %v367_v32 = vpop.permute.xlu0 %366  ;;  %780 = vperm.xlu0 %3209, %v3517_v8   ;;  %vm221_vm2 = vcmp.eq.s32.totalorder %v215_v31, %v3693_v55 }
  0xfd   :  { %vm373_vm14 = vcmp.eq.s32.totalorder %v367_v32, %v3693_v55  ;;  %455 = vperm.xlu1 %3184, %v3509_v6   ;;  %vm225_vm5 = vmor %vm3782_vm6, %vm221_vm2 }
  0xfe   :  { %vm3762_vm15 = vmor %vm357_vm12, %vm373_vm14 }
  0xff   :  { %v4698_v17 = vsel %vm3762_vm15, 4294967295, %v4697_v17  ;;  %v218_v34 = vpop.permute.xlu1 %217  ;;  %vm3799_vm14 = vmor %vm186_vm11, %vm202_vm8 }
 0x100   :  { %v3766_v3 = vpop.permute.xlu0 %433  ;;  %3213 = vset.pattern.permute.xlu0 %v3404_v35  ;;  %vm222_vm11 = vcmp.eq.s32.totalorder %v218_v34, %v3693_v55 }
 0x101   :  { %3185 = vset.pattern.permute.xlu1 %v3400_v36  ;;  %572 = vperm.xlu0 %3213, %v3569_v21   ;;  %vm226_vm10 = vmor %vm3799_vm14, %vm222_vm11 }
 0x102   :  { %466 = vperm.xlu1 %3185, %v3512_v7  }
 0x104   :  { %v232_v37 = vpop.permute.xlu1 %231  ;;  %v437_v38 = vpop.permute.xlu0 %436 }
 0x105   :  { %581 = vperm.xlu0 %3213, %v3578_v23   ;;  %vm240_vm12 = vcmp.eq.s32.totalorder %v232_v37, %v3693_v55  ;;  %vm443_vm0 = vcmp.eq.s32.totalorder %v437_v38, %v3693_v55 }
 0x106   :  { %472 = vperm.xlu1 %3185, %v3527_v11   ;;  %vm244_vm7 = vmor %vm224_vm1, %vm240_vm12 }
 0x107   :  { %v2671_v43 = vsel %vm244_vm7, 1.0, %v3403_v9  ;;  %vm271_vm7 = vcmp.eq.s32.totalorder %v3676_v47, %v3693_v55  ;;  %v4711_v47 = vmov 0 }
 0x108   :  { %v235_v41 = vpop.permute.xlu1 %234 }
 0x109   :  { %v229_v42 = vpop.permute.xlu0 %228  ;;  %796 = vperm.xlu0 %3213, %v3524_v10   ;;  %vm241_vm3 = vcmp.eq.s32.totalorder %v235_v41, %v3693_v55 }
 0x10a   :  { %vm239_vm8 = vcmp.eq.s32.totalorder %v229_v42, %v3693_v55  ;;  %475 = vperm.xlu1 %3185, %v3537_v13   ;;  %vm245_vm13 = vmor %vm225_vm5, %vm241_vm3  ;;  %vm287_vm3 = vcmp.eq.s32.totalorder %v3681_v50, %v3693_v55 }
 0x10b   :  { %vm243_vm9 = vmor %vm223_vm4, %vm239_vm8  ;;  %v2672_v53 = vsel %vm245_vm13, 1.0, %v3403_v9  ;;  %vm270_vm8 = vcmp.eq.s32.totalorder %v3672_v45, %v3693_v55 }
 0x10c   :  { %v2670_v44 = vsel %vm243_vm9, 1.0, %v3403_v9  ;;  %vm4705_vm9 = vcmask 523264  }
 0x10d   :  { %v255_v10 = vpack.c.bf16 %v2671_v43, %v2670_v44  ;;  %v238_v46 = vpop.permute.xlu0 %237  ;;  %v259_v48 = vpop.permute.xlu1 %258  ;;  %3215 = vset.pattern.permute.xlu0 %v3405_v51  ;;  %vm4706_vm14 = vmmov %vm4705_vm9 }
 0x10e   :  { %vm242_vm12 = vcmp.eq.s32.totalorder %v238_v46, %v3693_v55  ;;  %3186 = vset.pattern.permute.xlu1 %v3402_v57  ;;  %744 = vperm.xlu0 %3215, %v3569_v21  }
 0x10f   :  { %vm246_vm6 = vmor %vm226_vm10, %vm242_vm12  ;;  %489 = vperm.xlu1 %3186, %v3543_v15   ;;  %3026 = vmatprep.mubr.msk.bf16.mxu0 %vm4705_vm9, %v255_v10  ;;  %vm269_vm9 = vcmp.eq.s32.totalorder %v259_v48, %v3693_v55  ;;  %v3904_v10 = vld [vmem:[%s4685_s0] sm:$0xff] }
 0x110   :  { %v2673_v54 = vsel %vm246_vm6, 1.0, %v3403_v9  ;;  %vm3857_vm10 = vmor %vm271_vm7, %vm287_vm3 }
 0x111   :  { %v256_v58 = vpack.c.bf16 %v2673_v54, %v2672_v53  ;;  %v298_v59 = vpop.permute.xlu0 %297  ;;  %v4715_v53 = vmov 0 }
 0x112   :  { %v275_v60 = vpop.permute.xlu1 %274  ;;  %753 = vperm.xlu0 %3215, %v3578_v23  }
 0x113   :  { %492 = vperm.xlu1 %3186, %v3546_v16   ;;  %3027 = vmatmul.mubr.msk.bf16.gmra.mrb[4].mxu0 %vm4706_vm14, %v256_v58  ;;  %vm285_vm5 = vcmp.eq.s32.totalorder %v275_v60, %v3693_v55  ;;  %vm306_vm14 = vcmp.eq.s32.totalorder %v298_v59, %v3693_v55  ;;  %v3924_v59 = vld [vmem:[%s4685_s0 + $0x18] sm:$0xff] }
 0x115   :  { %v453_v61 = vpop.permute.xlu0 %452 }
 0x116   :  { %v278_v62 = vpop.permute.xlu1 %277  ;;  %vm459_vm1 = vcmp.eq.s32.totalorder %v453_v61, %v3693_v55  ;;  %813 = vperm.xlu0 %3215, %v3552_v18  }
 0x117   :  { %3187 = vset.pattern.permute.xlu1 %v3396_v26  ;;  %vm3833_vm2 = vmor %vm443_vm0, %vm459_vm1  ;;  %vm286_vm11 = vcmp.eq.s32.totalorder %v278_v62, %v3693_v55 }
 0x118   :  { %v4708_v63 = vsel %vm3833_vm2, 4294967295, %v4707_v63  ;;  %516 = vperm.xlu1 %3187, %v3493_v2   ;;  %vm290_vm0 = vmor %vm270_vm8, %vm286_vm11 }
 0x119   :  { %v3838_v0 = vpop.permute.xlu0 %519  ;;  %vm289_vm1 = vmor %vm269_vm9, %vm285_vm5 }
 0x11a   :  { %3218 = vset.pattern.permute.xlu0 %v3406_v40 }
 0x11b   :  { %v268_v12 = vpop.permute.xlu1 %267  ;;  %830 = vperm.xlu0 %3218, %v3569_v21  }
 0x11c   :  { %3188 = vset.pattern.permute.xlu1 %v3397_v27  ;;  %vm272_vm3 = vcmp.eq.s32.totalorder %v268_v12, %v3693_v55 }
 0x11d   :  { %532 = vperm.xlu1 %3188, %v3503_v4   ;;  %v523_v14 = vpop.permute.xlu0 %522 }
 0x11e   :  { %vm529_vm4 = vcmp.eq.s32.totalorder %v523_v14, %v3693_v55 }
 0x11f   :  { %839 = vperm.xlu0 %3218, %v3578_v23  }
 0x120   :  { %v284_v19 = vpop.permute.xlu1 %283 }
 0x121   :  { %535 = vperm.xlu1 %3188, %v3506_v5   ;;  %vm288_vm2 = vcmp.eq.s32.totalorder %v284_v19, %v3693_v55 }
 0x122   :  { %v315_v18 = vpop.permute.xlu0 %314 }
 0x123   :  { %vm325_vm7 = vcmp.eq.s32.totalorder %v315_v18, %v3693_v55 }
 0x125   :  { %3190 = vset.pattern.permute.xlu1 %v3396_v26  ;;  %v295_v20 = vpop.permute.xlu1 %294 }
 0x126   :  { %525 = vperm.xlu1 %3190, %v3488_v1   ;;  %v324_v22 = vpop.permute.xlu0 %323  ;;  %vm305_vm12 = vcmp.eq.s32.totalorder %v295_v20, %v3693_v55 }
 0x127   :  { %vm309_vm15 = vmor %vm289_vm1, %vm305_vm12  ;;  %vm328_vm5 = vcmp.eq.s32.totalorder %v324_v22, %v3693_v55 }
 0x128   :  { %vm329_vm8 = vmor %vm309_vm15, %vm325_vm7 }
 0x129   :  { %v301_v2 = vpop.permute.xlu1 %300  ;;  %v2674_v25 = vsel %vm329_vm8, 1.0, %v3403_v9 }
 0x12a   :  { %3192 = vset.pattern.permute.xlu1 %v3397_v27  ;;  %v539_v26 = vpop.permute.xlu0 %538  ;;  %vm307_vm9 = vcmp.eq.s32.totalorder %v301_v2, %v3693_v55 }
 0x12b   :  { %541 = vperm.xlu1 %3192, %v3509_v6   ;;  %vm545_vm13 = vcmp.eq.s32.totalorder %v539_v26, %v3693_v55  ;;  %vm311_vm15 = vmor %vm3857_vm10, %vm307_vm9 }
 0x12c   :  { %vm3862_vm6 = vmor %vm529_vm4, %vm545_vm13 }
 0x12d   :  { %v4712_v47 = vsel %vm3862_vm6, 4294967295, %v4711_v47  ;;  %v304_v27 = vpop.permute.xlu1 %303  ;;  %vm310_vm13 = vmor %vm290_vm0, %vm306_vm14  ;;  %vm4713_vm0 = vcmask 523264  }
 0x12e   :  { %vm308_vm4 = vcmp.eq.s32.totalorder %v304_v27, %v3693_v55  ;;  %vm292_vm6 = vmor %vm272_vm3, %vm288_vm2 }
 0x12f   :  { %3193 = vset.pattern.permute.xlu1 %v3402_v57  ;;  %v3871_v45 = vpop.permute.xlu0 %383  ;;  %vm312_vm11 = vmor %vm292_vm6, %vm308_vm4 }
 0x130   :  { %552 = vperm.xlu1 %3193, %v3512_v7   ;;  %vm332_vm14 = vmor %vm312_vm11, %vm328_vm5  ;;  %vm392_vm9 = vcmp.eq.s32.totalorder %v3871_v45, %v3693_v55 }
 0x131   :  { %v2677_v34 = vsel %vm332_vm14, 1.0, %v3403_v9  ;;  %vm4714_vm10 = vmmov %vm4713_vm0 }
 0x132   :  { %v318_v50 = vpop.permute.xlu1 %317 }
 0x133   :  { %vm326_vm12 = vcmp.eq.s32.totalorder %v318_v50, %v3693_v55  ;;  %v3878_v24 = vpop.permute.xlu0 %605 }
 0x134   :  { %vm330_vm1 = vmor %vm310_vm13, %vm326_vm12  ;;  %558 = vperm.xlu1 %3193, %v3527_v11   ;;  %vm356_vm13 = vcmp.eq.s32.totalorder %v3695_v56, %v3693_v55 }
 0x135   :  { %v2675_v29 = vsel %vm330_vm1, 1.0, %v3403_v9 }
 0x136   :  { %v341_v30 = vpack.c.bf16 %v2675_v29, %v2674_v25  ;;  %v321_v31 = vpop.permute.xlu1 %320 }
 0x137   :  { %vm327_vm2 = vcmp.eq.s32.totalorder %v321_v31, %v3693_v55  ;;  %v609_v32 = vpop.permute.xlu0 %608 }
 0x138   :  { %vm331_vm6 = vmor %vm311_vm15, %vm327_vm2  ;;  %561 = vperm.xlu1 %3193, %v3537_v13   ;;  %3030 = vmatprep.mubr.msk.bf16.mxu0 %vm4713_vm0, %v341_v30  ;;  %vm615_vm7 = vcmp.eq.s32.totalorder %v609_v32, %v3693_v55  ;;  %v4720_v30 = vmov 0 }
 0x139   :  { %v2676_v8 = vsel %vm331_vm6, 1.0, %v3403_v9 }
 0x13a   :  { %v342_v37 = vpack.c.bf16 %v2677_v34, %v2676_v8 }
 0x13b   :  { %v345_v38 = vpop.permute.xlu1 %344 }
 0x13c   :  { %3194 = vset.pattern.permute.xlu1 %v3404_v35  ;;  %3031 = vmatmul.mubr.msk.bf16.gmra.mrb[8].mxu0 %vm4714_vm10, %v342_v37  ;;  %v3894_v39 = vpop.permute.xlu0 %641  ;;  %vm355_vm12 = vcmp.eq.s32.totalorder %v345_v38, %v3693_v55 }
 0x13d   :  { %575 = vperm.xlu1 %3194, %v3543_v15  }
 0x140   :  { %v361_v41 = vpop.permute.xlu1 %360 }
 0x141   :  { %578 = vperm.xlu1 %3194, %v3546_v16   ;;  %v401_v42 = vpop.permute.xlu0 %400  ;;  %vm371_vm11 = vcmp.eq.s32.totalorder %v361_v41, %v3693_v55 }
 0x142   :  { %vm375_vm14 = vmor %vm355_vm12, %vm371_vm11  ;;  %vm411_vm6 = vcmp.eq.s32.totalorder %v401_v42, %v3693_v55 }
 0x144   :  { %v364_v43 = vpop.permute.xlu1 %363 }
 0x145   :  { %3195 = vset.pattern.permute.xlu1 %v3398_v28  ;;  %v410_v44 = vpop.permute.xlu0 %409  ;;  %vm372_vm8 = vcmp.eq.s32.totalorder %v364_v43, %v3693_v55 }
 0x146   :  { %602 = vperm.xlu1 %3195, %v3904_v10   ;;  %vm376_vm1 = vmor %vm356_vm13, %vm372_vm8  ;;  %vm414_vm11 = vcmp.eq.s32.totalorder %v410_v44, %v3693_v55 }
 0x149   :  { %v354_v46 = vpop.permute.xlu1 %353  ;;  %v3907_v48 = vpop.permute.xlu0 %469 }
 0x14a   :  { %3196 = vset.pattern.permute.xlu1 %v3400_v36  ;;  %vm358_vm0 = vcmp.eq.s32.totalorder %v354_v46, %v3693_v55 }
 0x14b   :  { %618 = vperm.xlu1 %3196, %v3503_v4  }
 0x14d   :  { %v625_v21 = vpop.permute.xlu0 %624 }
 0x14e   :  { %v370_v23 = vpop.permute.xlu1 %369  ;;  %vm631_vm3 = vcmp.eq.s32.totalorder %v625_v21, %v3693_v55 }
 0x14f   :  { %621 = vperm.xlu1 %3196, %v3506_v5   ;;  %vm3914_vm4 = vmor %vm615_vm7, %vm631_vm3  ;;  %vm374_vm15 = vcmp.eq.s32.totalorder %v370_v23, %v3693_v55 }
 0x150   :  { %v4716_v53 = vsel %vm3914_vm4, 4294967295, %v4715_v53  ;;  %vm396_vm7 = vmor %vm376_vm1, %vm392_vm9  ;;  %vm4717_vm1 = vnez %v4698_v17 }
 0x151   :  { %v3918_v54 = vpop.permute.xlu0 %691  ;;  %vm378_vm3 = vmor %vm358_vm0, %vm374_vm15  ;;  %vm4718_vm0 = vcmask 523264  }
 0x153   :  { %3197 = vset.pattern.permute.xlu1 %v3398_v28  ;;  %v381_v58 = vpop.permute.xlu1 %380 }
 0x154   :  { %611 = vperm.xlu1 %3197, %v3924_v59   ;;  %vm391_vm5 = vcmp.eq.s32.totalorder %v381_v58, %v3693_v55 }
 0x155   :  { %v695_v60 = vpop.permute.xlu0 %694  ;;  %vm395_vm2 = vmor %vm375_vm14, %vm391_vm5 }
 0x156   :  { %vm415_vm13 = vmor %vm395_vm2, %vm411_vm6 }
 0x157   :  { %v387_v61 = vpop.permute.xlu1 %386  ;;  %v2678_v14 = vsel %vm415_vm13, 1.0, %v3403_v9 }
 0x158   :  { %3198 = vset.pattern.permute.xlu1 %v3400_v36  ;;  %vm393_vm12 = vcmp.eq.s32.totalorder %v387_v61, %v3693_v55 }
 0x159   :  { %627 = vperm.xlu1 %3198, %v3509_v6   ;;  %vm397_vm15 = vmor %vm4717_vm1, %vm393_vm12 }
 0x15a   :  { %v3934_v28 = vpop.permute.xlu0 %658 }
 0x15b   :  { %v390_v62 = vpop.permute.xlu1 %389 }
 0x15c   :  { %vm394_vm10 = vcmp.eq.s32.totalorder %v390_v62, %v3693_v55 }
 0x15d   :  { %3199 = vset.pattern.permute.xlu1 %v3399_v33  ;;  %vm398_vm8 = vmor %vm378_vm3, %vm394_vm10 }
 0x15e   :  { %638 = vperm.xlu1 %3199, %v3512_v7   ;;  %v3945_v56 = vpop.permute.xlu0 %667  ;;  %vm418_vm9 = vmor %vm398_vm8, %vm414_vm11  ;;  %vm442_vm8 = vcmp.eq.s32.totalorder %v3766_v3, %v3693_v55 }
 0x15f   :  { %v2681_v22 = vsel %vm418_vm9, 1.0, %v3403_v9  ;;  %vm4719_vm10 = vmmov %vm4718_vm0 }
 0x160   :  { %v404_v12 = vpop.permute.xlu1 %403 }
 0x161   :  { %vm412_vm5 = vcmp.eq.s32.totalorder %v404_v12, %v3693_v55 }
 0x162   :  { %vm416_vm14 = vmor %vm396_vm7, %vm412_vm5  ;;  %644 = vperm.xlu1 %3199, %v3527_v11   ;;  %v3951_v33 = vpop.permute.xlu0 %727  ;;  %vm701_vm7 = vcmp.eq.s32.totalorder %v695_v60, %v3693_v55 }
 0x163   :  { %v2679_v19 = vsel %vm416_vm14, 1.0, %v3403_v9  ;;  %vm478_vm14 = vcmp.eq.s32.totalorder %v3907_v48, %v3693_v55 }
 0x164   :  { %v427_v18 = vpack.c.bf16 %v2679_v19, %v2678_v14  ;;  %v407_v20 = vpop.permute.xlu1 %406 }
 0x165   :  { %vm413_vm2 = vcmp.eq.s32.totalorder %v407_v20, %v3693_v55 }
 0x166   :  { %vm417_vm6 = vmor %vm397_vm15, %vm413_vm2  ;;  %647 = vperm.xlu1 %3199, %v3537_v13   ;;  %3034 = vmatprep.mubr.msk.bf16.mxu0 %vm4718_vm0, %v427_v18 }
 0x167   :  { %v2680_v2 = vsel %vm417_vm6, 1.0, %v3403_v9  ;;  %v487_v26 = vpop.permute.xlu0 %486 }
 0x168   :  { %v428_v1 = vpack.c.bf16 %v2681_v22, %v2680_v2  ;;  %vm497_vm0 = vcmp.eq.s32.totalorder %v487_v26, %v3693_v55 }
 0x169   :  { %v431_v27 = vpop.permute.xlu1 %430 }
 0x16a   :  { %3202 = vset.pattern.permute.xlu1 %v3401_v49  ;;  %3035 = vmatmul.mubr.msk.bf16.gmra.mrb[12].mxu0 %vm4719_vm10, %v428_v1  ;;  %vm441_vm9 = vcmp.eq.s32.totalorder %v431_v27, %v3693_v55 }
 0x16b   :  { %661 = vperm.xlu1 %3202, %v3543_v15   ;;  %v496_v17 = vpop.permute.xlu0 %495 }
 0x16e   :  { %v447_v45 = vpop.permute.xlu1 %446 }
 0x16f   :  { %664 = vperm.xlu1 %3202, %v3546_v16   ;;  %v3966_v50 = vpop.permute.xlu0 %555  ;;  %vm457_vm5 = vcmp.eq.s32.totalorder %v447_v45, %v3693_v55 }
 0x170   :  { %vm461_vm2 = vmor %vm441_vm9, %vm457_vm5 }
 0x172   :  { %v450_v25 = vpop.permute.xlu1 %449 }
 0x173   :  { %3203 = vset.pattern.permute.xlu1 %v3400_v36  ;;  %v711_v29 = vpop.permute.xlu0 %710  ;;  %vm458_vm11 = vcmp.eq.s32.totalorder %v450_v25, %v3693_v55 }
 0x174   :  { %688 = vperm.xlu1 %3203, %v3904_v10   ;;  %vm717_vm3 = vcmp.eq.s32.totalorder %v711_v29, %v3693_v55  ;;  %vm462_vm1 = vmor %vm442_vm8, %vm458_vm11  ;;  %vm500_vm11 = vcmp.eq.s32.totalorder %v496_v17, %v3693_v55 }
 0x175   :  { %vm3972_vm13 = vmor %vm701_vm7, %vm717_vm3 }
 0x176   :  { %v4721_v30 = vsel %vm3972_vm13, 4294967295, %v4720_v30  ;;  %vm482_vm3 = vmor %vm462_vm1, %vm478_vm14  ;;  %vm4722_vm14 = vnez %v4708_v63 }
 0x177   :  { %v440_v31 = vpop.permute.xlu1 %439  ;;  %v4018_v23 = vpop.permute.xlu0 %777 }
 0x178   :  { %3204 = vset.pattern.permute.xlu1 %v3402_v57  ;;  %vm444_vm10 = vcmp.eq.s32.totalorder %v440_v31, %v3693_v55 }
 0x179   :  { %704 = vperm.xlu1 %3204, %v3503_v4  }
 0x17b   :  { %v4022_v61 = vpop.permute.xlu0 %780 }
 0x17c   :  { %v456_v32 = vpop.permute.xlu1 %455 }
 0x17d   :  { %707 = vperm.xlu1 %3204, %v3506_v5   ;;  %vm460_vm15 = vcmp.eq.s32.totalorder %v456_v32, %v3693_v55 }
 0x17e   :  { %vm464_vm13 = vmor %vm444_vm10, %vm460_vm15 }
 0x181   :  { %3206 = vset.pattern.permute.xlu1 %v3400_v36  ;;  %v467_v34 = vpop.permute.xlu1 %466 }
 0x182   :  { %697 = vperm.xlu1 %3206, %v3924_v59   ;;  %vm477_vm12 = vcmp.eq.s32.totalorder %v467_v34, %v3693_v55 }
 0x183   :  { %vm481_vm6 = vmor %vm461_vm2, %vm477_vm12 }
 0x184   :  { %vm501_vm4 = vmor %vm481_vm6, %vm497_vm0  ;;  %vm4723_vm6 = vcmask 523264   ;;  %vm528_vm0 = vcmp.eq.s32.totalorder %v3838_v0, %v3693_v55 }
 0x185   :  { %v473_v8 = vpop.permute.xlu1 %472 }
 0x186   :  { %3207 = vset.pattern.permute.xlu1 %v3402_v57  ;;  %vm479_vm12 = vcmp.eq.s32.totalorder %v473_v8, %v3693_v55 }
 0x187   :  { %713 = vperm.xlu1 %3207, %v3509_v6   ;;  %vm483_vm1 = vmor %vm4722_vm14, %vm479_vm12 }
 0x189   :  { %v476_v36 = vpop.permute.xlu1 %475 }
 0x18a   :  { %vm480_vm7 = vcmp.eq.s32.totalorder %v476_v36, %v3693_v55 }
 0x18b   :  { %3208 = vset.pattern.permute.xlu1 %v3401_v49  ;;  %vm484_vm8 = vmor %vm464_vm13, %vm480_vm7  ;;  %v2682_v49 = vsel %vm501_vm4, 1.0, %v3403_v9 }
 0x18c   :  { %724 = vperm.xlu1 %3208, %v3512_v7   ;;  %vm504_vm2 = vmor %vm484_vm8, %vm500_vm11  ;;  %vm564_vm11 = vcmp.eq.s32.totalorder %v3966_v50, %v3693_v55 }
 0x18d   :  { %v2685_v42 = vsel %vm504_vm2, 1.0, %v3403_v9  ;;  %vm4724_vm4 = vmmov %vm4723_vm6 }
 0x18e   :  { %v490_v3 = vpop.permute.xlu1 %489 }
 0x18f   :  { %vm498_vm5 = vcmp.eq.s32.totalorder %v490_v3, %v3693_v55 }
 0x190   :  { %vm502_vm9 = vmor %vm482_vm3, %vm498_vm5  ;;  %730 = vperm.xlu1 %3208, %v3527_v11  }
 0x191   :  { %v2683_v37 = vsel %vm502_vm9, 1.0, %v3403_v9 }
 0x192   :  { %v513_v38 = vpack.c.bf16 %v2683_v37, %v2682_v49  ;;  %v493_v41 = vpop.permute.xlu1 %492 }
 0x193   :  { %vm499_vm13 = vcmp.eq.s32.totalorder %v493_v41, %v3693_v55 }
 0x194   :  { %vm503_vm15 = vmor %vm483_vm1, %vm499_vm13  ;;  %733 = vperm.xlu1 %3208, %v3537_v13   ;;  %3038 = vmatprep.mubr.msk.bf16.mxu0 %vm4723_vm6, %v513_v38 }
 0x195   :  { %v2684_v43 = vsel %vm503_vm15, 1.0, %v3403_v9 }
 0x196   :  { %v514_v44 = vpack.c.bf16 %v2685_v42, %v2684_v43 }
 0x197   :  { %v517_v46 = vpop.permute.xlu1 %516 }
 0x198   :  { %3210 = vset.pattern.permute.xlu1 %v3405_v51  ;;  %3039 = vmatmul.mubr.msk.bf16.gmra.mrb[16].mxu0 %vm4724_vm4, %v514_v44  ;;  %vm527_vm8 = vcmp.eq.s32.totalorder %v517_v46, %v3693_v55 }
 0x199   :  { %747 = vperm.xlu1 %3210, %v3543_v15  }
 0x19c   :  { %v533_v63 = vpop.permute.xlu1 %532 }
 0x19d   :  { %750 = vperm.xlu1 %3210, %v3546_v16   ;;  %vm543_vm7 = vcmp.eq.s32.totalorder %v533_v63, %v3693_v55 }
 0x19e   :  { %vm547_vm12 = vmor %vm527_vm8, %vm543_vm7 }
 0x1a0   :  { %v536_v48 = vpop.permute.xlu1 %535 }
 0x1a1   :  { %3211 = vset.pattern.permute.xlu1 %v3402_v57  ;;  %vm544_vm10 = vcmp.eq.s32.totalorder %v536_v48, %v3693_v55 }
 0x1a2   :  { %774 = vperm.xlu1 %3211, %v3904_v10   ;;  %vm548_vm5 = vmor %vm528_vm0, %vm544_vm10 }
 0x1a3   :  { %vm568_vm15 = vmor %vm548_vm5, %vm564_vm11  ;;  %vm4725_vm11 = vnez %v4712_v47 }
 0x1a5   :  { %v526_v21 = vpop.permute.xlu1 %525 }
 0x1a6   :  { %3212 = vset.pattern.permute.xlu1 %v3404_v35  ;;  %vm530_vm1 = vcmp.eq.s32.totalorder %v526_v21, %v3693_v55 }
 0x1a7   :  { %790 = vperm.xlu1 %3212, %v3503_v4   ;;  %v573_v4 = vpop.permute.xlu0 %572 }
 0x1a8   :  { %vm583_vm14 = vcmp.eq.s32.totalorder %v573_v4, %v3693_v55 }
 0x1aa   :  { %v542_v58 = vpop.permute.xlu1 %541 }
 0x1ab   :  { %793 = vperm.xlu1 %3212, %v3506_v5   ;;  %vm546_vm9 = vcmp.eq.s32.totalorder %v542_v58, %v3693_v55 }
 0x1ac   :  { %vm550_vm6 = vmor %vm530_vm1, %vm546_vm9 }
 0x1af   :  { %3214 = vset.pattern.permute.xlu1 %v3402_v57  ;;  %v553_v60 = vpop.permute.xlu1 %552 }
 0x1b0   :  { %783 = vperm.xlu1 %3214, %v3924_v59   ;;  %vm563_vm3 = vcmp.eq.s32.totalorder %v553_v60, %v3693_v55 }
 0x1b1   :  { %vm567_vm2 = vmor %vm547_vm12, %vm563_vm3 }
 0x1b2   :  { %vm587_vm4 = vmor %vm567_vm2, %vm583_vm14  ;;  %vm4726_vm14 = vcmask 523264  }
 0x1b3   :  { %v559_v62 = vpop.permute.xlu1 %558  ;;  %vm4727_vm1 = vmmov %vm4726_vm14 }
 0x1b4   :  { %3216 = vset.pattern.permute.xlu1 %v3404_v35  ;;  %vm565_vm3 = vcmp.eq.s32.totalorder %v559_v62, %v3693_v55  ;;  %v2686_v35 = vsel %vm587_vm4, 1.0, %v3403_v9 }
 0x1b5   :  { %799 = vperm.xlu1 %3216, %v3509_v6   ;;  %v582_v6 = vpop.permute.xlu0 %581  ;;  %vm569_vm5 = vmor %vm4725_vm11, %vm565_vm3  ;;  %vm669_vm11 = vcmp.eq.s32.totalorder %v3934_v28, %v3693_v55 }
 0x1b6   :  { %vm586_vm10 = vcmp.eq.s32.totalorder %v582_v6, %v3693_v55 }
 0x1b7   :  { %v562_v5 = vpop.permute.xlu1 %561 }
 0x1b8   :  { %vm566_vm13 = vcmp.eq.s32.totalorder %v562_v5, %v3693_v55 }
 0x1b9   :  { %3217 = vset.pattern.permute.xlu1 %v3405_v51  ;;  %vm570_vm0 = vmor %vm550_vm6, %vm566_vm13  ;;  %vm614_vm13 = vcmp.eq.s32.totalorder %v3878_v24, %v3693_v55  ;;  %v4115_v37 = vpop.permute.xlu0 %796 }
 0x1ba   :  { %810 = vperm.xlu1 %3217, %v3512_v7   ;;  %vm590_vm12 = vmor %vm570_vm0, %vm586_vm10 }
 0x1bb   :  { %v2689_v10 = vsel %vm590_vm12, 1.0, %v3403_v9 }
 0x1bc   :  { %v576_v57 = vpop.permute.xlu1 %575 }
 0x1bd   :  { %vm584_vm7 = vcmp.eq.s32.totalorder %v576_v57, %v3693_v55  ;;  %v745_v42 = vpop.permute.xlu0 %744 }
 0x1be   :  { %vm588_vm8 = vmor %vm568_vm15, %vm584_vm7  ;;  %816 = vperm.xlu1 %3217, %v3527_v11   ;;  %vm650_vm15 = vcmp.eq.s32.totalorder %v3894_v39, %v3693_v55 }
 0x1bf   :  { %v2687_v51 = vsel %vm588_vm8, 1.0, %v3403_v9 }
 0x1c0   :  { %v599_v7 = vpack.c.bf16 %v2687_v51, %v2686_v35  ;;  %v579_v0 = vpop.permute.xlu1 %578 }
 0x1c1   :  { %vm585_vm9 = vcmp.eq.s32.totalorder %v579_v0, %v3693_v55  ;;  %v754_v46 = vpop.permute.xlu0 %753 }
 0x1c2   :  { %vm589_vm2 = vmor %vm569_vm5, %vm585_vm9  ;;  %819 = vperm.xlu1 %3217, %v3537_v13   ;;  %3042 = vmatprep.mubr.msk.bf16.mxu0 %vm4726_vm14, %v599_v7 }
 0x1c3   :  { %v2688_v11 = vsel %vm589_vm2, 1.0, %v3403_v9 }
 0x1c4   :  { %v600_v59 = vpack.c.bf16 %v2689_v10, %v2688_v11 }
 0x1c5   :  { %v603_v12 = vpop.permute.xlu1 %602 }
 0x1c6   :  { %3219 = vset.pattern.permute.xlu1 %v3406_v40  ;;  %3043 = vmatmul.mubr.msk.bf16.gmra.mrb[20].mxu0 %vm4727_vm1, %v600_v59  ;;  %vm613_vm3 = vcmp.eq.s32.totalorder %v603_v12, %v3693_v55 }
 0x1c7   :  { %833 = vperm.xlu1 %3219, %v3543_v15  }
 0x1ca   :  { %v619_v47 = vpop.permute.xlu1 %618 }
 0x1cb   :  { %836 = vperm.xlu1 %3219, %v3546_v16   ;;  %vm629_vm10 = vcmp.eq.s32.totalorder %v619_v47, %v3693_v55 }
 0x1cc   :  { %vm633_vm8 = vmor %vm613_vm3, %vm629_vm10  ;;  %vm4730_vm3 = vnez %v4716_v53  ;;  %v4196_v53 = vshrl.u32 %v71_v52, 7 }
 0x1cd   :  { %v4060_v13 = vpop.f32.mrb[0].mxu0 }
 0x1ce   :  { %v4064_v14 = vpop.f32.mrb[1].mxu0  ;;  %v622_v19 = vpop.permute.xlu1 %621 }
 0x1cf   :  { %vm630_vm6 = vcmp.eq.s32.totalorder %v622_v19, %v3693_v55  ;;  %v4067_v40 = vpop.f32.mrb[2].mxu0 }
 0x1d0   :  { %vm634_vm4 = vmor %vm614_vm13, %vm630_vm6  ;;  %v4069_v15 = vpop.f32.mrb[3].mxu0  ;;  %vm672_vm13 = vcmp.eq.s32.totalorder %v3945_v56, %v3693_v55 }
 0x1d1   :  { %vm4071_vm0 = vmor %vm634_vm4, %vm650_vm15 }
 0x1d3   :  { %v612_v24 = vpop.permute.xlu1 %611 }
 0x1d4   :  { %vm616_vm9 = vcmp.eq.s32.totalorder %v612_v24, %v3693_v55 }
 0x1d8   :  { %v628_v18 = vpop.permute.xlu1 %627 }
 0x1d9   :  { %vm632_vm12 = vcmp.eq.s32.totalorder %v628_v18, %v3693_v55 }
 0x1da   :  { %vm636_vm14 = vmor %vm616_vm9, %vm632_vm12  ;;  %vm736_vm9 = vcmp.eq.s32.totalorder %v3951_v33, %v3693_v55 }
 0x1dd   :  { %v639_v20 = vpop.permute.xlu1 %638 }
 0x1de   :  { %vm649_vm7 = vcmp.eq.s32.totalorder %v639_v20, %v3693_v55 }
 0x1df   :  { %vm653_vm5 = vmor %vm633_vm8, %vm649_vm7 }
 0x1e0   :  { %vm673_vm1 = vmor %vm653_vm5, %vm669_vm11  ;;  %vm4731_vm5 = vcmask 523264  }
 0x1e1   :  { %v645_v22 = vpop.permute.xlu1 %644  ;;  %v2690_v28 = vsel %vm673_vm1, 1.0, %v3403_v9 }
 0x1e2   :  { %vm651_vm4 = vcmp.eq.s32.totalorder %v645_v22, %v3693_v55 }
 0x1e3   :  { %vm655_vm8 = vmor %vm4730_vm3, %vm651_vm4 }
 0x1e5   :  { %v648_v39 = vpop.permute.xlu1 %647 }
 0x1e6   :  { %v4079_v2 = vpop.f32.mrb[4].mxu0  ;;  %vm652_vm2 = vcmp.eq.s32.totalorder %v648_v39, %v3693_v55 }
 0x1e7   :  { %v4083_v26 = vpop.f32.mrb[5].mxu0  ;;  %vm656_vm15 = vmor %vm636_vm14, %vm652_vm2  ;;  %vm700_vm2 = vcmp.eq.s32.totalorder %v3918_v54, %v3693_v55 }
 0x1e8   :  { %v4087_v1 = vpop.f32.mrb[6].mxu0  ;;  %vm676_vm7 = vmor %vm656_vm15, %vm672_vm13 }
 0x1e9   :  { %v4089_v27 = vpop.f32.mrb[7].mxu0  ;;  %v2693_v56 = vsel %vm676_vm7, 1.0, %v3403_v9 }
 0x1ea   :  { %v662_v17 = vpop.permute.xlu1 %661 }
 0x1eb   :  { %vm670_vm6 = vcmp.eq.s32.totalorder %v662_v17, %v3693_v55 }
 0x1ec   :  { %vm674_vm10 = vmor %vm4071_vm0, %vm670_vm6 }
 0x1ed   :  { %v2691_v45 = vsel %vm674_vm10, 1.0, %v3403_v9  ;;  %vm4732_vm0 = vmmov %vm4731_vm5 }
 0x1ee   :  { %v685_v50 = vpack.c.bf16 %v2691_v45, %v2690_v28  ;;  %v665_v25 = vpop.permute.xlu1 %664 }
 0x1ef   :  { %vm671_vm12 = vcmp.eq.s32.totalorder %v665_v25, %v3693_v55 }
 0x1f0   :  { %vm675_vm11 = vmor %vm655_vm8, %vm671_vm12  ;;  %3046 = vmatprep.mubr.msk.bf16.mxu0 %vm4731_vm5, %v685_v50  ;;  %vm755_vm8 = vcmp.eq.s32.totalorder %v745_v42, %v3693_v55 }
 0x1f1   :  { %v2692_v29 = vsel %vm675_vm11, 1.0, %v3403_v9 }
 0x1f2   :  { %v686_v31 = vpack.c.bf16 %v2693_v56, %v2692_v29  ;;  %v3224_v29 = vld [vmem:[#allocation2 + $0xc0] sm:$0xff]  }
 0x1f3   :  { %v689_v32 = vpop.permute.xlu1 %688  ;;  %2874 = vmatprep.subr.bf16.mxu0 %v3224_v29 }
 0x1f4   :  { %3047 = vmatmul.mubr.msk.bf16.gmra.mrb[24].mxu0 %vm4732_vm0, %v686_v31  ;;  %vm699_vm4 = vcmp.eq.s32.totalorder %v689_v32, %v3693_v55  ;;  %v3225_v31 = vld [vmem:[#allocation2 + $0x80] sm:$0xff]  }
 0x1f5   :  { %2875 = vmatpush3.bf16.msra.mxu0 %v3225_v31 }
 0x1f8   :  { %v705_v34 = vpop.permute.xlu1 %704 }
 0x1f9   :  { %vm715_vm15 = vcmp.eq.s32.totalorder %v705_v34, %v3693_v55 }
 0x1fa   :  { %vm719_vm10 = vmor %vm699_vm4, %vm715_vm15  ;;  %vm4735_vm4 = vnez %v4721_v30  ;;  %v814_v30 = vpop.permute.xlu0 %813 }
 0x1fc   :  { %v708_v8 = vpop.permute.xlu1 %707 }
 0x1fd   :  { %vm716_vm14 = vcmp.eq.s32.totalorder %v708_v8, %v3693_v55 }
 0x1fe   :  { %vm720_vm1 = vmor %vm700_vm2, %vm716_vm14  ;;  %vm758_vm2 = vcmp.eq.s32.totalorder %v754_v46, %v3693_v55  ;;  %v831_v47 = vpop.permute.xlu0 %830 }
 0x1ff   :  { %vm4111_vm13 = vmor %vm720_vm1, %vm736_vm9 }
 0x201   :  { %v698_v36 = vpop.permute.xlu1 %697 }
 0x202   :  { %vm702_vm12 = vcmp.eq.s32.totalorder %v698_v36, %v3693_v55  ;;  %v869_v36 = vsub.s32 0, %v4196_v53 }
 0x206   :  { %v714_v3 = vpop.permute.xlu1 %713 }
 0x207   :  { %vm718_vm7 = vcmp.eq.s32.totalorder %v714_v3, %v3693_v55  ;;  %v4202_v3 = vld [vmem:[%s4690_s5] sm:$0xff] }
 0x208   :  { %vm722_vm5 = vmor %vm702_vm12, %vm718_vm7 }
 0x20b   :  { %v725_v49 = vpop.permute.xlu1 %724 }
 0x20c   :  { %vm735_vm6 = vcmp.eq.s32.totalorder %v725_v49, %v3693_v55  ;;  %v3226_v49 = vld [vmem:[#allocation2 + $0xc8] sm:$0xff]  }
 0x20d   :  { %vm739_vm3 = vmor %vm719_vm10, %vm735_vm6  ;;  %2876 = vmatprep.subr.bf16.mxu0 %v3226_v49 }
 0x20e   :  { %vm759_vm0 = vmor %vm739_vm3, %vm755_vm8  ;;  %vm4736_vm8 = vcmask 523264  }
 0x20f   :  { %v4117_v38 = vpop.f32.mrb[8].mxu0  ;;  %v731_v41 = vpop.permute.xlu1 %730  ;;  %v2694_v48 = vsel %vm759_vm0, 1.0, %v3403_v9 }
 0x210   :  { %v4119_v33 = vpop.f32.mrb[9].mxu0  ;;  %vm737_vm1 = vcmp.eq.s32.totalorder %v731_v41, %v3693_v55  ;;  %v4207_v41 = vrot.slane %v4202_v3, %v869_v36 }
 0x211   :  { %v4122_v54 = vpop.f32.mrb[10].mxu0  ;;  %vm741_vm10 = vmor %vm4735_vm4, %vm737_vm1  ;;  %vm841_vm4 = vcmp.eq.s32.totalorder %v831_v47, %v3693_v55 }
 0x212   :  { %v4125_v43 = vpop.f32.mrb[11].mxu0  ;;  %v988_v52 = vadd.f32 %v4069_v15, %v4207_v41  ;;  %v985_v42 = vadd.f32 %v4064_v14, %v4207_v41  ;;  %v993_v46 = vadd.f32 %v4060_v13, %v4207_v41  ;;  %v1001_v15 = vadd.f32 %v4083_v26, %v4207_v41 }
 0x213   :  { %v734_v44 = vpop.permute.xlu1 %733 }
 0x214   :  { %vm738_vm11 = vcmp.eq.s32.totalorder %v734_v44, %v3693_v55  ;;  %v1164_v44 = vmul.f32 0.05, %v988_v52 }
 0x215   :  { %vm742_vm9 = vmor %vm722_vm5, %vm738_vm11  ;;  %vm786_vm5 = vcmp.eq.s32.totalorder %v4018_v23, %v3693_v55  ;;  %v840_v23 = vpop.permute.xlu0 %839 }
 0x216   :  { %vm762_vm6 = vmor %vm742_vm9, %vm758_vm2 }
 0x217   :  { %v2697_v62 = vsel %vm762_vm6, 1.0, %v3403_v9 }
 0x218   :  { %v748_v63 = vpop.permute.xlu1 %747 }
 0x219   :  { %vm756_vm14 = vcmp.eq.s32.totalorder %v748_v63, %v3693_v55  ;;  %v1163_v63 = vmul.f32 0.05, %v985_v42 }
 0x21a   :  { %vm760_vm15 = vmor %vm4111_vm13, %vm756_vm14  ;;  %vm822_vm14 = vcmp.eq.s32.totalorder %v814_v30, %v3693_v55 }
 0x21b   :  { %v2695_v21 = vsel %vm760_vm15, 1.0, %v3403_v9  ;;  %vm4737_vm13 = vmmov %vm4736_vm8 }
 0x21c   :  { %v771_v58 = vpack.c.bf16 %v2695_v21, %v2694_v48  ;;  %v751_v60 = vpop.permute.xlu1 %750  ;;  %v1165_v21 = vmul.f32 0.05, %v993_v46 }
 0x21d   :  { %vm757_vm7 = vcmp.eq.s32.totalorder %v751_v60, %v3693_v55  ;;  %v996_v60 = vadd.f32 %v4067_v40, %v4207_v41  ;;  %v1004_v40 = vadd.f32 %v4089_v27, %v4207_v41 }
 0x21e   :  { %vm761_vm3 = vmor %vm741_vm10, %vm757_vm7  ;;  %3050 = vmatprep.mubr.msk.bf16.mxu0 %vm4736_vm8, %v771_v58 }
 0x21f   :  { %v2696_v4 = vsel %vm761_vm3, 1.0, %v3403_v9 }
 0x220   :  { %v772_v5 = vpack.c.bf16 %v2697_v62, %v2696_v4 }
 0x221   :  { %v775_v6 = vpop.permute.xlu1 %774 }
 0x222   :  { %3051 = vmatmul.mubr.msk.bf16.gmra.mrb[28].mxu0 %vm4737_vm13, %v772_v5  ;;  %vm785_vm9 = vcmp.eq.s32.totalorder %v775_v6, %v3693_v55  ;;  %vm787_vm13 = vcmp.eq.s32.totalorder %v4022_v61, %v3693_v55  ;;  %v1166_v5 = vmul.f32 0.05, %v996_v60  ;;  %v1167_v6 = vmul.f32 0.05, %v1001_v15 }
 0x226   :  { %v791_v57 = vpop.permute.xlu1 %790 }
 0x227   :  { %vm801_vm11 = vcmp.eq.s32.totalorder %v791_v57, %v3693_v55 }
 0x228   :  { %vm805_vm1 = vmor %vm785_vm9, %vm801_vm11 }
 0x22a   :  { %v794_v35 = vpop.permute.xlu1 %793 }
 0x22b   :  { %vm802_vm12 = vcmp.eq.s32.totalorder %v794_v35, %v3693_v55 }
 0x22c   :  { %vm806_vm2 = vmor %vm786_vm5, %vm802_vm12  ;;  %vm803_vm12 = vcmp.eq.s32.totalorder %v4115_v37, %v3693_v55  ;;  %v3227_v37 = vld [vmem:[#allocation2 + $0x88] sm:$0xff]  }
 0x22d   :  { %vm826_vm10 = vmor %vm806_vm2, %vm822_vm14  ;;  %2877 = vmatpush3.bf16.msra.mxu0 %v3227_v37  ;;  %v3235_v37 = vld [vmem:[#allocation2] sm:$0xff]  }
 0x22f   :  { %v784_v51 = vpop.permute.xlu1 %783 }
 0x230   :  { %vm788_vm7 = vcmp.eq.s32.totalorder %v784_v51, %v3693_v55 }
 0x234   :  { %v800_v7 = vpop.permute.xlu1 %799 }
 0x235   :  { %vm804_vm15 = vcmp.eq.s32.totalorder %v800_v7, %v3693_v55 }
 0x236   :  { %vm808_vm8 = vmor %vm788_vm7, %vm804_vm15 }
 0x239   :  { %v811_v0 = vpop.permute.xlu1 %810 }
 0x23a   :  { %vm821_vm0 = vcmp.eq.s32.totalorder %v811_v0, %v3693_v55  ;;  %v1168_v0 = vmul.f32 0.05, %v1004_v40 }
 0x23b   :  { %vm825_vm6 = vmor %vm805_vm1, %vm821_vm0  ;;  %vm844_vm0 = vcmp.eq.s32.totalorder %v840_v23, %v3693_v55 }
 0x23c   :  { %vm845_vm5 = vmor %vm825_vm6, %vm841_vm4 }
 0x23d   :  { %v4146_v10 = vpop.f32.mrb[12].mxu0  ;;  %v817_v11 = vpop.permute.xlu1 %816  ;;  %vm807_vm1 = vmor %vm787_vm13, %vm803_vm12  ;;  %v2698_v18 = vsel %vm845_vm5, 1.0, %v3403_v9  ;;  %vm1127_vm13 = vcmp.gt.f32.partialorder %v985_v42, 0.0  ;;  %vm1129_vm12 = vcmp.gt.f32.partialorder %v993_v46, 0.0  ;;  %vm1130_vm5 = vcmp.gt.f32.partialorder %v996_v60, 0.0 }
 0x23e   :  { %v4149_v59 = vpop.f32.mrb[13].mxu0  ;;  %vm823_vm2 = vcmp.eq.s32.totalorder %v817_v11, %v3693_v55  ;;  %v4217_v58 = vsel %vm1127_vm13, %v985_v42, %v1163_v63  ;;  %v4229_v4 = vsel %vm1129_vm12, %v993_v46, %v1165_v21  ;;  %v4236_v51 = vsel %vm1130_vm5, %v996_v60, %v1166_v5  ;;  %v3236_v46 = vld [vmem:[#allocation2 + $0x48] sm:$0xff]   ;;  %v3228_v5 = vld [vmem:[#allocation2 + $0xd0] sm:$0xff]  }
 0x23f   :  { %v4152_v12 = vpop.f32.mrb[14].mxu0  ;;  %vm827_vm7 = vmor %vm807_vm1, %vm823_vm2  ;;  %v1276_v13 = vmul.f32 %v4217_v58, %v4217_v58  ;;  %v1278_v26 = vmul.f32 %v4229_v4, %v4229_v4  ;;  %v1009_v11 = vadd.f32 %v4079_v2, %v4207_v41  ;;  %v1279_v27 = vmul.f32 %v4236_v51, %v4236_v51  ;;  %v3237_v21 = vld [vmem:[#allocation2 + $0x8] sm:$0xff]   ;;  %2878 = vmatprep.subr.bf16.mxu0 %v3228_v5 }
 0x240   :  { %v4157_v19 = vpop.f32.mrb[15].mxu0  ;;  %v1012_v2 = vadd.f32 %v4087_v1, %v4207_v41  ;;  %v3239_v5 = vld [vmem:[#allocation2 + $0xa8] sm:$0xff]  }
 0x241   :  { %v820_v16 = vpop.permute.xlu1 %819 }
 0x242   :  { %vm824_vm3 = vcmp.eq.s32.totalorder %v820_v16, %v3693_v55  ;;  %v1170_v1 = vmul.f32 0.05, %v1012_v2  ;;  %vm1134_vm2 = vcmp.gt.f32.partialorder %v1012_v2, 0.0 }
 0x243   :  { %vm828_vm11 = vmor %vm808_vm8, %vm824_vm3  ;;  %vm4738_vm3 = vcmask 523264   ;;  %vm1128_vm8 = vcmp.gt.f32.partialorder %v988_v52, 0.0 }
 0x244   :  { %vm848_vm15 = vmor %vm828_vm11, %vm844_vm0  ;;  %v4215_v48 = vsel %vm1128_vm8, %v988_v52, %v1164_v44  ;;  %vm1131_vm11 = vcmp.gt.f32.partialorder %v1001_v15, 0.0  ;;  %vm1132_vm0 = vcmp.gt.f32.partialorder %v1004_v40, 0.0 }
 0x245   :  { %v2701_v39 = vsel %vm848_vm15, 1.0, %v3403_v9  ;;  %v1277_v14 = vmul.f32 %v4215_v48, %v4215_v48  ;;  %v1235_v62 = vadd.f32 %v4215_v48, %v4217_v58  ;;  %v4238_v7 = vsel %vm1131_vm11, %v1001_v15, %v1167_v6  ;;  %v3240_v6 = vld [vmem:[#allocation2 + $0x50] sm:$0xff]  }
 0x246   :  { %v834_v24 = vpop.permute.xlu1 %833  ;;  %v1280_v16 = vmul.f32 %v4238_v7, %v4238_v7  ;;  %v4247_v23 = vsel %vm1132_vm0, %v1004_v40, %v1168_v0  ;;  %v3229_v40 = vld [vmem:[#allocation2 + $0x90] sm:$0xff]  }
 0x247   :  { %vm842_vm9 = vcmp.eq.s32.totalorder %v834_v24, %v3693_v55  ;;  %v1312_v57 = vadd.f32 %v1277_v14, %v1276_v13  ;;  %v1236_v35 = vadd.f32 %v1235_v62, %v4229_v4  ;;  %v1281_v31 = vmul.f32 %v4247_v23, %v4247_v23  ;;  %2879 = vmatpush3.bf16.msra.mxu0 %v3229_v40 }
 0x248   :  { %vm846_vm14 = vmor %vm826_vm10, %vm842_vm9  ;;  %vm1133_vm9 = vcmp.gt.f32.partialorder %v1009_v11, 0.0  ;;  %v4272_v14 = vsel %vm1134_vm2, %v1012_v2, %v1170_v1  ;;  %v1028_v2 = vadd.f32 %v4122_v54, %v4207_v41  ;;  %v3233_v1 = vld [vmem:[#allocation2 + $0xa0] sm:$0xff]  }
 0x249   :  { %v2699_v20 = vsel %vm846_vm14, 1.0, %v3403_v9  ;;  %vm4739_vm10 = vmmov %vm4738_vm3  ;;  %v1313_v30 = vadd.f32 %v1312_v57, %v1278_v26  ;;  %v1237_v47 = vadd.f32 %v1236_v35, %v4236_v51  ;;  %v3241_v57 = vld [vmem:[#allocation2 + $0x10] sm:$0xff]   ;;  %v1025_v26 = vadd.f32 %v4117_v38, %v4207_v41  ;;  %v3231_v38 = vld [vmem:[#allocation2 + $0x98] sm:$0xff]  }
 0x24a   :  { %v857_v61 = vpack.c.bf16 %v2699_v20, %v2698_v18  ;;  %v837_v22 = vpop.permute.xlu1 %836  ;;  %v1283_v35 = vmul.f32 %v4272_v14, %v4272_v14  ;;  %v1174_v54 = vmul.f32 0.05, %v1028_v2 }
 0x24b   :  { %vm843_vm6 = vcmp.eq.s32.totalorder %v837_v22, %v3693_v55  ;;  %v1238_v18 = vadd.f32 %v1237_v47, %v4238_v7  ;;  %v1314_v20 = vadd.f32 %v1313_v30, %v1279_v27  ;;  %v1169_v22 = vmul.f32 0.05, %v1009_v11  ;;  %v3230_v27 = vld [vmem:[#allocation2 + $0xd8] sm:$0xff]  }
 0x24c   :  { %vm847_vm4 = vmor %vm827_vm7, %vm843_vm6  ;;  %3054 = vmatprep.mubr.msk.bf16.mxu0 %vm4738_vm3, %v857_v61  ;;  %v3242_v47 = vld [vmem:[#allocation2 + $0x58] sm:$0xff]   ;;  %2880 = vmatprep.subr.bf16.mxu0 %v3230_v27  ;;  %vm1137_vm15 = vcmp.gt.f32.partialorder %v1025_v26, 0.0  ;;  %vm1138_vm7 = vcmp.gt.f32.partialorder %v1028_v2, 0.0 }
 0x24d   :  { %v2700_v17 = vsel %vm847_vm4, 1.0, %v3403_v9  ;;  %v1315_v29 = vadd.f32 %v1314_v20, %v1280_v16  ;;  %v1239_v52 = vadd.f32 %v1238_v18, %v4247_v23  ;;  %v4265_v42 = vsel %vm1133_vm9, %v1009_v11, %v1169_v22  ;;  %v3243_v20 = vld [vmem:[#allocation2 + $0x18] sm:$0xff]   ;;  %2881 = vmatpush3.bf16.msra.mxu0 %v3231_v38  ;;  %v3252_v38 = vld [vmem:[#allocation2 + $0x30] sm:$0xff]  }
 0x24e   :  { %v858_v28 = vpack.c.bf16 %v2701_v39, %v2700_v17  ;;  %v1017_v39 = vadd.f32 %v4119_v33, %v4207_v41  ;;  %v1020_v33 = vadd.f32 %v4125_v43, %v4207_v41  ;;  %v1282_v60 = vmul.f32 %v4265_v42, %v4265_v42 }
 0x24f   :  { %v1316_v63 = vadd.f32 %v1315_v29, %v1281_v31  ;;  %v1240_v15 = vadd.f32 %v1239_v52, %v4265_v42  ;;  %v1173_v22 = vmul.f32 0.05, %v1025_v26  ;;  %v3232_v31 = vld [vmem:[#allocation2 + $0xe0] sm:$0xff]  }
 0x250   :  { %3055 = vmatmul.mubr.msk.bf16.gmra.mrb[32].mxu0 %vm4739_vm10, %v858_v28  ;;  %v3234_v28 = vld [vmem:[#allocation2 + $0x40] sm:$0xff]   ;;  %v1171_v44 = vmul.f32 0.05, %v1017_v39  ;;  %vm1135_vm14 = vcmp.gt.f32.partialorder %v1017_v39, 0.0  ;;  %v1172_v62 = vmul.f32 0.05, %v1020_v33  ;;  %2882 = vmatprep.subr.bf16.mxu0 %v3232_v31  ;;  %v1044_v31 = vadd.f32 %v4152_v12, %v4207_v41 }
 0x251   :  { %2810 = vmatprep.subr.bf16.mxu1 %v3234_v28  ;;  %v1317_v43 = vadd.f32 %v1316_v63, %v1282_v60  ;;  %vm1136_vm1 = vcmp.gt.f32.partialorder %v1020_v33, 0.0  ;;  %v1241_v0 = vadd.f32 %v1240_v15, %v4272_v14  ;;  %2883 = vmatpush3.bf16.msra.mxu0 %v3233_v1  ;;  %v3248_v60 = vld [vmem:[#allocation2 + $0x68] sm:$0xff]  }
 0x252   :  { %2811 = vmatpush3.bf16.msra.mxu1 %v3235_v37  ;;  %v4274_v13 = vsel %vm1135_vm14, %v1017_v39, %v1171_v44  ;;  %v4283_v11 = vsel %vm1136_vm1, %v1020_v33, %v1172_v62  ;;  %v1033_v39 = vadd.f32 %v4149_v59, %v4207_v41  ;;  %v3245_v37 = vld [vmem:[#allocation2 + $0x60] sm:$0xff]   ;;  %v4293_v33 = vsel %vm1137_vm15, %v1025_v26, %v1173_v22  ;;  %v3254_v22 = vld [vmem:[#allocation2 + $0x78] sm:$0xff]  }
 0x253   :  { %2812 = vmatprep.subr.bf16.mxu1 %v3236_v46  ;;  %v1284_v30 = vmul.f32 %v4274_v13, %v4274_v13  ;;  %v1242_v16 = vadd.f32 %v1241_v0, %v4274_v13  ;;  %v1318_v18 = vadd.f32 %v1317_v43, %v1283_v35  ;;  %v1285_v29 = vmul.f32 %v4283_v11, %v4283_v11  ;;  %v3247_v44 = vld [vmem:[#allocation2 + $0x20] sm:$0xff]   ;;  %v3244_v35 = vld [vmem:[#allocation2 + $0xf0] sm:$0xff]  }
 0x254   :  { %v1175_v46 = vmul.f32 0.05, %v1033_v39  ;;  %v1036_v59 = vadd.f32 %v4157_v19, %v4207_v41  ;;  %vm1139_vm6 = vcmp.gt.f32.partialorder %v1033_v39, 0.0  ;;  %v1286_v15 = vmul.f32 %v4293_v33, %v4293_v33  ;;  %v3250_v0 = vld [vmem:[#allocation2 + $0x70] sm:$0xff]  }
 0x255   :  { %v1319_v28 = vadd.f32 %v1318_v18, %v1284_v30  ;;  %v1243_v52 = vadd.f32 %v1242_v16, %v4283_v11  ;;  %v4300_v43 = vsel %vm1138_vm7, %v1028_v2, %v1174_v54  ;;  %v1041_v26 = vadd.f32 %v4146_v10, %v4207_v41  ;;  %v3246_v16 = vld [vmem:[#allocation2 + $0xb0] sm:$0xff]   ;;  %v3251_v18 = vld [vmem:[#allocation2 + $0xf8] sm:$0xff]  }
 0x256   :  { %2813 = vmatpush3.bf16.msra.mxu1 %v3237_v21  ;;  %v3238_v21 = vld [vmem:[#allocation2 + $0xe8] sm:$0xff]   ;;  %v4302_v40 = vsel %vm1139_vm6, %v1033_v39, %v1175_v46  ;;  %v1176_v19 = vmul.f32 0.05, %v1036_v59  ;;  %vm1140_vm4 = vcmp.gt.f32.partialorder %v1036_v59, 0.0  ;;  %v1287_v30 = vmul.f32 %v4300_v43, %v4300_v43  ;;  %v3253_v39 = vld [vmem:[#allocation2 + $0xb8] sm:$0xff]  }
 0x257   :  { %2814 = vmatprep.subr.bf16.mxu1 %v3240_v6  ;;  %v1320_v63 = vadd.f32 %v1319_v28, %v1285_v29  ;;  %v1244_v62 = vadd.f32 %v1243_v52, %v4293_v33  ;;  %v3249_v6 = vld [vmem:[#allocation2 + $0x28] sm:$0xff]   ;;  %2884 = vmatprep.subr.bf16.mxu0 %v3238_v21  ;;  %v3255_v28 = vld [vmem:[#allocation2 + $0x38] sm:$0xff]   ;;  %v1177_v29 = vmul.f32 0.05, %v1041_v26  ;;  %vm1141_vm3 = vcmp.gt.f32.partialorder %v1041_v26, 0.0 }
 0x258   :  { %2885 = vmatpush3.bf16.msra.mxu0 %v3239_v5  ;;  %v1178_v46 = vmul.f32 0.05, %v1044_v31  ;;  %vm1142_vm10 = vcmp.gt.f32.partialorder %v1044_v31, 0.0 }
 0x259   :  { %v1245_v27 = vadd.f32 %v1244_v62, %v4300_v43  ;;  %2886 = vmatprep.subr.bf16.mxu0 %v3244_v35  ;;  %v4321_v54 = vsel %vm1141_vm3, %v1041_v26, %v1177_v29 }
 0x25a   :  { %2815 = vmatpush3.bf16.msra.mxu1 %v3241_v57  ;;  %v1321_v57 = vadd.f32 %v1320_v63, %v1286_v15  ;;  %v1290_v63 = vmul.f32 %v4321_v54, %v4321_v54 }
 0x25b   :  { %2816 = vmatprep.subr.bf16.mxu1 %v3242_v47  ;;  %v1288_v47 = vmul.f32 %v4302_v40, %v4302_v40  ;;  %v1246_v10 = vadd.f32 %v1245_v27, %v4302_v40 }
 0x25c   :  { %v1322_v2 = vadd.f32 %v1321_v57, %v1287_v30  ;;  %2887 = vmatpush3.bf16.msra.mxu0 %v3246_v16 }
 0x25d   :  { %2888 = vmatprep.subr.bf16.mxu0 %v3251_v18 }
 0x25e   :  { %2817 = vmatpush3.bf16.msra.mxu1 %v3243_v20  ;;  %v4311_v20 = vsel %vm1140_vm4, %v1036_v59, %v1176_v19  ;;  %v1323_v52 = vadd.f32 %v1322_v2, %v1288_v47 }
 0x25f   :  { %2818 = vmatprep.subr.bf16.mxu1 %v3245_v37  ;;  %v1289_v1 = vmul.f32 %v4311_v20, %v4311_v20 }
 0x260   :  { %2889 = vmatpush3.bf16.msra.mxu0 %v3253_v39 }
 0x262   :  { %2819 = vmatpush3.bf16.msra.mxu1 %v3247_v44  ;;  %v1247_v44 = vadd.f32 %v1246_v10, %v4311_v20 }
 0x263   :  { %2820 = vmatprep.subr.bf16.mxu1 %v3248_v60  ;;  %v4328_v60 = vsel %vm1142_vm10, %v1044_v31, %v1178_v46 }
 0x264   :  { %v1248_v21 = vadd.f32 %v1247_v44, %v4321_v54 }
 0x266   :  { %2821 = vmatpush3.bf16.msra.mxu1 %v3249_v6  ;;  %v1249_v19 = vadd.f32 %v1248_v21, %v4328_v60 }
 0x267   :  { %2822 = vmatprep.subr.bf16.mxu1 %v3250_v0 }
 0x26a   :  { %2823 = vmatpush3.bf16.msra.mxu1 %v3252_v38 }
 0x26b   :  { %v4179_v45 = vpop.f32.mrb[16].mxu0  ;;  %2824 = vmatprep.subr.bf16.mxu1 %v3254_v22 }
 0x26c   :  { %v4181_v50 = vpop.f32.mrb[17].mxu0  ;;  %v1057_v6 = vadd.f32 %v4179_v45, %v4207_v41 }
 0x26d   :  { %v4183_v25 = vpop.f32.mrb[18].mxu0  ;;  %v1049_v37 = vadd.f32 %v4181_v50, %v4207_v41  ;;  %v1324_v50 = vadd.f32 %v1323_v52, %v1289_v1 }
 0x26e   :  { %v4185_v56 = vpop.f32.mrb[19].mxu0  ;;  %2825 = vmatpush3.bf16.msra.mxu1 %v3255_v28  ;;  %v1181_v30 = vmul.f32 0.05, %v1057_v6  ;;  %v1060_v27 = vadd.f32 %v4183_v25, %v4207_v41  ;;  %vm1145_vm12 = vcmp.gt.f32.partialorder %v1057_v6, 0.0 }
 0x26f   :  { %v1179_v59 = vmul.f32 0.05, %v1049_v37  ;;  %v1052_v12 = vadd.f32 %v4185_v56, %v4207_v41  ;;  %vm1143_vm8 = vcmp.gt.f32.partialorder %v1049_v37, 0.0  ;;  %v1325_v5 = vadd.f32 %v1324_v50, %v1290_v63 }
 0x270   :  { %v1291_v56 = vmul.f32 %v4328_v60, %v4328_v60  ;;  %v4351_v10 = vsel %vm1145_vm12, %v1057_v6, %v1181_v30  ;;  %v1182_v2 = vmul.f32 0.05, %v1060_v27  ;;  %vm1146_vm5 = vcmp.gt.f32.partialorder %v1060_v27, 0.0 }
 0x271   :  { %v4330_v15 = vsel %vm1143_vm8, %v1049_v37, %v1179_v59  ;;  %v1180_v62 = vmul.f32 0.05, %v1052_v12  ;;  %vm1144_vm13 = vcmp.gt.f32.partialorder %v1052_v12, 0.0  ;;  %v1294_v31 = vmul.f32 %v4351_v10, %v4351_v10 }
 0x272   :  { %v1292_v57 = vmul.f32 %v4330_v15, %v4330_v15  ;;  %v1250_v35 = vadd.f32 %v1249_v19, %v4330_v15  ;;  %v1326_v0 = vadd.f32 %v1325_v5, %v1291_v56  ;;  %v4360_v52 = vsel %vm1146_vm5, %v1060_v27, %v1182_v2 }
 0x273   :  { %v4339_v26 = vsel %vm1144_vm13, %v1052_v12, %v1180_v62  ;;  %v1295_v59 = vmul.f32 %v4360_v52, %v4360_v52 }
 0x274   :  { %v1327_v47 = vadd.f32 %v1326_v0, %v1292_v57  ;;  %v1293_v16 = vmul.f32 %v4339_v26, %v4339_v26  ;;  %v1251_v38 = vadd.f32 %v1250_v35, %v4339_v26 }
 0x276   :  { %v1252_v37 = vadd.f32 %v1251_v38, %v4351_v10 }
 0x278   :  { %v1253_v12 = vadd.f32 %v1252_v37, %v4360_v52 }
 0x299   :  { %v4187_v32 = vpop.f32.mrb[20].mxu0 }
 0x29a   :  { %v4189_v34 = vpop.f32.mrb[21].mxu0 }
 0x29b   :  { %v4191_v9 = vpop.f32.mrb[22].mxu0  ;;  %v1065_v45 = vadd.f32 %v4189_v34, %v4207_v41  ;;  %v1328_v34 = vadd.f32 %v1327_v47, %v1293_v16 }
 0x29c   :  { %v4193_v8 = vpop.f32.mrb[23].mxu0  ;;  %v1076_v6 = vadd.f32 %v4191_v9, %v4207_v41 }
 0x29d   :  { %v1183_v39 = vmul.f32 0.05, %v1065_v45  ;;  %v1068_v25 = vadd.f32 %v4193_v8, %v4207_v41  ;;  %vm1147_vm11 = vcmp.gt.f32.partialorder %v1065_v45, 0.0  ;;  %v1329_v46 = vadd.f32 %v1328_v34, %v1294_v31 }
 0x29e   :  { %v1073_v8 = vadd.f32 %v4187_v32, %v4207_v41  ;;  %v1186_v0 = vmul.f32 0.05, %v1076_v6  ;;  %vm1150_vm2 = vcmp.gt.f32.partialorder %v1076_v6, 0.0 }
 0x29f   :  { %v4362_v1 = vsel %vm1147_vm11, %v1065_v45, %v1183_v39  ;;  %v1184_v44 = vmul.f32 0.05, %v1068_v25  ;;  %vm1148_vm0 = vcmp.gt.f32.partialorder %v1068_v25, 0.0  ;;  %v1330_v62 = vadd.f32 %v1329_v46, %v1295_v59 }
 0x2a0   :  { %v1296_v50 = vmul.f32 %v4362_v1, %v4362_v1  ;;  %v1254_v21 = vadd.f32 %v1253_v12, %v4362_v1  ;;  %v1185_v5 = vmul.f32 0.05, %v1073_v8  ;;  %vm1149_vm9 = vcmp.gt.f32.partialorder %v1073_v8, 0.0 }
 0x2a1   :  { %v4371_v63 = vsel %vm1148_vm0, %v1068_v25, %v1184_v44  ;;  %v4388_v47 = vsel %vm1150_vm2, %v1076_v6, %v1186_v0 }
 0x2a2   :  { %v1331_v56 = vadd.f32 %v1330_v62, %v1296_v50  ;;  %v1297_v19 = vmul.f32 %v4371_v63, %v4371_v63  ;;  %v1255_v57 = vadd.f32 %v1254_v21, %v4371_v63  ;;  %v4381_v35 = vsel %vm1149_vm9, %v1073_v8, %v1185_v5 }
 0x2a3   :  { %v1298_v9 = vmul.f32 %v4381_v35, %v4381_v35 }
 0x2a4   :  { %v1332_v45 = vadd.f32 %v1331_v56, %v1297_v19 }
 0x2a6   :  { %v1333_v2 = vadd.f32 %v1332_v45, %v1298_v9 }
 0x2c7   :  { %v4249_v24 = vpop.f32.mrb[24].mxu0 }
 0x2c8   :  { %v4252_v61 = vpop.f32.mrb[25].mxu0  ;;  %v1089_v39 = vadd.f32 %v4249_v24, %v4207_v41 }
 0x2c9   :  { %v4258_v17 = vpop.f32.mrb[26].mxu0  ;;  %v1081_v32 = vadd.f32 %v4252_v61, %v4207_v41  ;;  %v1256_v61 = vadd.f32 %v1255_v57, %v4381_v35 }
 0x2ca   :  { %v4262_v49 = vpop.f32.mrb[27].mxu0  ;;  %v1189_v46 = vmul.f32 0.05, %v1089_v39  ;;  %v1092_v8 = vadd.f32 %v4258_v17, %v4207_v41  ;;  %vm1153_vm15 = vcmp.gt.f32.partialorder %v1089_v39, 0.0 }
 0x2cb   :  { %v1187_v30 = vmul.f32 0.05, %v1081_v32  ;;  %v1084_v27 = vadd.f32 %v4262_v49, %v4207_v41  ;;  %vm1151_vm14 = vcmp.gt.f32.partialorder %v1081_v32, 0.0  ;;  %v1299_v49 = vmul.f32 %v4388_v47, %v4388_v47 }
 0x2cc   :  { %v1257_v25 = vadd.f32 %v1256_v61, %v4388_v47  ;;  %v4408_v21 = vsel %vm1153_vm15, %v1089_v39, %v1189_v46  ;;  %v1190_v62 = vmul.f32 0.05, %v1092_v8  ;;  %vm1154_vm7 = vcmp.gt.f32.partialorder %v1092_v8, 0.0 }
 0x2cd   :  { %v4390_v16 = vsel %vm1151_vm14, %v1081_v32, %v1187_v30  ;;  %v1188_v38 = vmul.f32 0.05, %v1084_v27  ;;  %vm1152_vm1 = vcmp.gt.f32.partialorder %v1084_v27, 0.0  ;;  %v1334_v44 = vadd.f32 %v1333_v2, %v1299_v49 }
 0x2ce   :  { %v1300_v34 = vmul.f32 %v4390_v16, %v4390_v16  ;;  %v1258_v37 = vadd.f32 %v1257_v25, %v4390_v16  ;;  %v1302_v17 = vmul.f32 %v4408_v21, %v4408_v21  ;;  %v4414_v56 = vsel %vm1154_vm7, %v1092_v8, %v1190_v62 }
 0x2cf   :  { %v4399_v31 = vsel %vm1152_vm1, %v1084_v27, %v1188_v38 }
 0x2d0   :  { %v1335_v24 = vadd.f32 %v1334_v44, %v1300_v34  ;;  %v1301_v12 = vmul.f32 %v4399_v31, %v4399_v31  ;;  %v1259_v50 = vadd.f32 %v1258_v37, %v4399_v31 }
 0x2d2   :  { %v1336_v32 = vadd.f32 %v1335_v24, %v1301_v12 }
 0x2d4   :  { %v1337_v0 = vadd.f32 %v1336_v32, %v1302_v17 }
 0x2f5   :  { %v4348_v18 = vpop.f32.mrb[28].mxu0 }
 0x2f6   :  { %v1096_v22 = vpop.f32.mrb[29].mxu0  ;;  %v1105_v30 = vadd.f32 %v4348_v18, %v4207_v41 }
 0x2f7   :  { %v4355_v28 = vpop.f32.mrb[30].mxu0  ;;  %v1097_v59 = vadd.f32 %v1096_v22, %v4207_v41  ;;  %v1260_v22 = vadd.f32 %v1259_v50, %v4408_v21 }
 0x2f8   :  { %v1099_v29 = vpop.f32.mrb[31].mxu0  ;;  %v1193_v2 = vmul.f32 0.05, %v1105_v30  ;;  %v1108_v39 = vadd.f32 %v4355_v28, %v4207_v41  ;;  %vm1157_vm3 = vcmp.gt.f32.partialorder %v1105_v30, 0.0 }
 0x2f9   :  { %v1191_v5 = vmul.f32 0.05, %v1097_v59  ;;  %v1100_v6 = vadd.f32 %v1099_v29, %v4207_v41  ;;  %vm1155_vm6 = vcmp.gt.f32.partialorder %v1097_v59, 0.0  ;;  %v1303_v29 = vmul.f32 %v4414_v56, %v4414_v56 }
 0x2fa   :  { %v1261_v27 = vadd.f32 %v1260_v22, %v4414_v56  ;;  %v4433_v34 = vsel %vm1157_vm3, %v1105_v30, %v1193_v2  ;;  %v1194_v37 = vmul.f32 0.05, %v1108_v39  ;;  %vm1158_vm10 = vcmp.gt.f32.partialorder %v1108_v39, 0.0 }
 0x2fb   :  { %v4416_v19 = vsel %vm1155_vm6, %v1097_v59, %v1191_v5  ;;  %v1192_v57 = vmul.f32 0.05, %v1100_v6  ;;  %vm1156_vm4 = vcmp.gt.f32.partialorder %v1100_v6, 0.0  ;;  %v1338_v38 = vadd.f32 %v1337_v0, %v1303_v29 }
 0x2fc   :  { %v1304_v45 = vmul.f32 %v4416_v19, %v4416_v19  ;;  %v1262_v61 = vadd.f32 %v1261_v27, %v4416_v19  ;;  %v1306_v8 = vmul.f32 %v4433_v34, %v4433_v34  ;;  %v4439_v12 = vsel %vm1158_vm10, %v1108_v39, %v1194_v37 }
 0x2fd   :  { %v4425_v9 = vsel %vm1156_vm4, %v1100_v6, %v1192_v57  ;;  %v1307_v0 = vmul.f32 %v4439_v12, %v4439_v12 }
 0x2fe   :  { %v1339_v49 = vadd.f32 %v1338_v38, %v1304_v45  ;;  %v1305_v18 = vmul.f32 %v4425_v9, %v4425_v9  ;;  %v1263_v25 = vadd.f32 %v1262_v61, %v4425_v9 }
 0x300   :  { %v1340_v44 = vadd.f32 %v1339_v49, %v1305_v18  ;;  %v1264_v59 = vadd.f32 %v1263_v25, %v4433_v34 }
 0x302   :  { %v1341_v5 = vadd.f32 %v1340_v44, %v1306_v8  ;;  %v1265_v30 = vadd.f32 %v1264_v59, %v4439_v12 }
 0x304   :  { %v1342_v2 = vadd.f32 %v1341_v5, %v1307_v0 }
 0x323   :  { %v3056_v46 = vpop.f32.mrb[32].mxu0 }
 0x324   :  { %v1121_v28 = vadd.f32 %v3056_v46, %v4207_v41  ;;  %v1112_v24 = vpop.f32.mrb[33].mxu0 }
 0x325   :  { %v1113_v50 = vadd.f32 %v1112_v24, %v4207_v41  ;;  %v3057_v62 = vpop.f32.mrb[34].mxu0 }
 0x326   :  { %v1124_v6 = vadd.f32 %v3057_v62, %v4207_v41  ;;  %v1115_v32 = vpop.f32.mrb[35].mxu0  ;;  %v1197_v17 = vmul.f32 0.05, %v1121_v28  ;;  %vm1161_vm13 = vcmp.gt.f32.partialorder %v1121_v28, 0.0 }
 0x327   :  { %vm1159_vm8 = vcmp.gt.f32.partialorder %v1113_v50, 0.0  ;;  %v1195_v22 = vmul.f32 0.05, %v1113_v50  ;;  %v1116_v57 = vadd.f32 %v1115_v32, %v4207_v41 }
 0x328   :  { %v1198_v27 = vmul.f32 0.05, %v1124_v6  ;;  %vm1162_vm5 = vcmp.gt.f32.partialorder %v1124_v6, 0.0  ;;  %v4452_v39 = vsel %vm1161_vm13, %v1121_v28, %v1197_v17 }
 0x329   :  { %v4447_v29 = vsel %vm1159_vm8, %v1113_v50, %v1195_v22  ;;  %vm1160_vm12 = vcmp.gt.f32.partialorder %v1116_v57, 0.0  ;;  %v1196_v45 = vmul.f32 0.05, %v1116_v57  ;;  %v1310_v44 = vmul.f32 %v4452_v39, %v4452_v39 }
 0x32a   :  { %v1266_v61 = vadd.f32 %v1265_v30, %v4447_v29  ;;  %v1308_v38 = vmul.f32 %v4447_v29, %v4447_v29  ;;  %v4454_v37 = vsel %vm1162_vm5, %v1124_v6, %v1198_v27 }
 0x32b   :  { %v1232_v41 = vsel %vm1160_vm12, %v1116_v57, %v1196_v45  ;;  %v1311_v59 = vmul.f32 %v4454_v37, %v4454_v37 }
 0x32c   :  { %v1343_v49 = vadd.f32 %v1342_v2, %v1308_v38  ;;  %v1267_v18 = vadd.f32 %v1266_v61, %v1232_v41  ;;  %v1309_v25 = vmul.f32 %v1232_v41, %v1232_v41 }
 0x32e   :  { %v1268_v46 = vadd.f32 %v1267_v18, %v4452_v39  ;;  %v1344_v8 = vadd.f32 %v1343_v49, %v1309_v25 }
 0x330   :  { %v1269_v24 = vadd.f32 %v1268_v46, %v4454_v37  ;;  %v1345_v50 = vadd.f32 %v1344_v8, %v1310_v44  ;;  %v1368_v44 = vsub.s32 1, %v4196_v53 }
 0x332   :  { %v1270_v28 = vrot.slane %v1269_v24, 4  ;;  %v1346_v62 = vadd.f32 %v1345_v50, %v1311_v59 }
 0x334   :  { %v1271_v5 = vadd.f32 %v1270_v28, %v1269_v24  ;;  %v1347_v32 = vrot.slane %v1346_v62, 4  ;;  %v1408_v28 = vsub.s32 2, %v4196_v53 }
 0x336   :  { %v1272_v17 = vrot.slane %v1271_v5, 2  ;;  %v1348_v22 = vadd.f32 %v1347_v32, %v1346_v62 }
 0x338   :  { %v1273_v6 = vadd.f32 %v1272_v17, %v1271_v5  ;;  %v1349_v57 = vrot.slane %v1348_v22, 2 }
 0x33a   :  { %v1274_v0 = vrot.slane %v1273_v6, 1  ;;  %v1350_v30 = vadd.f32 %v1349_v57, %v1348_v22 }
 0x33c   :  { %v1275_v27 = vadd.f32 %v1274_v0, %v1273_v6  ;;  %v1351_v45 = vrot.slane %v1350_v30, 1 }
 0x33e   :  { %v1352_v61 = vadd.f32 %v1351_v45, %v1350_v30  ;;  %v1353_v38 = vmul.f32 0.0034722222, %v1275_v27 }
 0x340   :  { %v1354_v2 = vmul.f32 0.0034722222, %v1352_v61  ;;  %v1355_v49 = vmul.f32 %v1353_v38, %v1353_v38 }
 0x342   :  { %v1356_v18 = vsub.f32 %v1354_v2, %v1355_v49 }
 0x344   :  { %v1357_v25 = vmax.f32 %v1356_v18, 0.0 }
 0x346   :  { %v1358_v46 = vadd.f32 1e-05, %v1357_v25 }
 0x348   :  { %3288 = vrsqrt.f32 %v1358_v46 }
 0x352   :  { %v3289_v8 = vpop.eup %3288 }
 0x353   :  { %v1360_v59 = vmul.f32 %v3289_v8, %v4202_v3 }
 0x355   :  { %v1361_v24 = vmul.f32 %v1360_v59, %v1353_v38  ;;  %v1369_v50 = vrot.slane %v1360_v59, %v1368_v44 }
 0x357   :  { %v1363_v62 = vrot.slane %v1361_v24, 7  ;;  %v4467_v5 = vmul.f32 %v1369_v50, %v1232_v41  ;;  %v1370_v32 = vmul.f32 %v1369_v50, %v4217_v58  ;;  %v1371_v17 = vmul.f32 %v1369_v50, %v4215_v48 }
 0x358   :  { %v1372_v22 = vmul.f32 %v1369_v50, %v4229_v4  ;;  %v1373_v6 = vmul.f32 %v1369_v50, %v4236_v51  ;;  %v1376_v57 = vmul.f32 %v1369_v50, %v4265_v42  ;;  %v1377_v0 = vmul.f32 %v1369_v50, %v4272_v14 }
 0x359   :  { %v1365_v30 = vsub.f32 %v4202_v3, %v1363_v62  ;;  %v1378_v27 = vmul.f32 %v1369_v50, %v4274_v13  ;;  %v1379_v45 = vmul.f32 %v1369_v50, %v4283_v11  ;;  %v1380_v41 = vmul.f32 %v1369_v50, %v4293_v33 }
 0x35a   :  { %v1381_v58 = vmul.f32 %v1369_v50, %v4300_v43  ;;  %v1382_v48 = vmul.f32 %v1369_v50, %v4302_v40  ;;  %v1383_v4 = vmul.f32 %v1369_v50, %v4311_v20  ;;  %v1384_v51 = vmul.f32 %v1369_v50, %v4321_v54 }
 0x35b   :  { %v4483_v61 = vrot.slane %v1365_v30, %v1408_v28  ;;  %v1385_v42 = vmul.f32 %v1369_v50, %v4328_v60  ;;  %v1386_v3 = vmul.f32 %v1369_v50, %v4330_v15  ;;  %v1387_v14 = vmul.f32 %v1369_v50, %v4339_v26 }
 0x35c   :  { %v1388_v13 = vmul.f32 %v1369_v50, %v4351_v10  ;;  %v1389_v11 = vmul.f32 %v1369_v50, %v4360_v52  ;;  %v1390_v33 = vmul.f32 %v1369_v50, %v4362_v1  ;;  %v1391_v43 = vmul.f32 %v1369_v50, %v4371_v63 }
 0x35d   :  { %v1392_v40 = vmul.f32 %v1369_v50, %v4381_v35  ;;  %v1393_v20 = vmul.f32 %v1369_v50, %v4388_v47  ;;  %v1394_v54 = vmul.f32 %v1369_v50, %v4390_v16  ;;  %v1395_v60 = vmul.f32 %v1369_v50, %v4399_v31 }
 0x35e   :  { %v1396_v15 = vmul.f32 %v1369_v50, %v4408_v21  ;;  %v1397_v26 = vmul.f32 %v1369_v50, %v4414_v56  ;;  %v1398_v10 = vmul.f32 %v1369_v50, %v4416_v19  ;;  %v1399_v52 = vmul.f32 %v1369_v50, %v4425_v9 }
 0x35f   :  { %v1400_v1 = vmul.f32 %v1369_v50, %v4433_v34  ;;  %v1401_v63 = vmul.f32 %v1369_v50, %v4439_v12  ;;  %v1402_v35 = vmul.f32 %v1369_v50, %v4447_v29  ;;  %v1404_v47 = vmul.f32 %v1369_v50, %v4452_v39 }
 0x360   :  { %v1405_v16 = vmul.f32 %v1369_v50, %v4454_v37  ;;  %v1422_v31 = vadd.f32 %v4483_v61, %v1382_v48  ;;  %v1423_v21 = vadd.f32 %v4483_v61, %v1383_v4  ;;  %v1426_v56 = vadd.f32 %v4483_v61, %v1386_v3 }
 0x361   :  { %v1427_v19 = vadd.f32 %v4483_v61, %v1387_v14  ;;  %v1428_v9 = vadd.f32 %v4483_v61, %v1388_v13  ;;  %v1429_v34 = vadd.f32 %v4483_v61, %v1389_v11  ;;  %v1374_v12 = vmul.f32 %v1369_v50, %v4238_v7 }
 0x362   :  { %v4512_v38 = vpack.c.bf16 %v1423_v21, %v1422_v31  ;;  %v1375_v29 = vmul.f32 %v1369_v50, %v4247_v23  ;;  %v1410_v39 = vadd.f32 %v4483_v61, %v1370_v32  ;;  %v1411_v37 = vadd.f32 %v4483_v61, %v1371_v17 }
 0x363   :  { %v1414_v2 = vadd.f32 %v4483_v61, %v1374_v12  ;;  %v4518_v49 = vpack.c.bf16 %v1427_v19, %v1426_v56  ;;  %v1416_v18 = vadd.f32 %v4483_v61, %v1376_v57  ;;  %v1417_v25 = vadd.f32 %v4483_v61, %v1377_v0  ;;  %v3263_v19 = vld [vmem:[#allocation4 + $0x18] sm:$0xff]   ;;  %v3266_v12 = vld [vmem:[#allocation4 + $0x68] sm:$0xff]  }
 0x364   :  { %v1415_v46 = vadd.f32 %v4483_v61, %v1375_v29  ;;  %v1446_v8 = vpack.c.bf16 %v1411_v37, %v1410_v39  ;;  %v4523_v7 = vpack.c.bf16 %v1429_v34, %v1428_v9  ;;  %v1412_v59 = vadd.f32 %v4483_v61, %v1372_v22  ;;  %v3264_v9 = vld [vmem:[#allocation4 + $0x60] sm:$0xff]   ;;  %v3268_v29 = vld [vmem:[#allocation4 + $0x70] sm:$0xff]   ;;  %v3270_v37 = vld [vmem:[#allocation4 + $0x78] sm:$0xff]  }
 0x365   :  { %1853 = vmatprep.mubr.bf16.mxu0 %v4518_v49  ;;  %v1449_v23 = vpack.c.bf16 %v1417_v25, %v1416_v18  ;;  %v1413_v24 = vadd.f32 %v4483_v61, %v1373_v6  ;;  %v1424_v50 = vadd.f32 %v4483_v61, %v1384_v51  ;;  %v1425_v28 = vadd.f32 %v4483_v61, %v1385_v42  ;;  %v3265_v34 = vld [vmem:[#allocation4 + $0x20] sm:$0xff]   ;;  %v3269_v39 = vld [vmem:[#allocation4 + $0x30] sm:$0xff]  }
 0x366   :  { %v1448_v62 = vpack.c.bf16 %v1415_v46, %v1414_v2  ;;  %1854 = vmatmul.mubr.bf16.vlgmr.msra.gmra.mrb[36].mxu0 %v4512_v38  ;;  %v1418_v32 = vadd.f32 %v4483_v61, %v1378_v27  ;;  %v1419_v17 = vadd.f32 %v4483_v61, %v1379_v45  ;;  %v1430_v57 = vadd.f32 %v4483_v61, %v1390_v33  ;;  %v3271_v2 = vld [vmem:[#allocation4 + $0x38] sm:$0xff]  }
 0x367   :  { %1861 = vmatprep.mubr.bf16.mxu0 %v4523_v7  ;;  %v1447_v22 = vpack.c.bf16 %v1413_v24, %v1412_v59  ;;  %v1453_v0 = vpack.c.bf16 %v1425_v28, %v1424_v50  ;;  %v1431_v30 = vadd.f32 %v4483_v61, %v1391_v43  ;;  %v1420_v6 = vadd.f32 %v4483_v61, %v1380_v41 }
 0x368   :  { %1756 = vmatprep.mubr.bf16.mxu1 %v1448_v62  ;;  %v1450_v48 = vpack.c.bf16 %v1419_v17, %v1418_v32  ;;  %v1421_v4 = vadd.f32 %v4483_v61, %v1381_v58  ;;  %v1432_v51 = vadd.f32 %v4483_v61, %v1392_v40  ;;  %v1433_v27 = vadd.f32 %v4483_v61, %v1393_v20 }
 0x369   :  { %1757 = vmatmul.mubr.bf16.vlgmr.msra.gmra.mrb[0].mxu1 %v1446_v8  ;;  %v1456_v45 = vpack.c.bf16 %v1431_v30, %v1430_v57  ;;  %v1438_v42 = vadd.f32 %v4483_v61, %v1398_v10  ;;  %v1439_v3 = vadd.f32 %v4483_v61, %v1399_v52  ;;  %v1434_v14 = vadd.f32 %v4483_v61, %v1394_v54 }
 0x36a   :  { %1764 = vmatprep.mubr.bf16.mxu1 %v1449_v23  ;;  %v1451_v13 = vpack.c.bf16 %v1421_v4, %v1420_v6  ;;  %v1457_v11 = vpack.c.bf16 %v1433_v27, %v1432_v51  ;;  %v1435_v41 = vadd.f32 %v4483_v61, %v1395_v60  ;;  %v1440_v33 = vadd.f32 %v4483_v61, %v1400_v1 }
 0x36b   :  { %v1460_v58 = vpack.c.bf16 %v1439_v3, %v1438_v42  ;;  %v1441_v43 = vadd.f32 %v4483_v61, %v1401_v63  ;;  %v1436_v40 = vadd.f32 %v4483_v61, %v1396_v15  ;;  %v1437_v20 = vadd.f32 %v4483_v61, %v1397_v26  ;;  %v3258_v15 = vld [vmem:[#allocation4 + $0x48] sm:$0xff]  }
 0x36c   :  { %v1458_v31 = vpack.c.bf16 %v1435_v41, %v1434_v14  ;;  %v1442_v10 = vadd.f32 %v4483_v61, %v1402_v35  ;;  %v1443_v54 = vadd.f32 %v4483_v61, %v4467_v5  ;;  %v1444_v52 = vadd.f32 %v4483_v61, %v1404_v47  ;;  %v3256_v5 = vld [vmem:[#allocation4 + $0x40] sm:$0xff]   ;;  %v3259_v26 = vld [vmem:[#allocation4 + $0x8] sm:$0xff]   ;;  %v3260_v35 = vld [vmem:[#allocation4 + $0x50] sm:$0xff]  }
 0x36d   :  { %v1461_v21 = vpack.c.bf16 %v1441_v43, %v1440_v33  ;;  %v1459_v56 = vpack.c.bf16 %v1437_v20, %v1436_v40  ;;  %v1445_v60 = vadd.f32 %v4483_v61, %v1405_v16  ;;  %v3257_v61 = vld [vmem:[#allocation4] sm:$0xff]   ;;  %2938 = vmatprep.subr.bf16.mxu1 %v3256_v5  ;;  %v3261_v47 = vld [vmem:[#allocation4 + $0x10] sm:$0xff]   ;;  %v3262_v16 = vld [vmem:[#allocation4 + $0x58] sm:$0xff]   ;;  %v1530_v18 = vsub.s32 3, %v4196_v53 }
 0x36e   :  { %1862 = vmatmul.mubr.bf16.gmra.mrb[40].mxu0 %v1453_v0  ;;  %v1462_v1 = vpack.c.bf16 %v1443_v54, %v1442_v10  ;;  %2939 = vmatpush3.bf16.msra.mxu1 %v3257_v61 }
 0x36f   :  { %1869 = vmatprep.mubr.bf16.mxu0 %v1456_v45  ;;  %v1463_v63 = vpack.c.bf16 %v1445_v60, %v1444_v52  ;;  %2940 = vmatprep.subr.bf16.mxu1 %v3258_v15 }
 0x371   :  { %1765 = vmatmul.mubr.bf16.gmra.mrb[4].mxu1 %v1447_v22 }
 0x372   :  { %1772 = vmatprep.mubr.bf16.mxu1 %v1450_v48  ;;  %2941 = vmatpush3.bf16.msra.mxu1 %v3259_v26 }
 0x373   :  { %2942 = vmatprep.subr.bf16.mxu1 %v3260_v35 }
 0x376   :  { %1870 = vmatmul.mubr.bf16.gmra.mrb[44].mxu0 %v4518_v49  ;;  %2943 = vmatpush3.bf16.msra.mxu1 %v3261_v47 }
 0x377   :  { %1877 = vmatprep.mubr.bf16.mxu0 %v1457_v11  ;;  %2944 = vmatprep.subr.bf16.mxu1 %v3262_v16 }
 0x379   :  { %1773 = vmatmul.mubr.bf16.gmra.mrb[8].mxu1 %v1448_v62 }
 0x37a   :  { %1780 = vmatprep.mubr.bf16.mxu1 %v1451_v13  ;;  %2945 = vmatpush3.bf16.msra.mxu1 %v3263_v19 }
 0x37b   :  { %2946 = vmatprep.subr.bf16.mxu1 %v3264_v9 }
 0x37e   :  { %1878 = vmatmul.mubr.bf16.gmra.mrb[48].mxu0 %v4523_v7  ;;  %2947 = vmatpush3.bf16.msra.mxu1 %v3265_v34 }
 0x37f   :  { %1885 = vmatprep.mubr.bf16.mxu0 %v1460_v58  ;;  %2948 = vmatprep.subr.bf16.mxu1 %v3266_v12 }
 0x381   :  { %1781 = vmatmul.mubr.bf16.gmra.mrb[12].mxu1 %v1449_v23  ;;  %v4564_v23 = vld [vmem:[%s4690_s5] sm:$0xff] }
 0x382   :  { %1788 = vmatprep.mubr.bf16.mxu1 %v4518_v49  ;;  %v4567_v24 = vrot.slane %v4564_v23, %v1530_v18 }
 0x386   :  { %1886 = vmatmul.mubr.bf16.gmra.mrb[52].mxu0 %v1458_v31 }
 0x387   :  { %1893 = vmatprep.mubr.bf16.mxu0 %v1461_v21 }
 0x389   :  { %1789 = vmatmul.mubr.bf16.gmra.mrb[16].mxu1 %v4512_v38  ;;  %v3267_v38 = vld [vmem:[#allocation4 + $0x28] sm:$0xff]  }
 0x38a   :  { %1796 = vmatprep.mubr.bf16.mxu1 %v4523_v7  ;;  %2949 = vmatpush3.bf16.msra.mxu1 %v3267_v38 }
 0x38b   :  { %2950 = vmatprep.subr.bf16.mxu1 %v3268_v29 }
 0x38e   :  { %1894 = vmatmul.mubr.bf16.gmra.mrb[56].mxu0 %v1459_v56  ;;  %2951 = vmatpush3.bf16.msra.mxu1 %v3269_v39 }
 0x38f   :  { %1901 = vmatprep.mubr.bf16.mxu0 %v1462_v1  ;;  %2952 = vmatprep.subr.bf16.mxu1 %v3270_v37 }
 0x391   :  { %1797 = vmatmul.mubr.bf16.gmra.mrb[20].mxu1 %v1453_v0 }
 0x392   :  { %1804 = vmatprep.mubr.bf16.mxu1 %v1456_v45  ;;  %2953 = vmatpush3.bf16.msra.mxu1 %v3271_v2 }
 0x396   :  { %1902 = vmatmul.mubr.bf16.gmra.mrb[60].mxu0 %v1460_v58 }
 0x397   :  { %1909 = vmatprep.mubr.bf16.mxu0 %v1463_v63 }
 0x399   :  { %1805 = vmatmul.mubr.bf16.gmra.mrb[24].mxu1 %v4518_v49  ;;  %v3272_v49 = vld [vmem:[#allocation4 + $0xc0] sm:$0xff]  }
 0x39a   :  { %1812 = vmatprep.mubr.bf16.mxu1 %v1457_v11  ;;  %2966 = vmatprep.subr.bf16.mxu1 %v3272_v49 }
 0x39e   :  { %1910 = vmatmul.mubr.bf16.gmra.mrb[64].mxu0 %v1461_v21 }
 0x3a1   :  { %1813 = vmatmul.mubr.bf16.gmra.mrb[28].mxu1 %v4523_v7 }
 0x439   :  { %v2890_v25 = vpop.f32.mrb[36].mxu0 }
 0x43a   :  { %v2891_v46 = vpop.f32.mrb[37].mxu0 }
 0x43b   :  { %v2892_v8 = vadd.f32 %v2891_v46, %v2890_v25  ;;  %v2893_v7 = vpop.f32.mrb[38].mxu0 }
 0x43c   :  { %v2826_v59 = vpop.f32.mrb[0].mxu1  ;;  %v2894_v50 = vpop.f32.mrb[39].mxu0 }
 0x43d   :  { %v2827_v28 = vpop.f32.mrb[1].mxu1  ;;  %v2895_v62 = vadd.f32 %v2894_v50, %v2893_v7 }
 0x43e   :  { %v2828_v32 = vadd.f32 %v2827_v28, %v2826_v59  ;;  %v2829_v17 = vpop.f32.mrb[2].mxu1 }
 0x43f   :  { %v2830_v57 = vpop.f32.mrb[3].mxu1 }
 0x440   :  { %v1759_v22 = vadd.f32 %v2828_v32, %v4567_v24  ;;  %v2831_v0 = vadd.f32 %v2830_v57, %v2829_v17 }
 0x441   :  { %v2896_v30 = vpop.f32.mrb[40].mxu0 }
 0x442   :  { %v1856_v6 = vadd.f32 %v2892_v8, %v1759_v22  ;;  %v1762_v48 = vadd.f32 %v2831_v0, %v4567_v24  ;;  %v2897_v4 = vpop.f32.mrb[41].mxu0 }
 0x443   :  { %v2898_v51 = vadd.f32 %v2897_v4, %v2896_v30  ;;  %v2899_v27 = vpop.f32.mrb[42].mxu0 }
 0x444   :  { %v1859_v45 = vadd.f32 %v2895_v62, %v1762_v48  ;;  %v2832_v42 = vpop.f32.mrb[4].mxu1  ;;  %v2900_v3 = vpop.f32.mrb[43].mxu0  ;;  %v1934_v31 = vmul.f32 0.05, %v1856_v6  ;;  %vm1918_vm0 = vcmp.gt.f32.partialorder %v1856_v6, 0.0 }
 0x445   :  { %v2833_v14 = vpop.f32.mrb[5].mxu1  ;;  %v2901_v13 = vadd.f32 %v2900_v3, %v2899_v27 }
 0x446   :  { %v2834_v11 = vadd.f32 %v2833_v14, %v2832_v42  ;;  %v2835_v41 = vpop.f32.mrb[6].mxu1  ;;  %v1935_v58 = vmul.f32 0.05, %v1859_v45  ;;  %vm1919_vm11 = vcmp.gt.f32.partialorder %v1859_v45, 0.0  ;;  %v4575_v35 = vsel %vm1918_vm0, %v1856_v6, %v1934_v31 }
 0x447   :  { %v2836_v33 = vpop.f32.mrb[7].mxu1  ;;  %v1987_v39 = vmul.f32 %v4575_v35, %v4575_v35 }
 0x448   :  { %v1767_v43 = vadd.f32 %v2834_v11, %v4567_v24  ;;  %v2837_v40 = vadd.f32 %v2836_v33, %v2835_v41  ;;  %v4573_v60 = vsel %vm1919_vm11, %v1859_v45, %v1935_v58 }
 0x449   :  { %v2902_v20 = vpop.f32.mrb[44].mxu0  ;;  %v1988_v34 = vmul.f32 %v4573_v60, %v4573_v60  ;;  %v1966_v37 = vadd.f32 %v4573_v60, %v4575_v35 }
 0x44a   :  { %v1864_v10 = vadd.f32 %v2898_v51, %v1767_v43  ;;  %v1770_v54 = vadd.f32 %v2837_v40, %v4567_v24  ;;  %v2903_v52 = vpop.f32.mrb[45].mxu0 }
 0x44b   :  { %v2904_v21 = vadd.f32 %v2903_v52, %v2902_v20  ;;  %v2905_v56 = vpop.f32.mrb[46].mxu0  ;;  %v2003_v7 = vadd.f32 %v1988_v34, %v1987_v39 }
 0x44c   :  { %vm1920_vm9 = vcmp.gt.f32.partialorder %v1864_v10, 0.0  ;;  %v1936_v1 = vmul.f32 0.05, %v1864_v10  ;;  %v1867_v63 = vadd.f32 %v2901_v13, %v1770_v54  ;;  %v2838_v5 = vpop.f32.mrb[8].mxu1  ;;  %v2906_v61 = vpop.f32.mrb[47].mxu0 }
 0x44d   :  { %v2839_v15 = vpop.f32.mrb[9].mxu1  ;;  %v2907_v26 = vadd.f32 %v2906_v61, %v2905_v56 }
 0x44e   :  { %v4577_v47 = vsel %vm1920_vm9, %v1864_v10, %v1936_v1  ;;  %v1937_v16 = vmul.f32 0.05, %v1867_v63  ;;  %v2840_v19 = vadd.f32 %v2839_v15, %v2838_v5  ;;  %v2841_v9 = vpop.f32.mrb[10].mxu1  ;;  %vm1921_vm2 = vcmp.gt.f32.partialorder %v1867_v63, 0.0 }
 0x44f   :  { %v2842_v12 = vpop.f32.mrb[11].mxu1  ;;  %v1989_v2 = vmul.f32 %v4577_v47, %v4577_v47  ;;  %v1967_v59 = vadd.f32 %v1966_v37, %v4577_v47 }
 0x450   :  { %v1775_v38 = vadd.f32 %v2840_v19, %v4567_v24  ;;  %v2843_v29 = vadd.f32 %v2842_v12, %v2841_v9  ;;  %v4588_v18 = vsel %vm1921_vm2, %v1867_v63, %v1937_v16 }
 0x451   :  { %v2908_v49 = vpop.f32.mrb[48].mxu0  ;;  %v2004_v22 = vadd.f32 %v2003_v7, %v1989_v2  ;;  %v1990_v0 = vmul.f32 %v4588_v18, %v4588_v18  ;;  %v1968_v45 = vadd.f32 %v1967_v59, %v4588_v18 }
 0x452   :  { %v1872_v25 = vadd.f32 %v2904_v21, %v1775_v38  ;;  %v1778_v46 = vadd.f32 %v2843_v29, %v4567_v24  ;;  %v2909_v8 = vpop.f32.mrb[49].mxu0 }
 0x453   :  { %v2910_v50 = vadd.f32 %v2909_v8, %v2908_v49  ;;  %v2911_v28 = vpop.f32.mrb[50].mxu0  ;;  %v2005_v41 = vadd.f32 %v2004_v22, %v1990_v0 }
 0x454   :  { %vm1922_vm14 = vcmp.gt.f32.partialorder %v1872_v25, 0.0  ;;  %v1938_v62 = vmul.f32 0.05, %v1872_v25  ;;  %v1875_v32 = vadd.f32 %v2907_v26, %v1778_v46  ;;  %v2844_v17 = vpop.f32.mrb[12].mxu1  ;;  %v2912_v57 = vpop.f32.mrb[51].mxu0 }
 0x455   :  { %v2845_v30 = vpop.f32.mrb[13].mxu1  ;;  %v2913_v6 = vadd.f32 %v2912_v57, %v2911_v28 }
 0x456   :  { %v4594_v48 = vsel %vm1922_vm14, %v1872_v25, %v1938_v62  ;;  %vm1923_vm1 = vcmp.gt.f32.partialorder %v1875_v32, 0.0  ;;  %v1939_v4 = vmul.f32 0.05, %v1875_v32  ;;  %v2846_v51 = vadd.f32 %v2845_v30, %v2844_v17  ;;  %v2847_v27 = vpop.f32.mrb[14].mxu1 }
 0x457   :  { %v1991_v42 = vmul.f32 %v4594_v48, %v4594_v48  ;;  %v2848_v3 = vpop.f32.mrb[15].mxu1  ;;  %v1969_v33 = vadd.f32 %v1968_v45, %v4594_v48  ;;  %vm2611_vm14 = vcmp.lt.s32.totalorder %v3693_v55, 4 }
 0x458   :  { %v4599_v14 = vsel %vm1923_vm1, %v1875_v32, %v1939_v4  ;;  %v1783_v13 = vadd.f32 %v2846_v51, %v4567_v24  ;;  %v2849_v11 = vadd.f32 %v2848_v3, %v2847_v27 }
 0x459   :  { %v2914_v58 = vpop.f32.mrb[52].mxu0  ;;  %v2006_v31 = vadd.f32 %v2005_v41, %v1991_v42  ;;  %v1992_v10 = vmul.f32 %v4599_v14, %v4599_v14  ;;  %v1970_v5 = vadd.f32 %v1969_v33, %v4599_v14 }
 0x45a   :  { %v1880_v43 = vadd.f32 %v2910_v50, %v1783_v13  ;;  %v1786_v40 = vadd.f32 %v2849_v11, %v4567_v24  ;;  %v2915_v20 = vpop.f32.mrb[53].mxu0 }
 0x45b   :  { %v2916_v54 = vadd.f32 %v2915_v20, %v2914_v58  ;;  %v2917_v52 = vpop.f32.mrb[54].mxu0  ;;  %v2007_v34 = vadd.f32 %v2006_v31, %v1992_v10 }
 0x45c   :  { %vm1924_vm15 = vcmp.gt.f32.partialorder %v1880_v43, 0.0  ;;  %v1940_v21 = vmul.f32 0.05, %v1880_v43  ;;  %v1883_v56 = vadd.f32 %v2913_v6, %v1786_v40  ;;  %v2850_v1 = vpop.f32.mrb[16].mxu1  ;;  %v2918_v63 = vpop.f32.mrb[55].mxu0 }
 0x45d   :  { %v2851_v61 = vpop.f32.mrb[17].mxu1  ;;  %v2919_v15 = vadd.f32 %v2918_v63, %v2917_v52 }
 0x45e   :  { %v4607_v26 = vsel %vm1924_vm15, %v1880_v43, %v1940_v21  ;;  %vm1925_vm7 = vcmp.gt.f32.partialorder %v1883_v56, 0.0  ;;  %v1941_v16 = vmul.f32 0.05, %v1883_v56  ;;  %v2852_v19 = vadd.f32 %v2851_v61, %v2850_v1  ;;  %v2853_v9 = vpop.f32.mrb[18].mxu1 }
 0x45f   :  { %v1971_v12 = vadd.f32 %v1970_v5, %v4607_v26  ;;  %v1993_v38 = vmul.f32 %v4607_v26, %v4607_v26  ;;  %v2854_v29 = vpop.f32.mrb[19].mxu1 }
 0x460   :  { %v4612_v39 = vsel %vm1925_vm7, %v1883_v56, %v1941_v16  ;;  %v1791_v37 = vadd.f32 %v2852_v19, %v4567_v24  ;;  %v2855_v2 = vadd.f32 %v2854_v29, %v2853_v9 }
 0x461   :  { %v2008_v49 = vadd.f32 %v2007_v34, %v1993_v38  ;;  %v1972_v25 = vadd.f32 %v1971_v12, %v4612_v39  ;;  %v1994_v46 = vmul.f32 %v4612_v39, %v4612_v39  ;;  %v2920_v8 = vpop.f32.mrb[56].mxu0 }
 0x462   :  { %v1888_v7 = vadd.f32 %v2916_v54, %v1791_v37  ;;  %v1794_v59 = vadd.f32 %v2855_v2, %v4567_v24  ;;  %v2921_v50 = vpop.f32.mrb[57].mxu0 }
 0x463   :  { %v2009_v28 = vadd.f32 %v2008_v49, %v1994_v46  ;;  %v2922_v62 = vadd.f32 %v2921_v50, %v2920_v8  ;;  %v2923_v32 = vpop.f32.mrb[58].mxu0 }
 0x464   :  { %vm1926_vm6 = vcmp.gt.f32.partialorder %v1888_v7, 0.0  ;;  %v1942_v17 = vmul.f32 0.05, %v1888_v7  ;;  %v1891_v57 = vadd.f32 %v2919_v15, %v1794_v59  ;;  %v2856_v22 = vpop.f32.mrb[20].mxu1  ;;  %v2924_v0 = vpop.f32.mrb[59].mxu0 }
 0x465   :  { %v2857_v30 = vpop.f32.mrb[21].mxu1  ;;  %v2925_v6 = vadd.f32 %v2924_v0, %v2923_v32 }
 0x466   :  { %v4619_v4 = vsel %vm1926_vm6, %v1888_v7, %v1942_v17  ;;  %vm1927_vm4 = vcmp.gt.f32.partialorder %v1891_v57, 0.0  ;;  %v1943_v51 = vmul.f32 0.05, %v1891_v57  ;;  %v2858_v27 = vadd.f32 %v2857_v30, %v2856_v22  ;;  %v2859_v45 = vpop.f32.mrb[22].mxu1 }
 0x467   :  { %v1995_v42 = vmul.f32 %v4619_v4, %v4619_v4  ;;  %v2860_v3 = vpop.f32.mrb[23].mxu1  ;;  %v1973_v33 = vadd.f32 %v1972_v25, %v4619_v4 }
 0x468   :  { %v4623_v13 = vsel %vm1927_vm4, %v1891_v57, %v1943_v51  ;;  %v1799_v11 = vadd.f32 %v2858_v27, %v4567_v24  ;;  %v2861_v41 = vadd.f32 %v2860_v3, %v2859_v45 }
 0x469   :  { %v2926_v58 = vpop.f32.mrb[60].mxu0  ;;  %v2010_v31 = vadd.f32 %v2009_v28, %v1995_v42  ;;  %v1996_v10 = vmul.f32 %v4623_v13, %v4623_v13  ;;  %v1974_v5 = vadd.f32 %v1973_v33, %v4623_v13 }
 0x46a   :  { %v1896_v43 = vadd.f32 %v2922_v62, %v1799_v11  ;;  %v1802_v40 = vadd.f32 %v2861_v41, %v4567_v24  ;;  %v2927_v20 = vpop.f32.mrb[61].mxu0 }
 0x46b   :  { %v2928_v54 = vadd.f32 %v2927_v20, %v2926_v58  ;;  %v2929_v52 = vpop.f32.mrb[62].mxu0  ;;  %v2011_v12 = vadd.f32 %v2010_v31, %v1996_v10 }
 0x46c   :  { %vm1928_vm3 = vcmp.gt.f32.partialorder %v1896_v43, 0.0  ;;  %v1944_v21 = vmul.f32 0.05, %v1896_v43  ;;  %v1899_v56 = vadd.f32 %v2925_v6, %v1802_v40  ;;  %v2862_v1 = vpop.f32.mrb[24].mxu1  ;;  %v2930_v63 = vpop.f32.mrb[63].mxu0 }
 0x46d   :  { %v2863_v61 = vpop.f32.mrb[25].mxu1  ;;  %v2931_v15 = vadd.f32 %v2930_v63, %v2929_v52 }
 0x46e   :  { %v4631_v16 = vsel %vm1928_vm3, %v1896_v43, %v1944_v21  ;;  %vm1929_vm10 = vcmp.gt.f32.partialorder %v1899_v56, 0.0  ;;  %v1945_v19 = vmul.f32 0.05, %v1899_v56  ;;  %v2864_v9 = vadd.f32 %v2863_v61, %v2862_v1  ;;  %v2865_v34 = vpop.f32.mrb[26].mxu1 }
 0x46f   :  { %v1975_v38 = vadd.f32 %v1974_v5, %v4631_v16  ;;  %v1997_v29 = vmul.f32 %v4631_v16, %v4631_v16  ;;  %v2866_v37 = vpop.f32.mrb[27].mxu1 }
 0x470   :  { %v4636_v2 = vsel %vm1929_vm10, %v1899_v56, %v1945_v19  ;;  %v1807_v49 = vadd.f32 %v2864_v9, %v4567_v24  ;;  %v2867_v25 = vadd.f32 %v2866_v37, %v2865_v34 }
 0x471   :  { %v2012_v46 = vadd.f32 %v2011_v12, %v1997_v29  ;;  %v1976_v8 = vadd.f32 %v1975_v38, %v4636_v2  ;;  %v1998_v7 = vmul.f32 %v4636_v2, %v4636_v2  ;;  %v2932_v59 = vpop.f32.mrb[64].mxu0 }
 0x472   :  { %v1904_v50 = vadd.f32 %v2928_v54, %v1807_v49  ;;  %v1810_v28 = vadd.f32 %v2867_v25, %v4567_v24  ;;  %v2933_v62 = vpop.f32.mrb[65].mxu0 }
 0x473   :  { %v2013_v32 = vadd.f32 %v2012_v46, %v1998_v7  ;;  %v2934_v17 = vadd.f32 %v2933_v62, %v2932_v59  ;;  %v2935_v57 = vpop.f32.mrb[66].mxu0 }
 0x474   :  { %vm1930_vm8 = vcmp.gt.f32.partialorder %v1904_v50, 0.0  ;;  %v1946_v22 = vmul.f32 0.05, %v1904_v50  ;;  %v1907_v0 = vadd.f32 %v2931_v15, %v1810_v28  ;;  %v2868_v30 = vpop.f32.mrb[28].mxu1  ;;  %v2936_v6 = vpop.f32.mrb[67].mxu0 }
 0x475   :  { %v2869_v51 = vpop.f32.mrb[29].mxu1  ;;  %v2937_v27 = vadd.f32 %v2936_v6, %v2935_v57 }
 0x476   :  { %v1962_v45 = vsel %vm1930_vm8, %v1904_v50, %v1946_v22  ;;  %vm1931_vm13 = vcmp.gt.f32.partialorder %v1907_v0, 0.0  ;;  %v1947_v42 = vmul.f32 0.05, %v1907_v0  ;;  %v2870_v3 = vadd.f32 %v2869_v51, %v2868_v30  ;;  %v2871_v11 = vpop.f32.mrb[30].mxu1 }
 0x477   :  { %v1977_v41 = vadd.f32 %v1976_v8, %v1962_v45  ;;  %v1999_v33 = vmul.f32 %v1962_v45, %v1962_v45  ;;  %v2872_v58 = vpop.f32.mrb[31].mxu1  ;;  %v2039_v51 = vsub.s32 4, %v4196_v53 }
 0x478   :  { %v1963_v43 = vsel %vm1931_vm13, %v1907_v0, %v1947_v42  ;;  %v1815_v40 = vadd.f32 %v2870_v3, %v4567_v24  ;;  %v2873_v20 = vadd.f32 %v2872_v58, %v2871_v11 }
 0x479   :  { %v2014_v31 = vadd.f32 %v2013_v32, %v1999_v33  ;;  %v1978_v10 = vadd.f32 %v1977_v41, %v1963_v43  ;;  %v2000_v54 = vmul.f32 %v1963_v43, %v1963_v43  ;;  %v2059_v33 = vsub.s32 5, %v4196_v53 }
 0x47a   :  { %v1912_v52 = vadd.f32 %v2934_v17, %v1815_v40  ;;  %v1818_v21 = vadd.f32 %v2873_v20, %v4567_v24 }
 0x47b   :  { %v2015_v56 = vadd.f32 %v2014_v31, %v2000_v54 }
 0x47c   :  { %vm1932_vm12 = vcmp.gt.f32.partialorder %v1912_v52, 0.0  ;;  %v1948_v1 = vmul.f32 0.05, %v1912_v52  ;;  %v1915_v63 = vadd.f32 %v2937_v27, %v1818_v21 }
 0x47e   :  { %v1964_v5 = vsel %vm1932_vm12, %v1912_v52, %v1948_v1  ;;  %vm1933_vm5 = vcmp.gt.f32.partialorder %v1915_v63, 0.0  ;;  %v1949_v61 = vmul.f32 0.05, %v1915_v63 }
 0x47f   :  { %v1979_v15 = vadd.f32 %v1978_v10, %v1964_v5  ;;  %v2001_v19 = vmul.f32 %v1964_v5, %v1964_v5 }
 0x480   :  { %v1965_v9 = vsel %vm1933_vm5, %v1915_v63, %v1949_v61 }
 0x481   :  { %v2016_v34 = vadd.f32 %v2015_v56, %v2001_v19  ;;  %v1980_v12 = vadd.f32 %v1979_v15, %v1965_v9  ;;  %v2002_v38 = vmul.f32 %v1965_v9, %v1965_v9 }
 0x483   :  { %v1981_v29 = vrot.slane %v1980_v12, 4  ;;  %v2017_v37 = vadd.f32 %v2016_v34, %v2002_v38 }
 0x485   :  { %v1982_v49 = vadd.f32 %v1981_v29, %v1980_v12  ;;  %v2018_v25 = vrot.slane %v2017_v37, 4  ;;  %v3273_v29 = vld [vmem:[#allocation4 + $0x80] sm:$0xff]  }
 0x487   :  { %v1983_v46 = vrot.slane %v1982_v49, 2  ;;  %v2019_v8 = vadd.f32 %v2018_v25, %v2017_v37 }
 0x489   :  { %v1984_v24 = vadd.f32 %v1983_v46, %v1982_v49  ;;  %v2020_v7 = vrot.slane %v2019_v8, 2  ;;  %v3274_v49 = vld [vmem:[#allocation4 + $0xc8] sm:$0xff]  }
 0x48b   :  { %v1985_v59 = vrot.slane %v1984_v24, 1  ;;  %v2021_v50 = vadd.f32 %v2020_v7, %v2019_v8 }
 0x48d   :  { %v1986_v28 = vadd.f32 %v1985_v59, %v1984_v24  ;;  %v2022_v62 = vrot.slane %v2021_v50, 1 }
 0x48f   :  { %v2023_v32 = vadd.f32 %v2022_v62, %v2021_v50  ;;  %v2024_v17 = vmul.f32 0.0078125, %v1986_v28  ;;  %v3275_v50 = vld [vmem:[#allocation4 + $0x88] sm:$0xff]   ;;  %v3276_v62 = vld [vmem:[#allocation4 + $0xd0] sm:$0xff]  }
 0x491   :  { %v2025_v57 = vmul.f32 0.0078125, %v2023_v32  ;;  %v2026_v22 = vmul.f32 %v2024_v17, %v2024_v17 }
 0x493   :  { %v2027_v0 = vsub.f32 %v2025_v57, %v2026_v22  ;;  %v3278_v57 = vld [vmem:[#allocation4 + $0xd8] sm:$0xff]  }
 0x494   :  { %v3279_v22 = vld [vmem:[#allocation4 + $0x98] sm:$0xff]  }
 0x495   :  { %v2028_v30 = vmax.f32 %v2027_v0, 0.0  ;;  %v3280_v0 = vld [vmem:[#allocation4 + $0xe0] sm:$0xff]  }
 0x497   :  { %v2029_v6 = vadd.f32 1e-05, %v2028_v30  ;;  %v3281_v30 = vld [vmem:[#allocation4 + $0xa0] sm:$0xff]  }
 0x499   :  { %3290 = vrsqrt.f32 %v2029_v6  ;;  %v3282_v6 = vld [vmem:[#allocation4 + $0xe8] sm:$0xff]  }
 0x4a3   :  { %v3291_v27 = vpop.eup %3290 }
 0x4a4   :  { %v2031_v42 = vmul.f32 %v4564_v23, %v3291_v27  ;;  %v3284_v27 = vld [vmem:[#allocation4 + $0xf0] sm:$0xff]  }
 0x4a6   :  { %v2032_v3 = vmul.f32 %v2031_v42, %v2024_v17  ;;  %v2040_v11 = vrot.slane %v2031_v42, %v2039_v51  ;;  %v3277_v17 = vld [vmem:[#allocation4 + $0x90] sm:$0xff]   ;;  %v3283_v51 = vld [vmem:[#allocation4 + $0xa8] sm:$0xff]  }
 0x4a7   :  { %v3285_v42 = vld [vmem:[#allocation4 + $0xb0] sm:$0xff]  }
 0x4a8   :  { %v2034_v41 = vrot.slane %v2032_v3, 7  ;;  %v2046_v58 = vmul.f32 %v2040_v11, %v4599_v14  ;;  %v2047_v40 = vmul.f32 %v2040_v11, %v4607_v26  ;;  %v2048_v20 = vmul.f32 %v2040_v11, %v4612_v39  ;;  %v3286_v3 = vld [vmem:[#allocation4 + $0xf8] sm:$0xff]  }
 0x4a9   :  { %v2053_v10 = vmul.f32 %v2040_v11, %v1962_v45  ;;  %v2054_v54 = vmul.f32 %v2040_v11, %v1963_v43  ;;  %v2045_v52 = vmul.f32 %v2040_v11, %v4594_v48  ;;  %v2041_v21 = vmul.f32 %v2040_v11, %v4575_v35 }
 0x4aa   :  { %v2036_v31 = vsub.f32 %v4564_v23, %v2034_v41  ;;  %v2055_v56 = vmul.f32 %v2040_v11, %v1964_v5  ;;  %v2056_v1 = vmul.f32 %v2040_v11, %v1965_v9  ;;  %v2042_v61 = vmul.f32 %v2040_v11, %v4573_v60  ;;  %v2506_v41 = vld [vmem:[#allocation6] sm:$0xff] }
 0x4ab   :  { %v2051_v15 = vmul.f32 %v2040_v11, %v4631_v16  ;;  %v2052_v14 = vmul.f32 %v2040_v11, %v4636_v2  ;;  %v2043_v26 = vmul.f32 %v2040_v11, %v4577_v47  ;;  %v2044_v39 = vmul.f32 %v2040_v11, %v4588_v18 }
 0x4ac   :  { %v2060_v63 = vrot.slane %v2036_v31, %v2059_v33  ;;  %v2049_v45 = vmul.f32 %v2040_v11, %v4619_v4  ;;  %v2050_v43 = vmul.f32 %v2040_v11, %v4623_v13  ;;  %v3287_v11 = vld [vmem:[#allocation4 + $0xb8] sm:$0xff]   ;;  %v2507_v33 = vld [vmem:[#allocation6 + $0x8] sm:$0xff] }
 0x4ae   :  { %v2065_v48 = vadd.f32 %v2060_v63, %v2045_v52  ;;  %v2066_v19 = vadd.f32 %v2060_v63, %v2046_v58  ;;  %v2061_v35 = vadd.f32 %v2060_v63, %v2041_v21  ;;  %v2062_v5 = vadd.f32 %v2060_v63, %v2042_v61  ;;  %v2512_v52 = vld [vmem:[#allocation6 + $0x30] sm:$0xff]  ;;  %v2515_v61 = vld [vmem:[#allocation6 + $0x48] sm:$0xff] }
 0x4af   :  { %v2067_v9 = vadd.f32 %v2060_v63, %v2047_v40  ;;  %v2068_v34 = vadd.f32 %v2060_v63, %v2048_v20  ;;  %v2063_v12 = vadd.f32 %v2060_v63, %v2043_v26  ;;  %v2064_v60 = vadd.f32 %v2060_v63, %v2044_v39  ;;  %v2508_v40 = vld [vmem:[#allocation6 + $0x10] sm:$0xff]  ;;  %v2509_v20 = vld [vmem:[#allocation6 + $0x18] sm:$0xff] }
 0x4b0   :  { %v2079_v38 = vpack.c.bf16 %v2066_v19, %v2065_v48  ;;  %v2077_v16 = vpack.c.bf16 %v2062_v5, %v2061_v35  ;;  %v2073_v2 = vadd.f32 %v2060_v63, %v2053_v10  ;;  %v2074_v37 = vadd.f32 %v2060_v63, %v2054_v54  ;;  %v2510_v10 = vld [vmem:[#allocation6 + $0x20] sm:$0xff]  ;;  %v2511_v54 = vld [vmem:[#allocation6 + $0x28] sm:$0xff]  ;;  %v2517_v26 = vld [vmem:[#allocation6 + $0x58] sm:$0xff] }
 0x4b1   :  { %v2080_v47 = vpack.c.bf16 %v2068_v34, %v2067_v9  ;;  %v2078_v18 = vpack.c.bf16 %v2064_v60, %v2063_v12  ;;  %v2069_v25 = vadd.f32 %v2060_v63, %v2049_v45  ;;  %v2070_v4 = vadd.f32 %v2060_v63, %v2050_v43  ;;  %v2518_v45 = vld [vmem:[#allocation6 + $0x60] sm:$0xff]  ;;  %v2519_v43 = vld [vmem:[#allocation6 + $0x68] sm:$0xff]  ;;  %v2520_v19 = vld [vmem:[#allocation6 + $0x70] sm:$0xff] }
 0x4b2   :  { %2377 = vmatprep.mubr.bf16.mxu1 %v2079_v38  ;;  %v2083_v13 = vpack.c.bf16 %v2074_v37, %v2073_v2  ;;  %v2075_v46 = vadd.f32 %v2060_v63, %v2055_v56  ;;  %v2076_v8 = vadd.f32 %v2060_v63, %v2056_v1  ;;  %v2071_v24 = vadd.f32 %v2060_v63, %v2051_v15  ;;  %v2513_v56 = vld [vmem:[#allocation6 + $0x38] sm:$0xff] }
 0x4b3   :  { %2378 = vmatmul.mubr.bf16.vlgmr.msra.gmra.mrb[32].mxu1 %v2077_v16  ;;  %v2081_v7 = vpack.c.bf16 %v2070_v4, %v2069_v25  ;;  %v2072_v59 = vadd.f32 %v2060_v63, %v2052_v14  ;;  %v3096_v58 = vpack.c.bf16 %v2507_v33, %v2506_v41  ;;  %v3100_v31 = vpack.c.bf16 %v2509_v20, %v2508_v40  ;;  %v2514_v63 = vld [vmem:[#allocation6 + $0x40] sm:$0xff]  ;;  %v2516_v14 = vld [vmem:[#allocation6 + $0x50] sm:$0xff]  ;;  %v2521_v35 = vld [vmem:[#allocation6 + $0x78] sm:$0xff] }
 0x4b4   :  { %2967 = vmatpush3.bf16.msra.mxu1 %v3273_v29  ;;  %2385 = vmatprep.mubr.bf16.mxu1 %v2080_v47  ;;  %v2084_v28 = vpack.c.bf16 %v2076_v8, %v2075_v46  ;;  %v3104_v21 = vpack.c.bf16 %v2511_v54, %v2510_v10  ;;  %v3108_v1 = vpack.c.bf16 %v2513_v56, %v2512_v52  ;;  %v2151_v25 = vsub.s32 6, %v4196_v53 }
 0x4b5   :  { %2968 = vmatprep.subr.bf16.mxu1 %v3274_v49  ;;  %v2082_v32 = vpack.c.bf16 %v2072_v59, %v2071_v24  ;;  %3097 = vmatprep.subr.bf16.mxu0 %v3096_v58  ;;  %v3112_v15 = vpack.c.bf16 %v2515_v61, %v2514_v63  ;;  %v3116_v39 = vpack.c.bf16 %v2517_v26, %v2516_v14 }
 0x4b6   :  { %3099 = vmatpush3.bf16.msra.mxu0 %v3096_v58  ;;  %v3120_v48 = vpack.c.bf16 %v2519_v43, %v2518_v45  ;;  %v3124_v5 = vpack.c.bf16 %v2521_v35, %v2520_v19  ;;  %v2152_v4 = vrot.slane %v4564_v23, %v2151_v25 }
 0x4b7   :  { %3101 = vmatprep.subr.bf16.mxu0 %v3100_v31 }
 0x4b8   :  { %2969 = vmatpush3.bf16.msra.mxu1 %v3275_v50 }
 0x4b9   :  { %2970 = vmatprep.subr.bf16.mxu1 %v3276_v62 }
 0x4ba   :  { %3103 = vmatpush3.bf16.msra.mxu0 %v3100_v31 }
 0x4bb   :  { %2386 = vmatmul.mubr.bf16.gmra.mrb[36].mxu1 %v2078_v18  ;;  %3105 = vmatprep.subr.bf16.mxu0 %v3104_v21 }
 0x4bc   :  { %2971 = vmatpush3.bf16.msra.mxu1 %v3277_v17  ;;  %2426 = vmatprep.mubr.bf16.mxu1 %v2083_v13 }
 0x4bd   :  { %2972 = vmatprep.subr.bf16.mxu1 %v3278_v57 }
 0x4be   :  { %3107 = vmatpush3.bf16.msra.mxu0 %v3104_v21 }
 0x4bf   :  { %3109 = vmatprep.subr.bf16.mxu0 %v3108_v1 }
 0x4c0   :  { %2973 = vmatpush3.bf16.msra.mxu1 %v3279_v22 }
 0x4c1   :  { %2974 = vmatprep.subr.bf16.mxu1 %v3280_v0 }
 0x4c2   :  { %3111 = vmatpush3.bf16.msra.mxu0 %v3108_v1 }
 0x4c3   :  { %3113 = vmatprep.subr.bf16.mxu0 %v3112_v15 }
 0x4c4   :  { %2975 = vmatpush3.bf16.msra.mxu1 %v3281_v30 }
 0x4c5   :  { %2976 = vmatprep.subr.bf16.mxu1 %v3282_v6 }
 0x4c6   :  { %3115 = vmatpush3.bf16.msra.mxu0 %v3112_v15 }
 0x4c7   :  { %3117 = vmatprep.subr.bf16.mxu0 %v3116_v39 }
 0x4c8   :  { %2977 = vmatpush3.bf16.msra.mxu1 %v3283_v51 }
 0x4c9   :  { %2978 = vmatprep.subr.bf16.mxu1 %v3284_v27 }
 0x4ca   :  { %3119 = vmatpush3.bf16.msra.mxu0 %v3116_v39 }
 0x4cb   :  { %3121 = vmatprep.subr.bf16.mxu0 %v3120_v48 }
 0x4cc   :  { %2979 = vmatpush3.bf16.msra.mxu1 %v3285_v42 }
 0x4cd   :  { %2980 = vmatprep.subr.bf16.mxu1 %v3286_v3 }
 0x4ce   :  { %3123 = vmatpush3.bf16.msra.mxu0 %v3120_v48 }
 0x4cf   :  { %3125 = vmatprep.subr.bf16.mxu0 %v3124_v5 }
 0x4d0   :  { %2981 = vmatpush3.bf16.msra.mxu1 %v3287_v11 }
 0x4d2   :  { %3127 = vmatpush3.bf16.msra.mxu0 %v3124_v5 }
 0x4d3   :  { %2427 = vmatmul.mubr.bf16.vlgmr.msra.gmra.mrb[40].mxu1 %v2081_v7 }
 0x4d4   :  { %2434 = vmatprep.mubr.bf16.mxu1 %v2084_v28 }
 0x4db   :  { %2435 = vmatmul.mubr.bf16.gmra.mrb[44].mxu1 %v2082_v32 }
 0x586   :  { %v2954_v9 = vpop.f32.mrb[32].mxu1 }
 0x587   :  { %v2955_v34 = vpop.f32.mrb[33].mxu1 }
 0x588   :  { %v2956_v12 = vadd.f32 %v2955_v34, %v2954_v9  ;;  %v2957_v60 = vpop.f32.mrb[34].mxu1 }
 0x589   :  { %v2958_v38 = vpop.f32.mrb[35].mxu1 }
 0x58a   :  { %v2959_v16 = vadd.f32 %v2958_v38, %v2957_v60  ;;  %v2380_v8 = vadd.f32 %v2956_v12, %v2152_v4 }
 0x58c   :  { %v2383_v50 = vadd.f32 %v2959_v16, %v2152_v4 }
 0x58e   :  { %v2960_v29 = vpop.f32.mrb[36].mxu1 }
 0x58f   :  { %v2961_v2 = vpop.f32.mrb[37].mxu1 }
 0x590   :  { %v2962_v37 = vadd.f32 %v2961_v2, %v2960_v29  ;;  %v2963_v47 = vpop.f32.mrb[38].mxu1 }
 0x591   :  { %v2964_v49 = vpop.f32.mrb[39].mxu1 }
 0x592   :  { %v2965_v18 = vadd.f32 %v2964_v49, %v2963_v47  ;;  %v2388_v6 = vadd.f32 %v2962_v37, %v2152_v4 }
 0x594   :  { %v2391_v58 = vadd.f32 %v2965_v18, %v2152_v4  ;;  %v2492_v18 = vsub.s32 7, %v4196_v53 }
 0x5a6   :  { %v2982_v13 = vpop.f32.mrb[40].mxu1 }
 0x5a7   :  { %v2983_v46 = vpop.f32.mrb[41].mxu1 }
 0x5a8   :  { %v2984_v24 = vadd.f32 %v2983_v46, %v2982_v13  ;;  %v2985_v7 = vpop.f32.mrb[42].mxu1 }
 0x5a9   :  { %v2986_v59 = vpop.f32.mrb[43].mxu1 }
 0x5aa   :  { %v2429_v28 = vadd.f32 %v2984_v24, %v2380_v8  ;;  %v2987_v62 = vadd.f32 %v2986_v59, %v2985_v7  ;;  %v70_v8 = vld [vmem:[%s4690_s5 + $0x8] sm:$0x3] }
 0x5ac   :  { %vm2443_vm11 = vcmp.gt.f32.partialorder %v2429_v28, 0.0  ;;  %v2447_v32 = vmul.f32 0.05, %v2429_v28  ;;  %v2432_v17 = vadd.f32 %v2987_v62, %v2383_v50 }
 0x5ae   :  { %v2451_v57 = vsel %vm2443_vm11, %v2429_v28, %v2447_v32  ;;  %vm2444_vm0 = vcmp.gt.f32.partialorder %v2432_v17, 0.0  ;;  %v2448_v22 = vmul.f32 0.05, %v2432_v17  ;;  %v2988_v0 = vpop.f32.mrb[44].mxu1 }
 0x5af   :  { %v2989_v30 = vpop.f32.mrb[45].mxu1  ;;  %v2464_v3 = vmul.f32 %v2451_v57, %v2451_v57 }
 0x5b0   :  { %v2452_v51 = vsel %vm2444_vm0, %v2432_v17, %v2448_v22  ;;  %v2990_v27 = vadd.f32 %v2989_v30, %v2988_v0  ;;  %v2991_v42 = vpop.f32.mrb[46].mxu1 }
 0x5b1   :  { %v2455_v11 = vadd.f32 %v2452_v51, %v2451_v57  ;;  %v2465_v41 = vmul.f32 %v2452_v51, %v2452_v51  ;;  %v2992_v33 = vpop.f32.mrb[47].mxu1 }
 0x5b2   :  { %v2437_v40 = vadd.f32 %v2990_v27, %v2388_v6  ;;  %v2993_v20 = vadd.f32 %v2992_v33, %v2991_v42 }
 0x5b3   :  { %v2468_v31 = vadd.f32 %v2465_v41, %v2464_v3 }
 0x5b4   :  { %vm2445_vm9 = vcmp.gt.f32.partialorder %v2437_v40, 0.0  ;;  %v2449_v10 = vmul.f32 0.05, %v2437_v40  ;;  %v2440_v54 = vadd.f32 %v2993_v20, %v2391_v58 }
 0x5b6   :  { %v2453_v52 = vsel %vm2445_vm9, %v2437_v40, %v2449_v10  ;;  %vm2446_vm2 = vcmp.gt.f32.partialorder %v2440_v54, 0.0  ;;  %v2450_v21 = vmul.f32 0.05, %v2440_v54 }
 0x5b7   :  { %v2456_v56 = vadd.f32 %v2455_v11, %v2453_v52  ;;  %v2466_v1 = vmul.f32 %v2453_v52, %v2453_v52 }
 0x5b8   :  { %v2454_v63 = vsel %vm2446_vm2, %v2440_v54, %v2450_v21 }
 0x5b9   :  { %v2469_v61 = vadd.f32 %v2468_v31, %v2466_v1  ;;  %v2457_v15 = vadd.f32 %v2456_v56, %v2454_v63  ;;  %v2467_v14 = vmul.f32 %v2454_v63, %v2454_v63 }
 0x5bb   :  { %v2458_v26 = vrot.slane %v2457_v15, 4  ;;  %v2470_v39 = vadd.f32 %v2469_v61, %v2467_v14 }
 0x5bd   :  { %v2459_v45 = vadd.f32 %v2458_v26, %v2457_v15  ;;  %v2471_v43 = vrot.slane %v2470_v39, 4 }
 0x5bf   :  { %v2460_v48 = vrot.slane %v2459_v45, 2  ;;  %v2472_v19 = vadd.f32 %v2471_v43, %v2470_v39 }
 0x5c1   :  { %v2461_v35 = vadd.f32 %v2460_v48, %v2459_v45  ;;  %v2473_v5 = vrot.slane %v2472_v19, 2 }
 0x5c3   :  { %v2462_v9 = vrot.slane %v2461_v35, 1  ;;  %v2474_v34 = vadd.f32 %v2473_v5, %v2472_v19 }
 0x5c5   :  { %v2463_v12 = vadd.f32 %v2462_v9, %v2461_v35  ;;  %v2475_v60 = vrot.slane %v2474_v34, 1 }
 0x5c7   :  { %v2476_v38 = vadd.f32 %v2475_v60, %v2474_v34  ;;  %v2477_v16 = vmul.f32 0.03125, %v2463_v12 }
 0x5c9   :  { %v2478_v29 = vmul.f32 0.03125, %v2476_v38  ;;  %v2479_v2 = vmul.f32 %v2477_v16, %v2477_v16 }
 0x5cb   :  { %v2480_v37 = vsub.f32 %v2478_v29, %v2479_v2 }
 0x5cd   :  { %v2481_v47 = vmax.f32 %v2480_v37, 0.0 }
 0x5cf   :  { %v2482_v49 = vadd.f32 1e-05, %v2481_v47 }
 0x5d1   :  { %3292 = vrsqrt.f32 %v2482_v49 }
 0x5db   :  { %v3293_v25 = vpop.eup %3292 }
 0x5dc   :  { %v2484_v4 = vmul.f32 %v4564_v23, %v3293_v25  ;;  %v2525_v23 = vrot.slane %v70_v8, %v1368_v44 }
 0x5de   :  { %v2485_v13 = vmul.f32 %v2484_v4, %v2477_v16  ;;  %v2493_v46 = vrot.slane %v2484_v4, %v2492_v18 }
 0x5e0   :  { %v2487_v24 = vrot.slane %v2485_v13, 7  ;;  %v2494_v7 = vmul.f32 %v2493_v46, %v2451_v57  ;;  %v2495_v59 = vmul.f32 %v2493_v46, %v2452_v51  ;;  %v2496_v50 = vmul.f32 %v2493_v46, %v2453_v52 }
 0x5e1   :  { %v2497_v28 = vmul.f32 %v2493_v46, %v2454_v63 }
 0x5e2   :  { %v2489_v62 = vsub.f32 %v70_v8, %v2487_v24 }
 0x5e4   :  { %v2501_v32 = vrot.slane %v2489_v62, %v869_v36 }
 0x5e6   :  { %v2502_v17 = vadd.f32 %v2501_v32, %v2494_v7  ;;  %v2503_v22 = vadd.f32 %v2501_v32, %v2495_v59  ;;  %v2504_v0 = vadd.f32 %v2501_v32, %v2496_v50  ;;  %v2505_v30 = vadd.f32 %v2501_v32, %v2497_v28 }
 0x5e8   :  { %3090 = vmatprep.mubr.f32.mxu0 %v2502_v17 }
 0x5e9   :  { %3091 = vmatmul.mubr.f32.vlgmr.msra.gmra.mrb[68].mxu0 %v2503_v22 }
 0x5ea   :  { %3093 = vmatprep.mubr.f32.mxu0 %v2504_v0 }
 0x5ed   :  { %3094 = vmatmul.mubr.f32.gmra.mrb[70].mxu0 %v2505_v30 }
 0x6bc   :  { %v3092_v6 = vpop.f32.mrb[68].mxu0 }
 0x6bd   :  { %v2598_v57 = vadd.f32 %v3092_v6, %v2525_v23  ;;  %v2592_v51 = vpop.f32.mrb[69].mxu0 }
 0x6be   :  { %v2593_v27 = vadd.f32 %v2592_v51, %v2525_v23 }
 0x6bf   :  { %v2613_v42 = vsel %vm2611_vm14, %v2598_v57, -1e+30 }
 0x6c0   :  { %2618 = vmax.xlane.f32.xlu0 %v2613_v42  ;;  %v3095_v36 = vpop.f32.mrb[70].mxu0  ;;  %v2612_v3 = vsel %vm2611_vm14, %v2593_v27, -1e+30 }
 0x6c1   :  { %v2608_v11 = vadd.f32 %v3095_v36, %v2525_v23  ;;  %v2602_v41 = vpop.f32.mrb[71].mxu0  ;;  %2616 = vmax.xlane.f32.xlu1 %v2612_v3 }
 0x6c2   :  { %v2603_v33 = vadd.f32 %v2602_v41, %v2525_v23 }
 0x6c3   :  { %v2615_v58 = vsel %vm2611_vm14, %v2608_v11, -1e+30 }
 0x6c4   :  { %v2614_v40 = vsel %vm2611_vm14, %v2603_v33, -1e+30 }
 0x6c5   :  { %2620 = vmax.xlane.f32.xlu0 %v2614_v40  ;;  %2622 = vmax.xlane.f32.xlu1 %v2615_v58 }
 0x74d   :  { %v2619_v53 = vpop.xlane.xlu0 %2618 }
 0x74e   :  { %v2625_v44 = vsub.f32 %v2613_v42, %v2619_v53  ;;  %v2617_v20 = vpop.xlane.xlu1 %2616 }
 0x74f   :  { %v2624_v31 = vsub.f32 %v2612_v3, %v2617_v20 }
 0x750   :  { %v2630_v55 = vmul.f32 1.442695, %v2625_v44 }
 0x751   :  { %v2628_v10 = vmul.f32 1.442695, %v2624_v31 }
 0x752   :  { %3294 = vpow2.f32 %v2630_v55  ;;  %v2621_v54 = vpop.xlane.xlu0 %2620  ;;  %v2623_v52 = vpop.xlane.xlu1 %2622 }
 0x753   :  { %3296 = vpow2.f32 %v2628_v10  ;;  %v2626_v21 = vsub.f32 %v2614_v40, %v2621_v54  ;;  %v2627_v56 = vsub.f32 %v2615_v58, %v2623_v52 }
 0x755   :  { %v2632_v1 = vmul.f32 1.442695, %v2626_v21  ;;  %v2634_v63 = vmul.f32 1.442695, %v2627_v56 }
 0x757   :  { %3298 = vpow2.f32 %v2632_v1 }
 0x758   :  { %3300 = vpow2.f32 %v2634_v63 }
 0x75c   :  { %v3295_v61 = vpop.eup %3294 }
 0x75d   :  { %v3297_v15 = vpop.eup %3296  ;;  %2638 = vadd.xlane.f32.xlu1 %v3295_v61 }
 0x75e   :  { %2636 = vadd.xlane.f32.xlu0 %v3297_v15 }
 0x761   :  { %v3299_v14 = vpop.eup %3298 }
 0x762   :  { %v3301_v26 = vpop.eup %3300  ;;  %2640 = vadd.xlane.f32.xlu0 %v3299_v14 }
 0x763   :  { %2642 = vadd.xlane.f32.xlu1 %v3301_v26 }
 0x7ea   :  { %v2639_v39 = vpop.xlane.xlu1 %2638 }
 0x7eb   :  { %3302 = vlog2.f32 %v2639_v39  ;;  %v2637_v45 = vpop.xlane.xlu0 %2636 }
 0x7ec   :  { %3304 = vlog2.f32 %v2637_v45 }
 0x7ef   :  { %v2641_v43 = vpop.xlane.xlu0 %2640 }
 0x7f0   :  { %3306 = vlog2.f32 %v2641_v43  ;;  %v2643_v48 = vpop.xlane.xlu1 %2642 }
 0x7f1   :  { %3308 = vlog2.f32 %v2643_v48 }
 0x7f5   :  { %v3303_v19 = vpop.eup %3302 }
 0x7f6   :  { %v3305_v35 = vpop.eup %3304  ;;  %v2647_v5 = vmul.f32 0.6931472, %v3303_v19 }
 0x7f7   :  { %v2645_v9 = vmul.f32 0.6931472, %v3305_v35 }
 0x7f8   :  { %v2653_v34 = vsub.f32 %v2625_v44, %v2647_v5 }
 0x7f9   :  { %v2652_v12 = vsub.f32 %v2624_v31, %v2645_v9 }
 0x7fa   :  { %v3307_v60 = vpop.eup %3306  ;;  %2657 = vst [vmem:[%s4691_s6 + $0x8] sm:$0xff] %v2653_v34 }
 0x7fb   :  { %v3309_v38 = vpop.eup %3308  ;;  %2656 = vst [vmem:[%s4691_s6] sm:$0xff] %v2652_v12  ;;  %v2649_v16 = vmul.f32 0.6931472, %v3307_v60 }
 0x7fc   :  { %v2651_v29 = vmul.f32 0.6931472, %v3309_v38 }
 0x7fd   :  { %v2654_v2 = vsub.f32 %v2626_v21, %v2649_v16 }
 0x7fe   :  { %v2655_v37 = vsub.f32 %v2627_v56, %v2651_v29 }
 0x7ff   :  { %2658 = vst [vmem:[%s4691_s6 + $0x10] sm:$0xff] %v2654_v2 }
 0x800   :  { %2659 = vst [vmem:[%s4691_s6 + $0x18] sm:$0xff] %v2655_v37 }
 0x801   :  { %2664 = vsyncpa [#allocation3], 1 }
 0x802   :  { %2665 = vsyncpa [#allocation5], 1 }

</bundles_post_ra>
